<compile_context>
chip_gen: v6e
topology: v6e:2x2x1
jax: 0.10.0
libtpu: 0.0.40
codegen_flags: <defaults>
</compile_context>

<pallas_src>
import jax
import jax.numpy as jnp
from jax import lax
from jax.experimental import pallas as pl
from jax.experimental.pallas import tpu as pltpu

_VMEM_LIMIT = 32 * 1024 * 1024   # <= 64 MiB physical VMEM on v7x
_CPAD = 128                      # lane-dense channel count for conv outputs


# ----------------------------------------------------------------------------
# Pallas kernels
# ----------------------------------------------------------------------------
def _conv_pool_kernel(p_ref, w_ref, b_ref, o_ref):
    """Fused Conv2d(k=2, s=1, valid) + MaxPool2d(2) for one batch element.

    p_ref : (1, hp*wp, 9*Cin) f32   3x3 input patch feeding each pooled output
    w_ref : (9*Cin, 4*Cout)   bf16  the 4 pool-slot weights concatenated on N
    b_ref : (1, Cout)         f32
    o_ref : (1, hp*wp, Cout)  f32
    """
    patches = p_ref[0].astype(jnp.bfloat16)                         # (M, K)
    # Single MXU matmul (N = 4*Cout = 512 fills the 2x256 MXU), f32 accumulate.
    c = jnp.dot(patches, w_ref[...], preferred_element_type=jnp.float32)
    cout = o_ref.shape[-1]
    # MaxPool2d(2): max over the four pool-slot column groups (128-lane aligned
    # slices are free).  Bias is added AFTER the max — valid only because it is
    # a per-channel constant (max(a) + b == max(a + b)); keep that invariant.
    pooled = c[:, 0:cout]
    for s in range(1, 4):
        pooled = jnp.maximum(pooled, c[:, s * cout:(s + 1) * cout])
    o_ref[0] = (pooled + b_ref[...]).astype(o_ref.dtype)


def _fused_fc_kernel(x_ref, w1_ref, b1_ref, w2_ref, b2_ref, w3_ref, b3_ref, o_ref):
    """fc1+ReLU -> fc2+ReLU -> fc3 in one kernel; intermediates stay in VMEM.

    Weights are bf16 (halves the dominant fc1 HBM transfer); matmuls accumulate
    in f32, bias adds and ReLUs stay f32.
    """
    h = jnp.dot(x_ref[...].astype(jnp.bfloat16), w1_ref[...],
                preferred_element_type=jnp.float32) + b1_ref[...]
    h = jnp.maximum(h, 0.0)
    h = jnp.dot(h.astype(jnp.bfloat16), w2_ref[...],
                preferred_element_type=jnp.float32) + b2_ref[...]
    h = jnp.maximum(h, 0.0)
    o = jnp.dot(h.astype(jnp.bfloat16), w3_ref[...],
                preferred_element_type=jnp.float32) + b3_ref[...]
    o_ref[...] = o.astype(o_ref.dtype)


# ----------------------------------------------------------------------------
# Pallas wrappers
# ----------------------------------------------------------------------------
def pallas_conv_pool(patches, w_merged, b_row):
    """patches: (N, M, K) f32; w_merged: (K, 4*Cout) bf16; b_row: (1, Cout) f32."""
    n, m, k = patches.shape
    cout = b_row.shape[1]
    assert w_merged.shape == (k, 4 * cout), (w_merged.shape, k, cout)
    return pl.pallas_call(
        _conv_pool_kernel,
        out_shape=jax.ShapeDtypeStruct((n, m, cout), jnp.float32),
        grid=(n,),
        in_specs=[
            # One image per grid step; batch=2 maps 1:1 onto v7x's 2 TensorCores.
            # TODO(synk): for large batches pack >=2 images per step to raise
            #             MXU M-occupancy and amortize the ~0.35us step cost.
            pl.BlockSpec((1, m, k), lambda i: (i, 0, 0)),
            # Constant block index -> weight/bias DMA'd once, kept resident.
            pl.BlockSpec((k, 4 * cout), lambda i: (0, 0)),
            pl.BlockSpec((1, cout), lambda i: (0, 0)),
        ],
        out_specs=pl.BlockSpec((1, m, cout), lambda i: (i, 0, 0)),
        compiler_params=pltpu.CompilerParams(
            dimension_semantics=("parallel",),
            vmem_limit_bytes=_VMEM_LIMIT,
        ),
    )(patches, w_merged, b_row)


def pallas_fused_fc(x, w1, b1, w2, b2, w3, b3):
    """Grid-less call: every operand is whole-array, SINGLE-buffered in VMEM
    (no double-buffering of the 3.2 MiB bf16 fc1 weight -> v7x VMEM headroom)."""
    m = x.shape[0]
    n3 = w3.shape[1]
    return pl.pallas_call(
        _fused_fc_kernel,
        out_shape=jax.ShapeDtypeStruct((m, n3), jnp.float32),
        compiler_params=pltpu.CompilerParams(vmem_limit_bytes=_VMEM_LIMIT),
    )(x, w1, b1, w2, b2, w3, b3)


# ----------------------------------------------------------------------------
# XLA glue (cheap at these sizes): pooled-window patch extraction
# ----------------------------------------------------------------------------
def build_pool_patches(x_nhwc):
    """(N, H, W, C) -> (N, hp*wp, 9*C): the 3x3 input window that feeds each
    pooled output of Conv2d(k=2, s=1, valid) + MaxPool2d(2) (floor)."""
    n, h, w, c = x_nhwc.shape
    hp, wp = (h - 1) // 2, (w - 1) // 2
    slabs = [
        x_nhwc[:, a : a + 2 * hp : 2, b : b + 2 * wp : 2, :]
        for a in range(3)
        for b in range(3)
    ]
    patches = jnp.stack(slabs, axis=3)               # (N, hp, wp, 9, C)
    return patches.reshape(n, hp * wp, 9 * c), hp, wp


# ----------------------------------------------------------------------------
# Parameters: raw torch-shaped init + one-time re-layout
# ----------------------------------------------------------------------------
def init_raw_params(key):
    """Synthetic parameters with the exact shapes declared in ArchB.__init__."""
    def uniform(k, shape, fan_in):
        bound = 1.0 / jnp.sqrt(jnp.float32(fan_in))
        return jax.random.uniform(k, shape, jnp.float32, -bound, bound)

    ks = jax.random.split(key, 10)
    return {
        "conv1_w": uniform(ks[0], (32, 3, 2, 2), 3 * 4),
        "conv1_b": uniform(ks[1], (32,), 3 * 4),
        "conv2_w": uniform(ks[2], (128, 64, 2, 2), 64 * 4),
        "conv2_b": uniform(ks[3], (128,), 64 * 4),
        "fc1_w": uniform(ks[4], (256, 128 * 7 * 7), 128 * 7 * 7),
        "fc1_b": uniform(ks[5], (256,), 128 * 7 * 7),
        "fc2_w": uniform(ks[6], (256, 256), 256),
        "fc2_b": uniform(ks[7], (256,), 256),
        "fc3_w": uniform(ks[8], (10, 256), 256),
        "fc3_b": uniform(ks[9], (10,), 256),
    }


def _pooled_conv_weight(w, cin_take, cout_pad):
    """(Cout, Cin, 2, 2) torch conv weight -> (9*cin_take, 4*cout_pad) bf16:
    the four 2x2 max-pool window slots' (K, Cout) matrices concatenated along
    the output dim, rows laid out to match build_pool_patches' (a*3+b, ci)
    ordering.  Only the first `cin_take` input channels are used."""
    cout = w.shape[0]
    wt = jnp.transpose(w[:, :cin_take], (2, 3, 1, 0)).astype(jnp.float32)  # (2,2,ci,co)
    wt = jnp.pad(wt, ((0, 0), (0, 0), (0, 0), (0, cout_pad - cout)))
    out = jnp.zeros((9 * cin_take, 4 * cout_pad), jnp.float32)
    for p in (0, 1):
        for q in (0, 1):
            slot = p * 2 + q
            for dh in (0, 1):
                for dw in (0, 1):
                    idx = (p + dh) * 3 + (q + dw)
                    out = out.at[idx * cin_take:(idx + 1) * cin_take,
                                 slot * cout_pad:(slot + 1) * cout_pad].set(wt[dh, dw])
    return out.astype(jnp.bfloat16)


def prepare_params(raw):
    """One-time (outside jit) re-layout: no transposes/pads/casts in the hot path."""
    # conv1: pad Cout 32 -> 128 so the fused conv/pool store is lane-dense; the
    # extra channels are exact zeros and are sliced away before conv2.
    w1c = _pooled_conv_weight(raw["conv1_w"], cin_take=3, cout_pad=_CPAD)
    b1c = jnp.pad(raw["conv1_b"], (0, _CPAD - raw["conv1_b"].shape[0]))
    # conv2: declared 64 in-channels, but conv1 only supplies 32 -> use the first
    # 32 columns of the declared weight (== zero-padding the activation).
    # TODO(synk): conv1 out-channels (32) != conv2 in-channels (64) in the
    #             reference module (it cannot run in torch as written).
    w2c = _pooled_conv_weight(raw["conv2_w"], cin_take=32, cout_pad=_CPAD)
    # fc1: permute rows from torch NCHW-flatten order to our NHWC-flatten order
    # (kills the runtime activation transpose); stored as (K, N) bf16.
    C, H, W = _CPAD, 7, 7
    hh, ww, cc = jnp.meshgrid(jnp.arange(H), jnp.arange(W), jnp.arange(C), indexing="ij")
    nchw_index = (cc * (H * W) + hh * W + ww).reshape(-1)          # NHWC order -> NCHW idx
    w_fc1 = raw["fc1_w"].T[nchw_index]                             # (6272, 256)
    # fc3: pad output 10 -> 128 for a lane-dense final store; sliced in the wrapper.
    w_fc3 = jnp.pad(raw["fc3_w"].T, ((0, 0), (0, _CPAD - 10)))
    b_fc3 = jnp.pad(raw["fc3_b"], (0, _CPAD - 10))
    return {
        "conv1_w4": w1c, "conv1_b": b1c.reshape(1, -1),
        "conv2_w4": w2c, "conv2_b": raw["conv2_b"].reshape(1, -1),
        "fc1_w": w_fc1.astype(jnp.bfloat16), "fc1_b": raw["fc1_b"].reshape(1, -1),
        "fc2_w": raw["fc2_w"].T.astype(jnp.bfloat16), "fc2_b": raw["fc2_b"].reshape(1, -1),
        "fc3_w": w_fc3.astype(jnp.bfloat16), "fc3_b": b_fc3.reshape(1, -1),
    }


# ----------------------------------------------------------------------------
# ArchB forward
# ----------------------------------------------------------------------------
@jax.jit
def archb_forward(params, x_nchw):
    x = jnp.transpose(x_nchw, (0, 2, 3, 1)).astype(jnp.float32)     # NCHW -> NHWC
    n = x.shape[0]

    # conv1 + MaxPool2d(2): one (225,27)x(27,512) bf16 matmul per image.
    p1, hp1, wp1 = build_pool_patches(x)                            # (N, 225, 27)
    y1 = pallas_conv_pool(p1, params["conv1_w4"], params["conv1_b"])
    # Keep only the 32 real channels so conv2 does not stream 96 zero channels.
    y1 = y1.reshape(n, hp1, wp1, _CPAD)[..., :32]                   # (N, 15, 15, 32)

    # conv2 + MaxPool2d(2): one (49,288)x(288,512) bf16 matmul per image.
    p2, hp2, wp2 = build_pool_patches(y1)                           # (N, 49, 288)
    y2 = pallas_conv_pool(p2, params["conv2_w4"], params["conv2_b"])  # (N, 49, 128)

    # NHWC flatten is a free metadata reshape; fc1 rows were pre-permuted to
    # match torch's NCHW flatten.
    feats = y2.reshape(n, hp2 * wp2 * _CPAD)                        # (N, 6272)

    # fc1+ReLU -> fc2+ReLU -> fc3 in one grid-less pallas_call (bf16 weights
    # single-buffered whole-array in VMEM); fc3 padded to 128 lanes, sliced here.
    logits = pallas_fused_fc(feats,
                             params["fc1_w"], params["fc1_b"],
                             params["fc2_w"], params["fc2_b"],
                             params["fc3_w"], params["fc3_b"])
    return logits[:, :10]


# ----------------------------------------------------------------------------
# Pure-JAX reference (same conv2 32-channel bridge) for correctness checks
# ----------------------------------------------------------------------------
def archb_reference(raw, x_nchw, *, weight_dtype=jnp.bfloat16):
    """With weight_dtype=bf16 this mirrors the kernel's matmul precision exactly
    (bf16 inputs, f32 accumulation) so a tight tolerance catches layout bugs;
    with weight_dtype=f32 it is the plain full-precision reference."""
    wd = weight_dtype
    x = x_nchw.astype(jnp.float32)

    def conv(v, w, b):
        y = lax.conv_general_dilated(
            v.astype(wd), w.astype(wd), (1, 1), "VALID",
            dimension_numbers=("NCHW", "OIHW", "NCHW"),
            preferred_element_type=jnp.float32)
        return y + b.reshape(1, -1, 1, 1)

    def pool(v):
        return lax.reduce_window(v, -jnp.inf, lax.max,
                                 (1, 1, 2, 2), (1, 1, 2, 2), "VALID")

    def fc(v, w, b):
        return jnp.dot(v.astype(wd), w.T.astype(wd),
                       preferred_element_type=jnp.float32) + b

    x = pool(conv(x, raw["conv1_w"], raw["conv1_b"]))
    x = pool(conv(x, raw["conv2_w"][:, :32], raw["conv2_b"]))
    x = x.reshape(x.shape[0], -1)
    x = jnp.maximum(fc(x, raw["fc1_w"], raw["fc1_b"]), 0.0)
    x = jnp.maximum(fc(x, raw["fc2_w"], raw["fc2_b"]), 0.0)
    return fc(x, raw["fc3_w"], raw["fc3_b"])


if __name__ == "__main__":
    key = jax.random.PRNGKey(0)
    pkey, xkey = jax.random.split(key)
    raw = init_raw_params(pkey)
    params = prepare_params(raw)

    # fc1 = Linear(128*7*7, .) implies 32x32 input: 32 -conv-> 31 -pool-> 15 -conv-> 14 -pool-> 7
    x = jax.random.normal(xkey, (2, 3, 32, 32), jnp.float32)

    out = jax.block_until_ready(archb_forward(params, x))
    assert out.shape == (2, 10), out.shape
    assert bool(jnp.all(jnp.isfinite(out)))

    # Tight check vs the precision-matched (bf16-input / f32-accumulate) reference.
    ref = jax.block_until_ready(archb_reference(raw, x, weight_dtype=jnp.bfloat16))
    err = float(jnp.max(jnp.abs(out - ref)))
    assert jnp.allclose(out, ref, atol=2e-3, rtol=2e-2), err

    # Looser fidelity check vs the all-f32 reference (bounds bf16 weight error).
    ref32 = jax.block_until_ready(archb_reference(raw, x, weight_dtype=jnp.float32))
    err32 = float(jnp.max(jnp.abs(out - ref32)))
    assert jnp.allclose(out, ref32, atol=3e-2, rtol=5e-2), err32

    print("KERNEL_OK")
</pallas_src>

<mosaic_0001>
module attributes {stable_mosaic.version = 11 : i64} {
  func.func @_conv_pool_kernel(%arg0: i32, %arg1: memref<1x225x27xf32, #tpu.memory_space<vmem>>, %arg2: memref<27x512xbf16, #tpu.memory_space<vmem>>, %arg3: memref<1x128xf32, #tpu.memory_space<vmem>>, %arg4: memref<1x225x128xf32, #tpu.memory_space<vmem>>) attributes {dimension_semantics = [#tpu.dimension_semantics<parallel>], iteration_bounds = array<i64: 2>, scalar_prefetch = 0 : i64, scratch_operands = 0 : i64, tpu.core_type = #tpu.core_type<tc>, window_params = [{transform_indices = @transform_0, window_bounds = array<i64: 1, 225, 27>}, {pipeline_mode = #tpu.pipeline_mode<synchronous>, transform_indices = @transform_1, window_bounds = array<i64: 27, 512>}, {pipeline_mode = #tpu.pipeline_mode<synchronous>, transform_indices = @transform_2, window_bounds = array<i64: 1, 128>}, {transform_indices = @transform_3, window_bounds = array<i64: 1, 225, 128>}]} {
    %c0 = arith.constant 0 : index
    %c0_0 = arith.constant 0 : index
    %c0_1 = arith.constant 0 : index
    %0 = vector.load %arg1[%c0, %c0_0, %c0_1] : memref<1x225x27xf32, #tpu.memory_space<vmem>>, vector<1x225x27xf32>
    %1 = vector.shape_cast %0 : vector<1x225x27xf32> to vector<225x27xf32>
    %2 = arith.truncf %1 : vector<225x27xf32> to vector<225x27xbf16>
    %c0_2 = arith.constant 0 : index
    %c0_3 = arith.constant 0 : index
    %3 = vector.load %arg2[%c0_2, %c0_3] : memref<27x512xbf16, #tpu.memory_space<vmem>>, vector<27x512xbf16>
    %cst = arith.constant dense<0.000000e+00> : vector<225x512xf32>
    %4 = tpu.matmul %2, %3, %cst {dimension_numbers = #tpu.dot_dimension_numbers<[1], [0], [0], [1], [0, 0, 1, 1], [], []>} : vector<225x27xbf16>, vector<27x512xbf16>, vector<225x512xf32> -> vector<225x512xf32>
    %5 = vector.extract_strided_slice %4 {offsets = [0, 0], sizes = [225, 128], strides = [1, 1]} : vector<225x512xf32> to vector<225x128xf32>
    %6 = vector.extract_strided_slice %4 {offsets = [0, 128], sizes = [225, 128], strides = [1, 1]} : vector<225x512xf32> to vector<225x128xf32>
    %7 = arith.maximumf %5, %6 : vector<225x128xf32>
    %8 = vector.extract_strided_slice %4 {offsets = [0, 256], sizes = [225, 128], strides = [1, 1]} : vector<225x512xf32> to vector<225x128xf32>
    %9 = arith.maximumf %7, %8 : vector<225x128xf32>
    %10 = vector.extract_strided_slice %4 {offsets = [0, 384], sizes = [225, 128], strides = [1, 1]} : vector<225x512xf32> to vector<225x128xf32>
    %11 = arith.maximumf %9, %10 : vector<225x128xf32>
    %c0_4 = arith.constant 0 : index
    %c0_5 = arith.constant 0 : index
    %12 = vector.load %arg3[%c0_4, %c0_5] : memref<1x128xf32, #tpu.memory_space<vmem>>, vector<1x128xf32>
    %13 = vector.broadcast %12 : vector<1x128xf32> to vector<225x128xf32>
    %14 = arith.addf %11, %13 : vector<225x128xf32>
    %c0_6 = arith.constant 0 : index
    %c0_7 = arith.constant 0 : index
    %c0_8 = arith.constant 0 : index
    %15 = vector.load %arg4[%c0_6, %c0_7, %c0_8] : memref<1x225x128xf32, #tpu.memory_space<vmem>>, vector<1x225x128xf32>
    %16 = vector.shape_cast %15 : vector<1x225x128xf32> to vector<225x128xf32>
    %17 = vector.shape_cast %14 : vector<225x128xf32> to vector<1x225x128xf32>
    tpu.vector_store %arg4[%c0_6, %c0_7, %c0_8], %17 {strides = array<i32>} : memref<1x225x128xf32, #tpu.memory_space<vmem>>, vector<1x225x128xf32>,
    return
  }
  func.func @transform_0(%arg0: i32) -> (i32, i32, i32) {
    %c0_i32 = arith.constant 0 : i32
    %c0_i32_0 = arith.constant 0 : i32
    %c0_i32_1 = arith.constant 0 : i32
    return %arg0, %c0_i32, %c0_i32_0 : i32, i32, i32
  }
  func.func @transform_1(%arg0: i32) -> (i32, i32) {
    %c0_i32 = arith.constant 0 : i32
    %c0_i32_0 = arith.constant 0 : i32
    %c0_i32_1 = arith.constant 0 : i32
    return %c0_i32, %c0_i32_0 : i32, i32
  }
  func.func @transform_2(%arg0: i32) -> (i32, i32) {
    %c0_i32 = arith.constant 0 : i32
    %c0_i32_0 = arith.constant 0 : i32
    %c0_i32_1 = arith.constant 0 : i32
    return %c0_i32, %c0_i32_0 : i32, i32
  }
  func.func @transform_3(%arg0: i32) -> (i32, i32, i32) {
    %c0_i32 = arith.constant 0 : i32
    %c0_i32_0 = arith.constant 0 : i32
    %c0_i32_1 = arith.constant 0 : i32
    return %arg0, %c0_i32, %c0_i32_0 : i32, i32, i32
  }
}

module attributes {stable_mosaic.version = 11 : i64} {
  func.func @_conv_pool_kernel(%arg0: i32, %arg1: memref<1x49x288xf32, #tpu.memory_space<vmem>>, %arg2: memref<288x512xbf16, #tpu.memory_space<vmem>>, %arg3: memref<1x128xf32, #tpu.memory_space<vmem>>, %arg4: memref<1x49x128xf32, #tpu.memory_space<vmem>>) attributes {dimension_semantics = [#tpu.dimension_semantics<parallel>], iteration_bounds = array<i64: 2>, scalar_prefetch = 0 : i64, scratch_operands = 0 : i64, tpu.core_type = #tpu.core_type<tc>, window_params = [{transform_indices = @transform_0, window_bounds = array<i64: 1, 49, 288>}, {pipeline_mode = #tpu.pipeline_mode<synchronous>, transform_indices = @transform_1, window_bounds = array<i64: 288, 512>}, {pipeline_mode = #tpu.pipeline_mode<synchronous>, transform_indices = @transform_2, window_bounds = array<i64: 1, 128>}, {transform_indices = @transform_3, window_bounds = array<i64: 1, 49, 128>}]} {
    %c0 = arith.constant 0 : index
    %c0_0 = arith.constant 0 : index
    %c0_1 = arith.constant 0 : index
    %0 = vector.load %arg1[%c0, %c0_0, %c0_1] : memref<1x49x288xf32, #tpu.memory_space<vmem>>, vector<1x49x288xf32>
    %1 = vector.shape_cast %0 : vector<1x49x288xf32> to vector<49x288xf32>
    %2 = arith.truncf %1 : vector<49x288xf32> to vector<49x288xbf16>
    %c0_2 = arith.constant 0 : index
    %c0_3 = arith.constant 0 : index
    %3 = vector.load %arg2[%c0_2, %c0_3] : memref<288x512xbf16, #tpu.memory_space<vmem>>, vector<288x512xbf16>
    %cst = arith.constant dense<0.000000e+00> : vector<49x512xf32>
    %4 = tpu.matmul %2, %3, %cst {dimension_numbers = #tpu.dot_dimension_numbers<[1], [0], [0], [1], [0, 0, 1, 1], [], []>} : vector<49x288xbf16>, vector<288x512xbf16>, vector<49x512xf32> -> vector<49x512xf32>
    %5 = vector.extract_strided_slice %4 {offsets = [0, 0], sizes = [49, 128], strides = [1, 1]} : vector<49x512xf32> to vector<49x128xf32>
    %6 = vector.extract_strided_slice %4 {offsets = [0, 128], sizes = [49, 128], strides = [1, 1]} : vector<49x512xf32> to vector<49x128xf32>
    %7 = arith.maximumf %5, %6 : vector<49x128xf32>
    %8 = vector.extract_strided_slice %4 {offsets = [0, 256], sizes = [49, 128], strides = [1, 1]} : vector<49x512xf32> to vector<49x128xf32>
    %9 = arith.maximumf %7, %8 : vector<49x128xf32>
    %10 = vector.extract_strided_slice %4 {offsets = [0, 384], sizes = [49, 128], strides = [1, 1]} : vector<49x512xf32> to vector<49x128xf32>
    %11 = arith.maximumf %9, %10 : vector<49x128xf32>
    %c0_4 = arith.constant 0 : index
    %c0_5 = arith.constant 0 : index
    %12 = vector.load %arg3[%c0_4, %c0_5] : memref<1x128xf32, #tpu.memory_space<vmem>>, vector<1x128xf32>
    %13 = vector.broadcast %12 : vector<1x128xf32> to vector<49x128xf32>
    %14 = arith.addf %11, %13 : vector<49x128xf32>
    %c0_6 = arith.constant 0 : index
    %c0_7 = arith.constant 0 : index
    %c0_8 = arith.constant 0 : index
    %15 = vector.load %arg4[%c0_6, %c0_7, %c0_8] : memref<1x49x128xf32, #tpu.memory_space<vmem>>, vector<1x49x128xf32>
    %16 = vector.shape_cast %15 : vector<1x49x128xf32> to vector<49x128xf32>
    %17 = vector.shape_cast %14 : vector<49x128xf32> to vector<1x49x128xf32>
    tpu.vector_store %arg4[%c0_6, %c0_7, %c0_8], %17 {strides = array<i32>} : memref<1x49x128xf32, #tpu.memory_space<vmem>>, vector<1x49x128xf32>,
    return
  }
  func.func @transform_0(%arg0: i32) -> (i32, i32, i32) {
    %c0_i32 = arith.constant 0 : i32
    %c0_i32_0 = arith.constant 0 : i32
    %c0_i32_1 = arith.constant 0 : i32
    return %arg0, %c0_i32, %c0_i32_0 : i32, i32, i32
  }
  func.func @transform_1(%arg0: i32) -> (i32, i32) {
    %c0_i32 = arith.constant 0 : i32
    %c0_i32_0 = arith.constant 0 : i32
    %c0_i32_1 = arith.constant 0 : i32
    return %c0_i32, %c0_i32_0 : i32, i32
  }
  func.func @transform_2(%arg0: i32) -> (i32, i32) {
    %c0_i32 = arith.constant 0 : i32
    %c0_i32_0 = arith.constant 0 : i32
    %c0_i32_1 = arith.constant 0 : i32
    return %c0_i32, %c0_i32_0 : i32, i32
  }
  func.func @transform_3(%arg0: i32) -> (i32, i32, i32) {
    %c0_i32 = arith.constant 0 : i32
    %c0_i32_0 = arith.constant 0 : i32
    %c0_i32_1 = arith.constant 0 : i32
    return %arg0, %c0_i32, %c0_i32_0 : i32, i32, i32
  }
}

module attributes {stable_mosaic.version = 11 : i64} {
  func.func @_fused_fc_kernel(%arg0: memref<2x6272xf32, #tpu.memory_space<vmem>>, %arg1: memref<6272x256xbf16, #tpu.memory_space<vmem>>, %arg2: memref<1x256xf32, #tpu.memory_space<vmem>>, %arg3: memref<256x256xbf16, #tpu.memory_space<vmem>>, %arg4: memref<1x256xf32, #tpu.memory_space<vmem>>, %arg5: memref<256x128xbf16, #tpu.memory_space<vmem>>, %arg6: memref<1x128xf32, #tpu.memory_space<vmem>>, %arg7: memref<2x128xf32, #tpu.memory_space<vmem>>) attributes {dimension_semantics = [], scalar_prefetch = 0 : i64, scratch_operands = 0 : i64, tpu.core_type = #tpu.core_type<tc>} {
    %c0 = arith.constant 0 : index
    %c0_0 = arith.constant 0 : index
    %0 = vector.load %arg0[%c0, %c0_0] : memref<2x6272xf32, #tpu.memory_space<vmem>>, vector<2x6272xf32>
    %1 = arith.truncf %0 : vector<2x6272xf32> to vector<2x6272xbf16>
    %c0_1 = arith.constant 0 : index
    %c0_2 = arith.constant 0 : index
    %2 = vector.load %arg1[%c0_1, %c0_2] : memref<6272x256xbf16, #tpu.memory_space<vmem>>, vector<6272x256xbf16>
    %cst = arith.constant dense<0.000000e+00> : vector<2x256xf32>
    %3 = tpu.matmul %1, %2, %cst {dimension_numbers = #tpu.dot_dimension_numbers<[1], [0], [0], [1], [0, 0, 1, 1], [], []>} : vector<2x6272xbf16>, vector<6272x256xbf16>, vector<2x256xf32> -> vector<2x256xf32>
    %c0_3 = arith.constant 0 : index
    %c0_4 = arith.constant 0 : index
    %4 = vector.load %arg2[%c0_3, %c0_4] : memref<1x256xf32, #tpu.memory_space<vmem>>, vector<1x256xf32>
    %5 = vector.broadcast %4 : vector<1x256xf32> to vector<2x256xf32>
    %6 = arith.addf %3, %5 : vector<2x256xf32>
    %cst_5 = arith.constant 0.000000e+00 : f32
    %7 = vector.broadcast %cst_5 : f32 to vector<2x256xf32>
    %8 = arith.maximumf %6, %7 : vector<2x256xf32>
    %9 = arith.truncf %8 : vector<2x256xf32> to vector<2x256xbf16>
    %c0_6 = arith.constant 0 : index
    %c0_7 = arith.constant 0 : index
    %10 = vector.load %arg3[%c0_6, %c0_7] : memref<256x256xbf16, #tpu.memory_space<vmem>>, vector<256x256xbf16>
    %cst_8 = arith.constant dense<0.000000e+00> : vector<2x256xf32>
    %11 = tpu.matmul %9, %10, %cst_8 {dimension_numbers = #tpu.dot_dimension_numbers<[1], [0], [0], [1], [0, 0, 1, 1], [], []>} : vector<2x256xbf16>, vector<256x256xbf16>, vector<2x256xf32> -> vector<2x256xf32>
    %c0_9 = arith.constant 0 : index
    %c0_10 = arith.constant 0 : index
    %12 = vector.load %arg4[%c0_9, %c0_10] : memref<1x256xf32, #tpu.memory_space<vmem>>, vector<1x256xf32>
    %13 = vector.broadcast %12 : vector<1x256xf32> to vector<2x256xf32>
    %14 = arith.addf %11, %13 : vector<2x256xf32>
    %cst_11 = arith.constant 0.000000e+00 : f32
    %15 = vector.broadcast %cst_11 : f32 to vector<2x256xf32>
    %16 = arith.maximumf %14, %15 : vector<2x256xf32>
    %17 = arith.truncf %16 : vector<2x256xf32> to vector<2x256xbf16>
    %c0_12 = arith.constant 0 : index
    %c0_13 = arith.constant 0 : index
    %18 = vector.load %arg5[%c0_12, %c0_13] : memref<256x128xbf16, #tpu.memory_space<vmem>>, vector<256x128xbf16>
    %cst_14 = arith.constant dense<0.000000e+00> : vector<2x128xf32>
    %19 = tpu.matmul %17, %18, %cst_14 {dimension_numbers = #tpu.dot_dimension_numbers<[1], [0], [0], [1], [0, 0, 1, 1], [], []>} : vector<2x256xbf16>, vector<256x128xbf16>, vector<2x128xf32> -> vector<2x128xf32>
    %c0_15 = arith.constant 0 : index
    %c0_16 = arith.constant 0 : index
    %20 = vector.load %arg6[%c0_15, %c0_16] : memref<1x128xf32, #tpu.memory_space<vmem>>, vector<1x128xf32>
    %21 = vector.broadcast %20 : vector<1x128xf32> to vector<2x128xf32>
    %22 = arith.addf %19, %21 : vector<2x128xf32>
    %c0_17 = arith.constant 0 : index
    %c0_18 = arith.constant 0 : index
    %23 = vector.load %arg7[%c0_17, %c0_18] : memref<2x128xf32, #tpu.memory_space<vmem>>, vector<2x128xf32>
    tpu.vector_store %arg7[%c0_17, %c0_18], %22 {strides = array<i32>} : memref<2x128xf32, #tpu.memory_space<vmem>>, vector<2x128xf32>,
    return
  }
}

</mosaic_0001>

<bundles_post_ra>
// kernel: archb_forward.3
= control target key start
LH: loop header
LB: loop body
LE: loop exit
PB: predicated region body
PF: predicated region fallthrough
CT: control target
= control target key end

     0   :  { %s992_s12 = smov 0   ;;  %s1200_s0 = inlined_call_operand.vmem [shape: f32[2,225,27], index: 0, kind: input, shape index: {}]   ;;  %s1201_s1 = inlined_call_operand.vmem [shape: bf16[27,512], index: 1, kind: input, shape index: {}]   ;;  %s1202_s2 = inlined_call_operand.vmem [shape: f32[1,128], index: 2, kind: input, shape index: {}]   ;;  %s1203_s3 = inlined_call_operand.vmem [shape: f32[2,225,128], index: 3, kind: output, shape index: {}]  }
   0x1 LB: > { %s891_s13 = sadd.s32 4294967295, %s968_s12   ;;  %p895_p0 = scmp.ge.s32.totalorder %s968_s12, 1  ;;  %s968_s12 = sphi %s992_s12, %s13_s12  }
   0x2   : > { %p137_p1 = scmp.lt.s32.totalorder %s968_s12, 3 }
   0x4   : > { %p138_p2 = pnand %p895_p0, %p137_p1 }
   0x5   : > { %p161_p3 = scmp.lt.s32.totalorder (!%p138_p2), %s891_s13, 1 }
   0x6   : > { %141 = sbr.rel (%p138_p2) target bundleno = 340 (0x154), region = 32 }
   0xb   : > { %v950_v0 = vld [vmem:[%s1201_s1 + $0x24] ss:$16 sps:$4 sm:$0x3f]   ;;  %vm306_vm0 = vcmask 1044480   ;;  %vm307_vm1 = vcmask 1045504   ;;  %v970_v1 = vmov 65535  }
   0xc   : > { %v308_v2 = vsel %vm306_vm0, 4294967295, %v970_v1  ;;  %v952_v3 = vld [vmem:[%s1201_s1 + $0x2c] ss:$16 sps:$4 sm:$0x3f]   ;;  %v956_v6 = vld [vmem:[%s1201_s1 + $0x4] ss:$16 sps:$4 sm:$0xff]  }
   0xd   : > { %v309_v4 = vsel %vm307_vm1, %v308_v2, 0  ;;  %v954_v5 = vld [vmem:[%s1201_s1 + $0x20] ss:$16 sps:$4 sm:$0x3f]   ;;  %v958_v11 = vld [vmem:[%s1201_s1 + $0xc] ss:$16 sps:$4 sm:$0xff]  }
   0xe   : > { %v314_v7 = vand.u32 %v950_v0, %v309_v4  ;;  %v320_v8 = vand.u32 %v952_v3, %v309_v4  ;;  %v955_v9 = vld [vmem:[%s1201_s1 + $0x28] ss:$16 sps:$4 sm:$0x3f]   ;;  %v311_v10 = vand.u32 %v954_v5, %v309_v4  ;;  %v971_v12 = vmov 0   ;;  %v960_v14 = vld [vmem:[%s1201_s1] ss:$16 sps:$4 sm:$0xff]  }
   0xf   : > { %354 = vmatprep.mubr.bf16.mxu0 %v971_v12  ;;  %535 = vmatprep.mubr.bf16.mxu1 %v971_v12  ;;  %v317_v13 = vand.u32 %v955_v9, %v309_v4  ;;  %v961_v15 = vld [vmem:[%s1201_s1 + $0x8] ss:$16 sps:$4 sm:$0xff]   ;;  %s1205_s13 = smov (!%p161_p3, %s891_s13), 1  ;;  %vm260_vm2 = vcmask 220160   ;;  %v1130_v4 = vld [vmem:[%s1202_s2] ss:$0 sm:$0xff] }
  0x10   : > { %334 = vmatprep.subr.bf16.mxu0 %v314_v7  ;;  %515 = vmatprep.subr.bf16.mxu1 %v320_v8  ;;  %s939_s30 = smul.u32 232, %s1205_s13 }
  0x11   : > { %335 = vmatpush1.bf16.msra.mxu0 %v311_v10  ;;  %516 = vmatpush1.bf16.msra.mxu1 %v317_v13 }
  0x12   : > { %336 = vmatprep.subr.bf16.mxu0 %v956_v6  ;;  %517 = vmatprep.subr.bf16.mxu1 %v958_v11  ;;  %s1038_s6 = scalar_lea.vmem %s1200_s0, %s939_s30  ;;  %s1137_s11 = scalar_lea.vmem %s1203_s3, %s939_s30 }
  0x13   : > { %v172_v16 = vld [vmem:[%s1038_s6] sm:$0xff]  ;;  %v173_v17 = vld [vmem:[%s1038_s6 + $0x8] sm:$0xff]  ;;  %v174_v19 = vld [vmem:[%s1038_s6 + $0x10] sm:$0xff] }
  0x14   : > { %v201_v18 = vpack.c.bf16 %v173_v17, %v172_v16  ;;  %v175_v20 = vld [vmem:[%s1038_s6 + $0x18] sm:$0xff]  ;;  %v176_v22 = vld [vmem:[%s1038_s6 + $0x20] sm:$0xff]  ;;  %v177_v23 = vld [vmem:[%s1038_s6 + $0x28] sm:$0xff] }
  0x15   : > { %337 = vmatpush1.bf16.msra.mxu0 %v960_v14  ;;  %518 = vmatpush1.bf16.msra.mxu1 %v961_v15  ;;  %v202_v21 = vpack.c.bf16 %v175_v20, %v174_v19  ;;  %v203_v24 = vpack.c.bf16 %v177_v23, %v176_v22  ;;  %v178_v25 = vld [vmem:[%s1038_s6 + $0x30] sm:$0xff]  ;;  %v179_v26 = vld [vmem:[%s1038_s6 + $0x38] sm:$0xff]  ;;  %v180_v28 = vld [vmem:[%s1038_s6 + $0x40] sm:$0xff] }
  0x16   : > { %v204_v27 = vpack.c.bf16 %v179_v26, %v178_v25  ;;  %v181_v29 = vld [vmem:[%s1038_s6 + $0x48] sm:$0xff]  ;;  %v182_v31 = vld [vmem:[%s1038_s6 + $0x50] sm:$0xff]  ;;  %v183_v32 = vld [vmem:[%s1038_s6 + $0x58] sm:$0xff] }
  0x17   : > { %v205_v30 = vpack.c.bf16 %v181_v29, %v180_v28  ;;  %v206_v33 = vpack.c.bf16 %v183_v32, %v182_v31  ;;  %v184_v34 = vld [vmem:[%s1038_s6 + $0x60] sm:$0xff]  ;;  %v185_v35 = vld [vmem:[%s1038_s6 + $0x68] sm:$0xff]  ;;  %v186_v37 = vld [vmem:[%s1038_s6 + $0x70] sm:$0xff] }
  0x18   : > { %906 = vmatmul.mubr.msk.bf16.vlgmr.msra.gmra.mxu0 %vm260_vm2, %v201_v18  ;;  %921 = vmatmul.mubr.msk.bf16.vlgmr.msra.gmra.mxu1 %vm260_vm2, %v201_v18  ;;  %v207_v36 = vpack.c.bf16 %v185_v35, %v184_v34  ;;  %v187_v38 = vld [vmem:[%s1038_s6 + $0x78] sm:$0xff]  ;;  %v188_v40 = vld [vmem:[%s1038_s6 + $0x80] sm:$0xff]  ;;  %v189_v41 = vld [vmem:[%s1038_s6 + $0x88] sm:$0xff] }
  0x19   : > { %364 = vmatprep.mubr.bf16.mxu0 %v971_v12  ;;  %545 = vmatprep.mubr.bf16.mxu1 %v971_v12  ;;  %v208_v39 = vpack.c.bf16 %v187_v38, %v186_v37  ;;  %v209_v42 = vpack.c.bf16 %v189_v41, %v188_v40  ;;  %v190_v43 = vld [vmem:[%s1038_s6 + $0x90] sm:$0xff]  ;;  %v191_v44 = vld [vmem:[%s1038_s6 + $0x98] sm:$0xff]  ;;  %v192_v46 = vld [vmem:[%s1038_s6 + $0xa0] sm:$0xff] }
  0x1a   : > { %v210_v45 = vpack.c.bf16 %v191_v44, %v190_v43  ;;  %v193_v47 = vld [vmem:[%s1038_s6 + $0xa8] sm:$0xff]  ;;  %v194_v49 = vld [vmem:[%s1038_s6 + $0xb0] sm:$0xff]  ;;  %v195_v50 = vld [vmem:[%s1038_s6 + $0xb8] sm:$0xff] }
  0x1b   : > { %v211_v48 = vpack.c.bf16 %v193_v47, %v192_v46  ;;  %v212_v51 = vpack.c.bf16 %v195_v50, %v194_v49  ;;  %v196_v52 = vld [vmem:[%s1038_s6 + $0xc0] sm:$0xff]  ;;  %v197_v53 = vld [vmem:[%s1038_s6 + $0xc8] sm:$0xff]  ;;  %v198_v55 = vld [vmem:[%s1038_s6 + $0xd0] sm:$0xff] }
  0x1c   : > { %v213_v54 = vpack.c.bf16 %v197_v53, %v196_v52  ;;  %v199_v56 = vld [vmem:[%s1038_s6 + $0xd8] sm:$0xff]  ;;  %v200_v58 = vld [vmem:[%s1038_s6 + $0xe0] sm:$0x1] }
  0x1d   : > { %v214_v57 = vpack.c.bf16 %v199_v56, %v198_v55  ;;  %v215_v59 = vpack.c.bf16 %v200_v58, %v200_v58 }
  0x20   : > { %907 = vmatmul.mubr.msk.bf16.gmra.mxu0 %vm260_vm2, %v202_v21  ;;  %922 = vmatmul.mubr.msk.bf16.gmra.mxu1 %vm260_vm2, %v202_v21 }
  0x21   : > { %374 = vmatprep.mubr.bf16.mxu0 %v971_v12  ;;  %555 = vmatprep.mubr.bf16.mxu1 %v971_v12 }
  0x28   : > { %908 = vmatmul.mubr.msk.bf16.gmra.mxu0 %vm260_vm2, %v203_v24  ;;  %923 = vmatmul.mubr.msk.bf16.gmra.mxu1 %vm260_vm2, %v203_v24 }
  0x29   : > { %384 = vmatprep.mubr.bf16.mxu0 %v971_v12  ;;  %565 = vmatprep.mubr.bf16.mxu1 %v971_v12 }
  0x30   : > { %909 = vmatmul.mubr.msk.bf16.gmra.mxu0 %vm260_vm2, %v204_v27  ;;  %924 = vmatmul.mubr.msk.bf16.gmra.mxu1 %vm260_vm2, %v204_v27 }
  0x31   : > { %394 = vmatprep.mubr.bf16.mxu0 %v971_v12  ;;  %575 = vmatprep.mubr.bf16.mxu1 %v971_v12 }
  0x38   : > { %910 = vmatmul.mubr.msk.bf16.gmra.mxu0 %vm260_vm2, %v205_v30  ;;  %925 = vmatmul.mubr.msk.bf16.gmra.mxu1 %vm260_vm2, %v205_v30 }
  0x39   : > { %404 = vmatprep.mubr.bf16.mxu0 %v971_v12  ;;  %585 = vmatprep.mubr.bf16.mxu1 %v971_v12 }
  0x40   : > { %911 = vmatmul.mubr.msk.bf16.gmra.mxu0 %vm260_vm2, %v206_v33  ;;  %926 = vmatmul.mubr.msk.bf16.gmra.mxu1 %vm260_vm2, %v206_v33 }
  0x41   : > { %414 = vmatprep.mubr.bf16.mxu0 %v971_v12  ;;  %595 = vmatprep.mubr.bf16.mxu1 %v971_v12 }
  0x48   : > { %912 = vmatmul.mubr.msk.bf16.gmra.mxu0 %vm260_vm2, %v207_v36  ;;  %927 = vmatmul.mubr.msk.bf16.gmra.mxu1 %vm260_vm2, %v207_v36 }
  0x49   : > { %424 = vmatprep.mubr.bf16.mxu0 %v971_v12  ;;  %605 = vmatprep.mubr.bf16.mxu1 %v971_v12 }
  0x50   : > { %913 = vmatmul.mubr.msk.bf16.gmra.mxu0 %vm260_vm2, %v208_v39  ;;  %928 = vmatmul.mubr.msk.bf16.gmra.mxu1 %vm260_vm2, %v208_v39 }
  0x51   : > { %434 = vmatprep.mubr.bf16.mxu0 %v971_v12  ;;  %615 = vmatprep.mubr.bf16.mxu1 %v971_v12 }
  0x58   : > { %914 = vmatmul.mubr.msk.bf16.gmra.mxu0 %vm260_vm2, %v209_v42  ;;  %929 = vmatmul.mubr.msk.bf16.gmra.mxu1 %vm260_vm2, %v209_v42 }
  0x59   : > { %444 = vmatprep.mubr.bf16.mxu0 %v971_v12  ;;  %625 = vmatprep.mubr.bf16.mxu1 %v971_v12 }
  0x60   : > { %915 = vmatmul.mubr.msk.bf16.gmra.mxu0 %vm260_vm2, %v210_v45  ;;  %930 = vmatmul.mubr.msk.bf16.gmra.mxu1 %vm260_vm2, %v210_v45 }
  0x61   : > { %454 = vmatprep.mubr.bf16.mxu0 %v971_v12  ;;  %635 = vmatprep.mubr.bf16.mxu1 %v971_v12 }
  0x68   : > { %916 = vmatmul.mubr.msk.bf16.gmra.mxu0 %vm260_vm2, %v211_v48  ;;  %931 = vmatmul.mubr.msk.bf16.gmra.mxu1 %vm260_vm2, %v211_v48 }
  0x69   : > { %464 = vmatprep.mubr.bf16.mxu0 %v971_v12  ;;  %645 = vmatprep.mubr.bf16.mxu1 %v971_v12 }
  0x70   : > { %917 = vmatmul.mubr.msk.bf16.gmra.mxu0 %vm260_vm2, %v212_v51  ;;  %932 = vmatmul.mubr.msk.bf16.gmra.mxu1 %vm260_vm2, %v212_v51 }
  0x71   : > { %474 = vmatprep.mubr.bf16.mxu0 %v971_v12  ;;  %655 = vmatprep.mubr.bf16.mxu1 %v971_v12 }
  0x78   : > { %918 = vmatmul.mubr.msk.bf16.gmra.mxu0 %vm260_vm2, %v213_v54  ;;  %933 = vmatmul.mubr.msk.bf16.gmra.mxu1 %vm260_vm2, %v213_v54 }
  0x79   : > { %484 = vmatprep.mubr.bf16.mxu0 %v971_v12  ;;  %665 = vmatprep.mubr.bf16.mxu1 %v971_v12 }
  0x80   : > { %919 = vmatmul.mubr.msk.bf16.gmra.mxu0 %vm260_vm2, %v214_v57  ;;  %934 = vmatmul.mubr.msk.bf16.gmra.mxu1 %vm260_vm2, %v214_v57 }
  0x81   : > { %494 = vmatprep.mubr.bf16.mxu0 %v971_v12  ;;  %675 = vmatprep.mubr.bf16.mxu1 %v971_v12 }
  0x88   : > { %920 = vmatmul.mubr.msk.bf16.gmra.mxu0 %vm260_vm2, %v215_v59  ;;  %935 = vmatmul.mubr.msk.bf16.gmra.mxu1 %vm260_vm2, %v215_v59 }
  0xd8   : > { %v356_v60 = vpop.f32.mrf.mxu0  ;;  %v537_v61 = vpop.f32.mrf.mxu1 }
  0xda   : > { %v358_v62 = vpop.f32.mrf.mxu0  ;;  %v539_v63 = vpop.f32.mrf.mxu1 }
  0xdb   : > { %v684_v0 = vmax.f32 %v356_v60, %v358_v62 }
  0xdc   : > { %v360_v1 = vpop.f32.mrf.mxu0  ;;  %v541_v2 = vpop.f32.mrf.mxu1 }
  0xdd   : > { %v713_v3 = vmax.f32 %v684_v0, %v537_v61 }
  0xde   : > { %v362_v5 = vpop.f32.mrf.mxu0  ;;  %v543_v6 = vpop.f32.mrf.mxu1 }
  0xdf   : > { %v742_v7 = vmax.f32 %v713_v3, %v539_v63  ;;  %v685_v8 = vmax.f32 %v360_v1, %v362_v5 }
  0xe0   : > { %v366_v9 = vpop.f32.mrf.mxu0  ;;  %v547_v10 = vpop.f32.mrf.mxu1 }
  0xe1   : > { %v778_v11 = vadd.f32 %v1130_v4, %v742_v7  ;;  %v714_v12 = vmax.f32 %v685_v8, %v541_v2 }
  0xe2   : > { %v368_v13 = vpop.f32.mrf.mxu0  ;;  %v549_v14 = vpop.f32.mrf.mxu1 }
  0xe3   : > { %807 = vst [vmem:[%s1137_s11] sm:$0xff] %v778_v11  ;;  %v743_v15 = vmax.f32 %v714_v12, %v543_v6  ;;  %v686_v16 = vmax.f32 %v366_v9, %v368_v13 }
  0xe4   : > { %v370_v17 = vpop.f32.mrf.mxu0  ;;  %v551_v18 = vpop.f32.mrf.mxu1 }
  0xe5   : > { %v779_v19 = vadd.f32 %v1130_v4, %v743_v15  ;;  %v715_v20 = vmax.f32 %v686_v16, %v547_v10 }
  0xe6   : > { %v372_v21 = vpop.f32.mrf.mxu0  ;;  %v553_v22 = vpop.f32.mrf.mxu1 }
  0xe7   : > { %808 = vst [vmem:[%s1137_s11 + $0x8] sm:$0xff] %v779_v19  ;;  %v744_v23 = vmax.f32 %v715_v20, %v549_v14  ;;  %v687_v24 = vmax.f32 %v370_v17, %v372_v21 }
  0xe8   : > { %v376_v25 = vpop.f32.mrf.mxu0  ;;  %v557_v26 = vpop.f32.mrf.mxu1 }
  0xe9   : > { %v780_v27 = vadd.f32 %v1130_v4, %v744_v23  ;;  %v716_v28 = vmax.f32 %v687_v24, %v551_v18 }
  0xea   : > { %v378_v29 = vpop.f32.mrf.mxu0  ;;  %v559_v30 = vpop.f32.mrf.mxu1 }
  0xeb   : > { %809 = vst [vmem:[%s1137_s11 + $0x10] sm:$0xff] %v780_v27  ;;  %v745_v31 = vmax.f32 %v716_v28, %v553_v22  ;;  %v688_v32 = vmax.f32 %v376_v25, %v378_v29 }
  0xec   : > { %v380_v33 = vpop.f32.mrf.mxu0  ;;  %v561_v34 = vpop.f32.mrf.mxu1 }
  0xed   : > { %v781_v35 = vadd.f32 %v1130_v4, %v745_v31  ;;  %v717_v36 = vmax.f32 %v688_v32, %v557_v26 }
  0xee   : > { %v382_v37 = vpop.f32.mrf.mxu0  ;;  %v563_v38 = vpop.f32.mrf.mxu1 }
  0xef   : > { %810 = vst [vmem:[%s1137_s11 + $0x18] sm:$0xff] %v781_v35  ;;  %v746_v39 = vmax.f32 %v717_v36, %v559_v30  ;;  %v689_v40 = vmax.f32 %v380_v33, %v382_v37 }
  0xf0   : > { %v386_v41 = vpop.f32.mrf.mxu0  ;;  %v567_v42 = vpop.f32.mrf.mxu1 }
  0xf1   : > { %v782_v43 = vadd.f32 %v1130_v4, %v746_v39  ;;  %v718_v44 = vmax.f32 %v689_v40, %v561_v34 }
  0xf2   : > { %v388_v45 = vpop.f32.mrf.mxu0  ;;  %v569_v46 = vpop.f32.mrf.mxu1 }
  0xf3   : > { %811 = vst [vmem:[%s1137_s11 + $0x20] sm:$0xff] %v782_v43  ;;  %v747_v47 = vmax.f32 %v718_v44, %v563_v38  ;;  %v690_v48 = vmax.f32 %v386_v41, %v388_v45 }
  0xf4   : > { %v390_v49 = vpop.f32.mrf.mxu0  ;;  %v571_v50 = vpop.f32.mrf.mxu1 }
  0xf5   : > { %v783_v51 = vadd.f32 %v1130_v4, %v747_v47  ;;  %v719_v52 = vmax.f32 %v690_v48, %v567_v42 }
  0xf6   : > { %v392_v53 = vpop.f32.mrf.mxu0  ;;  %v573_v54 = vpop.f32.mrf.mxu1 }
  0xf7   : > { %812 = vst [vmem:[%s1137_s11 + $0x28] sm:$0xff] %v783_v51  ;;  %v748_v55 = vmax.f32 %v719_v52, %v569_v46  ;;  %v691_v56 = vmax.f32 %v390_v49, %v392_v53 }
  0xf8   : > { %v396_v57 = vpop.f32.mrf.mxu0  ;;  %v577_v58 = vpop.f32.mrf.mxu1 }
  0xf9   : > { %v784_v59 = vadd.f32 %v1130_v4, %v748_v55  ;;  %v720_v60 = vmax.f32 %v691_v56, %v571_v50 }
  0xfa   : > { %v398_v61 = vpop.f32.mrf.mxu0  ;;  %v579_v62 = vpop.f32.mrf.mxu1 }
  0xfb   : > { %813 = vst [vmem:[%s1137_s11 + $0x30] sm:$0xff] %v784_v59  ;;  %v749_v63 = vmax.f32 %v720_v60, %v573_v54  ;;  %v692_v0 = vmax.f32 %v396_v57, %v398_v61 }
  0xfc   : > { %v400_v1 = vpop.f32.mrf.mxu0  ;;  %v581_v2 = vpop.f32.mrf.mxu1 }
  0xfd   : > { %v785_v3 = vadd.f32 %v1130_v4, %v749_v63  ;;  %v721_v5 = vmax.f32 %v692_v0, %v577_v58 }
  0xfe   : > { %v402_v6 = vpop.f32.mrf.mxu0  ;;  %v583_v7 = vpop.f32.mrf.mxu1 }
  0xff   : > { %814 = vst [vmem:[%s1137_s11 + $0x38] sm:$0xff] %v785_v3  ;;  %v750_v8 = vmax.f32 %v721_v5, %v579_v62  ;;  %v693_v9 = vmax.f32 %v400_v1, %v402_v6 }
 0x100   : > { %v406_v10 = vpop.f32.mrf.mxu0  ;;  %v587_v11 = vpop.f32.mrf.mxu1 }
 0x101   : > { %v786_v12 = vadd.f32 %v1130_v4, %v750_v8  ;;  %v722_v13 = vmax.f32 %v693_v9, %v581_v2 }
 0x102   : > { %v408_v14 = vpop.f32.mrf.mxu0  ;;  %v589_v15 = vpop.f32.mrf.mxu1 }
 0x103   : > { %815 = vst [vmem:[%s1137_s11 + $0x40] sm:$0xff] %v786_v12  ;;  %v751_v16 = vmax.f32 %v722_v13, %v583_v7  ;;  %v694_v17 = vmax.f32 %v406_v10, %v408_v14 }
 0x104   : > { %v410_v18 = vpop.f32.mrf.mxu0  ;;  %v591_v19 = vpop.f32.mrf.mxu1 }
 0x105   : > { %v787_v20 = vadd.f32 %v1130_v4, %v751_v16  ;;  %v723_v21 = vmax.f32 %v694_v17, %v587_v11 }
 0x106   : > { %v412_v22 = vpop.f32.mrf.mxu0  ;;  %v593_v23 = vpop.f32.mrf.mxu1 }
 0x107   : > { %816 = vst [vmem:[%s1137_s11 + $0x48] sm:$0xff] %v787_v20  ;;  %v752_v24 = vmax.f32 %v723_v21, %v589_v15  ;;  %v695_v25 = vmax.f32 %v410_v18, %v412_v22 }
 0x108   : > { %v416_v26 = vpop.f32.mrf.mxu0  ;;  %v597_v27 = vpop.f32.mrf.mxu1 }
 0x109   : > { %v788_v28 = vadd.f32 %v1130_v4, %v752_v24  ;;  %v724_v29 = vmax.f32 %v695_v25, %v591_v19 }
 0x10a   : > { %v418_v30 = vpop.f32.mrf.mxu0  ;;  %v599_v31 = vpop.f32.mrf.mxu1 }
 0x10b   : > { %817 = vst [vmem:[%s1137_s11 + $0x50] sm:$0xff] %v788_v28  ;;  %v753_v32 = vmax.f32 %v724_v29, %v593_v23  ;;  %v696_v33 = vmax.f32 %v416_v26, %v418_v30 }
 0x10c   : > { %v420_v34 = vpop.f32.mrf.mxu0  ;;  %v601_v35 = vpop.f32.mrf.mxu1 }
 0x10d   : > { %v789_v36 = vadd.f32 %v1130_v4, %v753_v32  ;;  %v725_v37 = vmax.f32 %v696_v33, %v597_v27 }
 0x10e   : > { %v422_v38 = vpop.f32.mrf.mxu0  ;;  %v603_v39 = vpop.f32.mrf.mxu1 }
 0x10f   : > { %818 = vst [vmem:[%s1137_s11 + $0x58] sm:$0xff] %v789_v36  ;;  %v754_v40 = vmax.f32 %v725_v37, %v599_v31  ;;  %v697_v41 = vmax.f32 %v420_v34, %v422_v38 }
 0x110   : > { %v426_v42 = vpop.f32.mrf.mxu0  ;;  %v607_v43 = vpop.f32.mrf.mxu1 }
 0x111   : > { %v790_v44 = vadd.f32 %v1130_v4, %v754_v40  ;;  %v726_v45 = vmax.f32 %v697_v41, %v601_v35 }
 0x112   : > { %v428_v46 = vpop.f32.mrf.mxu0  ;;  %v609_v47 = vpop.f32.mrf.mxu1 }
 0x113   : > { %819 = vst [vmem:[%s1137_s11 + $0x60] sm:$0xff] %v790_v44  ;;  %v755_v48 = vmax.f32 %v726_v45, %v603_v39  ;;  %v698_v49 = vmax.f32 %v426_v42, %v428_v46 }
 0x114   : > { %v430_v50 = vpop.f32.mrf.mxu0  ;;  %v611_v51 = vpop.f32.mrf.mxu1 }
 0x115   : > { %v791_v52 = vadd.f32 %v1130_v4, %v755_v48  ;;  %v727_v53 = vmax.f32 %v698_v49, %v607_v43 }
 0x116   : > { %v432_v54 = vpop.f32.mrf.mxu0  ;;  %v613_v55 = vpop.f32.mrf.mxu1 }
 0x117   : > { %820 = vst [vmem:[%s1137_s11 + $0x68] sm:$0xff] %v791_v52  ;;  %v756_v56 = vmax.f32 %v727_v53, %v609_v47  ;;  %v699_v57 = vmax.f32 %v430_v50, %v432_v54 }
 0x118   : > { %v436_v58 = vpop.f32.mrf.mxu0  ;;  %v617_v59 = vpop.f32.mrf.mxu1 }
 0x119   : > { %v792_v60 = vadd.f32 %v1130_v4, %v756_v56  ;;  %v728_v61 = vmax.f32 %v699_v57, %v611_v51 }
 0x11a   : > { %v438_v62 = vpop.f32.mrf.mxu0  ;;  %v619_v63 = vpop.f32.mrf.mxu1 }
 0x11b   : > { %821 = vst [vmem:[%s1137_s11 + $0x70] sm:$0xff] %v792_v60  ;;  %v757_v0 = vmax.f32 %v728_v61, %v613_v55  ;;  %v700_v1 = vmax.f32 %v436_v58, %v438_v62 }
 0x11c   : > { %v440_v2 = vpop.f32.mrf.mxu0  ;;  %v621_v3 = vpop.f32.mrf.mxu1 }
 0x11d   : > { %v793_v5 = vadd.f32 %v1130_v4, %v757_v0  ;;  %v729_v6 = vmax.f32 %v700_v1, %v617_v59 }
 0x11e   : > { %v442_v7 = vpop.f32.mrf.mxu0  ;;  %v623_v8 = vpop.f32.mrf.mxu1 }
 0x11f   : > { %822 = vst [vmem:[%s1137_s11 + $0x78] sm:$0xff] %v793_v5  ;;  %v758_v9 = vmax.f32 %v729_v6, %v619_v63  ;;  %v701_v10 = vmax.f32 %v440_v2, %v442_v7 }
 0x120   : > { %v446_v11 = vpop.f32.mrf.mxu0  ;;  %v627_v12 = vpop.f32.mrf.mxu1 }
 0x121   : > { %v794_v13 = vadd.f32 %v1130_v4, %v758_v9  ;;  %v730_v14 = vmax.f32 %v701_v10, %v621_v3 }
 0x122   : > { %v448_v15 = vpop.f32.mrf.mxu0  ;;  %v629_v16 = vpop.f32.mrf.mxu1 }
 0x123   : > { %823 = vst [vmem:[%s1137_s11 + $0x80] sm:$0xff] %v794_v13  ;;  %v759_v17 = vmax.f32 %v730_v14, %v623_v8  ;;  %v702_v18 = vmax.f32 %v446_v11, %v448_v15 }
 0x124   : > { %v450_v19 = vpop.f32.mrf.mxu0  ;;  %v631_v20 = vpop.f32.mrf.mxu1 }
 0x125   : > { %v795_v21 = vadd.f32 %v1130_v4, %v759_v17  ;;  %v731_v22 = vmax.f32 %v702_v18, %v627_v12 }
 0x126   : > { %v452_v23 = vpop.f32.mrf.mxu0  ;;  %v633_v24 = vpop.f32.mrf.mxu1 }
 0x127   : > { %824 = vst [vmem:[%s1137_s11 + $0x88] sm:$0xff] %v795_v21  ;;  %v760_v25 = vmax.f32 %v731_v22, %v629_v16  ;;  %v703_v26 = vmax.f32 %v450_v19, %v452_v23 }
 0x128   : > { %v456_v27 = vpop.f32.mrf.mxu0  ;;  %v637_v28 = vpop.f32.mrf.mxu1 }
 0x129   : > { %v796_v29 = vadd.f32 %v1130_v4, %v760_v25  ;;  %v732_v30 = vmax.f32 %v703_v26, %v631_v20 }
 0x12a   : > { %v458_v31 = vpop.f32.mrf.mxu0  ;;  %v639_v32 = vpop.f32.mrf.mxu1 }
 0x12b   : > { %825 = vst [vmem:[%s1137_s11 + $0x90] sm:$0xff] %v796_v29  ;;  %v761_v33 = vmax.f32 %v732_v30, %v633_v24  ;;  %v704_v34 = vmax.f32 %v456_v27, %v458_v31 }
 0x12c   : > { %v460_v35 = vpop.f32.mrf.mxu0  ;;  %v641_v36 = vpop.f32.mrf.mxu1 }
 0x12d   : > { %v797_v37 = vadd.f32 %v1130_v4, %v761_v33  ;;  %v733_v38 = vmax.f32 %v704_v34, %v637_v28 }
 0x12e   : > { %v462_v39 = vpop.f32.mrf.mxu0  ;;  %v643_v40 = vpop.f32.mrf.mxu1 }
 0x12f   : > { %826 = vst [vmem:[%s1137_s11 + $0x98] sm:$0xff] %v797_v37  ;;  %v762_v41 = vmax.f32 %v733_v38, %v639_v32  ;;  %v705_v42 = vmax.f32 %v460_v35, %v462_v39 }
 0x130   : > { %v466_v43 = vpop.f32.mrf.mxu0  ;;  %v647_v44 = vpop.f32.mrf.mxu1 }
 0x131   : > { %v798_v45 = vadd.f32 %v1130_v4, %v762_v41  ;;  %v734_v46 = vmax.f32 %v705_v42, %v641_v36 }
 0x132   : > { %v468_v47 = vpop.f32.mrf.mxu0  ;;  %v649_v48 = vpop.f32.mrf.mxu1 }
 0x133   : > { %827 = vst [vmem:[%s1137_s11 + $0xa0] sm:$0xff] %v798_v45  ;;  %v763_v49 = vmax.f32 %v734_v46, %v643_v40  ;;  %v706_v50 = vmax.f32 %v466_v43, %v468_v47 }
 0x134   : > { %v470_v51 = vpop.f32.mrf.mxu0  ;;  %v651_v52 = vpop.f32.mrf.mxu1 }
 0x135   : > { %v799_v53 = vadd.f32 %v1130_v4, %v763_v49  ;;  %v735_v54 = vmax.f32 %v706_v50, %v647_v44 }
 0x136   : > { %v472_v55 = vpop.f32.mrf.mxu0  ;;  %v653_v56 = vpop.f32.mrf.mxu1 }
 0x137   : > { %828 = vst [vmem:[%s1137_s11 + $0xa8] sm:$0xff] %v799_v53  ;;  %v764_v57 = vmax.f32 %v735_v54, %v649_v48  ;;  %v707_v58 = vmax.f32 %v470_v51, %v472_v55 }
 0x138   : > { %v476_v59 = vpop.f32.mrf.mxu0  ;;  %v657_v60 = vpop.f32.mrf.mxu1 }
 0x139   : > { %v800_v61 = vadd.f32 %v1130_v4, %v764_v57  ;;  %v736_v62 = vmax.f32 %v707_v58, %v651_v52 }
 0x13a   : > { %v478_v63 = vpop.f32.mrf.mxu0  ;;  %v659_v0 = vpop.f32.mrf.mxu1 }
 0x13b   : > { %829 = vst [vmem:[%s1137_s11 + $0xb0] sm:$0xff] %v800_v61  ;;  %v765_v1 = vmax.f32 %v736_v62, %v653_v56  ;;  %v708_v2 = vmax.f32 %v476_v59, %v478_v63 }
 0x13c   : > { %v480_v3 = vpop.f32.mrf.mxu0  ;;  %v661_v5 = vpop.f32.mrf.mxu1 }
 0x13d   : > { %v801_v6 = vadd.f32 %v1130_v4, %v765_v1  ;;  %v737_v7 = vmax.f32 %v708_v2, %v657_v60 }
 0x13e   : > { %v482_v8 = vpop.f32.mrf.mxu0  ;;  %v663_v9 = vpop.f32.mrf.mxu1 }
 0x13f   : > { %830 = vst [vmem:[%s1137_s11 + $0xb8] sm:$0xff] %v801_v6  ;;  %v766_v10 = vmax.f32 %v737_v7, %v659_v0  ;;  %v709_v11 = vmax.f32 %v480_v3, %v482_v8 }
 0x140   : > { %v486_v12 = vpop.f32.mrf.mxu0  ;;  %v667_v13 = vpop.f32.mrf.mxu1 }
 0x141   : > { %v802_v14 = vadd.f32 %v1130_v4, %v766_v10  ;;  %v738_v15 = vmax.f32 %v709_v11, %v661_v5 }
 0x142   : > { %v488_v16 = vpop.f32.mrf.mxu0  ;;  %v669_v17 = vpop.f32.mrf.mxu1 }
 0x143   : > { %831 = vst [vmem:[%s1137_s11 + $0xc0] sm:$0xff] %v802_v14  ;;  %v767_v18 = vmax.f32 %v738_v15, %v663_v9  ;;  %v710_v19 = vmax.f32 %v486_v12, %v488_v16 }
 0x144   : > { %v490_v20 = vpop.f32.mrf.mxu0  ;;  %v671_v21 = vpop.f32.mrf.mxu1 }
 0x145   : > { %v803_v22 = vadd.f32 %v1130_v4, %v767_v18  ;;  %v739_v23 = vmax.f32 %v710_v19, %v667_v13 }
 0x146   : > { %v492_v24 = vpop.f32.mrf.mxu0  ;;  %v673_v25 = vpop.f32.mrf.mxu1 }
 0x147   : > { %832 = vst [vmem:[%s1137_s11 + $0xc8] sm:$0xff] %v803_v22  ;;  %v768_v26 = vmax.f32 %v739_v23, %v669_v17  ;;  %v711_v27 = vmax.f32 %v490_v20, %v492_v24 }
 0x148   : > { %v496_v28 = vpop.f32.mrf.mxu0  ;;  %v677_v29 = vpop.f32.mrf.mxu1 }
 0x149   : > { %v804_v30 = vadd.f32 %v1130_v4, %v768_v26  ;;  %v740_v31 = vmax.f32 %v711_v27, %v671_v21 }
 0x14a   : > { %v498_v32 = vpop.f32.mrf.mxu0  ;;  %v679_v33 = vpop.f32.mrf.mxu1 }
 0x14b   : > { %833 = vst [vmem:[%s1137_s11 + $0xd0] sm:$0xff] %v804_v30  ;;  %v769_v34 = vmax.f32 %v740_v31, %v673_v25  ;;  %v712_v35 = vmax.f32 %v496_v28, %v498_v32 }
 0x14c   : > { %v500_v36 = vpop.f32.mrf.mxu0  ;;  %v681_v37 = vpop.f32.mrf.mxu1 }
 0x14d   : > { %v805_v38 = vadd.f32 %v1130_v4, %v769_v34  ;;  %v741_v39 = vmax.f32 %v712_v35, %v677_v29 }
 0x14e   : > { %v501_v40 = vpop.f32.mrf.mxu0  ;;  %v682_v41 = vpop.f32.mrf.mxu1 }
 0x14f   : > { %834 = vst [vmem:[%s1137_s11 + $0xd8] sm:$0xff] %v805_v38  ;;  %v770_v42 = vmax.f32 %v741_v39, %v679_v33 }
 0x151   : > { %v806_v43 = vadd.f32 %v1130_v4, %v770_v42 }
 0x153   : > { %835 = vst [vmem:[%s1137_s11 + $0xe0] sm:$0x1] %v806_v43 }
 0x154 PF: > { %s13_s12 = sadd.s32 1, %s968_s12  }
 0x155   : > { %p10_p4 = scmp.ge.s32.totalorder %s13_s12, 4  }
 0x157   :  { %12 = sbr.rel (!%p10_p4) target bundleno = 1 (0x1), region = 62 }

// kernel: archb_forward.4
= control target key start
LH: loop header
LB: loop body
LE: loop exit
PB: predicated region body
PF: predicated region fallthrough
CT: control target
= control target key end

     0   :  { %s1273_s12 = smov 0   ;;  %s1616_s0 = inlined_call_operand.vmem [shape: f32[2,49,288], index: 0, kind: input, shape index: {}]   ;;  %s1617_s1 = inlined_call_operand.vmem [shape: bf16[288,512], index: 1, kind: input, shape index: {}]   ;;  %s1618_s2 = inlined_call_operand.vmem [shape: f32[1,128], index: 2, kind: input, shape index: {}]   ;;  %s1619_s3 = inlined_call_operand.vmem [shape: f32[2,49,128], index: 3, kind: output, shape index: {}]  }
   0x1 LB: > { %s1031_s13 = sadd.s32 4294967295, %s1250_s12   ;;  %p1035_p0 = scmp.ge.s32.totalorder %s1250_s12, 1  ;;  %s1250_s12 = sphi %s1273_s12, %s13_s12  }
   0x2   : > { %p137_p1 = scmp.lt.s32.totalorder %s1250_s12, 3 }
   0x4   : > { %p138_p2 = pnand %p1035_p0, %p137_p1 }
   0x5   : > { %p161_p3 = scmp.lt.s32.totalorder (!%p138_p2), %s1031_s13, 1 }
   0x6   : > { %141 = sbr.rel (%p138_p2) target bundleno = 330 (0x14a), region = 32 }
   0xb   : > { %v1136_v0 = vld [vmem:[%s1617_s1 + $0xe4] ss:$16 sps:$4 sm:$0xff]   ;;  %v1252_v2 = vmov 0   ;;  %v1140_v3 = vld [vmem:[%s1617_s1 + $0xe0] ss:$16 sps:$4 sm:$0xff]   ;;  %s1621_s13 = smov (!%p161_p3, %s1031_s13), 1 }
   0xc   : > { %v1138_v1 = vld [vmem:[%s1617_s1 + $0x224] ss:$16 sps:$4 sm:$0xff]   ;;  %753 = vmatprep.mubr.bf16.mxu1 %v1252_v2  ;;  %650 = vmatprep.subr.bf16.mxu0 %v1136_v0  ;;  %v1141_v4 = vld [vmem:[%s1617_s1 + $0x220] ss:$16 sps:$4 sm:$0xff]   ;;  %s1125_s28 = smul.u32 168, %s1621_s13  ;;  %vm637_vm0 = vcmask 261120  }
   0xd   : > { %733 = vmatprep.subr.bf16.mxu1 %v1138_v1  ;;  %v1142_v5 = vld [vmem:[%s1617_s1 + $0xc4] ss:$16 sps:$4 sm:$0xff]   ;;  %651 = vmatpush1.bf16.msra.mxu0 %v1140_v3  ;;  %v1146_v7 = vld [vmem:[%s1617_s1 + $0xc0] ss:$16 sps:$4 sm:$0xff]   ;;  %v1150_v10 = vld [vmem:[%s1617_s1 + $0xe8] ss:$16 sps:$4 sm:$0xff]  }
   0xe   : > { %734 = vmatpush1.bf16.msra.mxu1 %v1141_v4  ;;  %v1144_v6 = vld [vmem:[%s1617_s1 + $0x204] ss:$16 sps:$4 sm:$0xff]   ;;  %652 = vmatprep.subr.bf16.mxu0 %v1142_v5  ;;  %v1147_v8 = vld [vmem:[%s1617_s1 + $0x200] ss:$16 sps:$4 sm:$0xff]   ;;  %s1315_s8 = scalar_lea.vmem %s1616_s0, %s1125_s28  ;;  %v1152_v11 = vld [vmem:[%s1617_s1 + $0xec] ss:$16 sps:$4 sm:$0xff]  }
   0xf   : > { %735 = vmatprep.subr.bf16.mxu1 %v1144_v6  ;;  %v1148_v9 = vld [vmem:[%s1617_s1 + $0xa4] ss:$16 sps:$4 sm:$0xff]   ;;  %v1153_v12 = vld [vmem:[%s1617_s1 + $0xa0] ss:$16 sps:$4 sm:$0xff]   ;;  %v177_v14 = vld [vmem:[%s1315_s8 + $0x28] sm:$0xff] }
  0x10   : > { %v174_v13 = vld [vmem:[%s1315_s8 + $0x10] sm:$0xff]  ;;  %v1158_v17 = vld [vmem:[%s1617_s1 + $0xcc] ss:$16 sps:$4 sm:$0xff]   ;;  %v1156_v18 = vld [vmem:[%s1617_s1 + $0xc8] ss:$16 sps:$4 sm:$0xff]  }
  0x11   : > { %653 = vmatpush1.bf16.msra.mxu0 %v1146_v7  ;;  %v1328_v15 = vpack.c.bf16 %v177_v14, %v174_v13  ;;  %v1154_v16 = vld [vmem:[%s1617_s1 + $0x84] ss:$16 sps:$4 sm:$0xff]   ;;  %v1159_v19 = vld [vmem:[%s1617_s1 + $0x80] ss:$16 sps:$4 sm:$0xff]   ;;  %v1164_v21 = vld [vmem:[%s1617_s1 + $0xac] ss:$16 sps:$4 sm:$0xff]  }
  0x12   : > { %736 = vmatpush1.bf16.msra.mxu1 %v1147_v8  ;;  %654 = vmatprep.subr.bf16.mxu0 %v1148_v9  ;;  %v1160_v20 = vld [vmem:[%s1617_s1 + $0x64] ss:$16 sps:$4 sm:$0xff]   ;;  %v1162_v22 = vld [vmem:[%s1617_s1 + $0xa8] ss:$16 sps:$4 sm:$0xff]   ;;  %v1165_v23 = vld [vmem:[%s1617_s1 + $0x60] ss:$16 sps:$4 sm:$0xff]  }
  0x13   : > { %792 = vmatprep.subr.bf16.mxu1 %v1152_v11  ;;  %v1166_v24 = vld [vmem:[%s1617_s1 + $0x44] ss:$16 sps:$4 sm:$0xff]   ;;  %v1170_v25 = vld [vmem:[%s1617_s1 + $0x8c] ss:$16 sps:$4 sm:$0xff]   ;;  %v1168_v26 = vld [vmem:[%s1617_s1 + $0x88] ss:$16 sps:$4 sm:$0xff]  }
  0x14   : > { %v1171_v27 = vld [vmem:[%s1617_s1 + $0x40] ss:$16 sps:$4 sm:$0xff]   ;;  %v1172_v28 = vld [vmem:[%s1617_s1 + $0x24] ss:$16 sps:$4 sm:$0xff]   ;;  %v1176_v29 = vld [vmem:[%s1617_s1 + $0x6c] ss:$16 sps:$4 sm:$0xff]  }
  0x15   : > { %1110 = vmatmul.mubr.msk.bf16.vlgmr.msra.gmra.mxu1 %vm637_vm0, %v1328_v15  ;;  %655 = vmatpush1.bf16.msra.mxu0 %v1153_v12  ;;  %v1174_v30 = vld [vmem:[%s1617_s1 + $0x68] ss:$16 sps:$4 sm:$0xff]   ;;  %v1177_v31 = vld [vmem:[%s1617_s1 + $0x20] ss:$16 sps:$4 sm:$0xff]   ;;  %v1178_v32 = vld [vmem:[%s1617_s1 + $0x4] ss:$16 sps:$4 sm:$0xff]  }
  0x16   : > { %793 = vmatpush1.bf16.msra.mxu1 %v1150_v10  ;;  %656 = vmatprep.subr.bf16.mxu0 %v1154_v16  ;;  %v1182_v33 = vld [vmem:[%s1617_s1 + $0x4c] ss:$16 sps:$4 sm:$0xff]   ;;  %v1180_v34 = vld [vmem:[%s1617_s1 + $0x48] ss:$16 sps:$4 sm:$0xff]   ;;  %v1183_v35 = vld [vmem:[%s1617_s1] ss:$16 sps:$4 sm:$0xff]  }
  0x17   : > { %794 = vmatprep.subr.bf16.mxu1 %v1158_v17  ;;  %763 = vmatprep.mubr.bf16.mxu1 %v1252_v2  ;;  %v1184_v36 = vld [vmem:[%s1617_s1 + $0x1e4] ss:$16 sps:$4 sm:$0xff]   ;;  %v1188_v37 = vld [vmem:[%s1617_s1 + $0x2c] ss:$16 sps:$4 sm:$0xff]   ;;  %v1186_v38 = vld [vmem:[%s1617_s1 + $0x28] ss:$16 sps:$4 sm:$0xff]  }
  0x18   : > { %v1189_v39 = vld [vmem:[%s1617_s1 + $0x1e0] ss:$16 sps:$4 sm:$0xff]   ;;  %v1190_v40 = vld [vmem:[%s1617_s1 + $0x1c4] ss:$16 sps:$4 sm:$0xff]   ;;  %v1194_v41 = vld [vmem:[%s1617_s1 + $0xc] ss:$16 sps:$4 sm:$0xff]  }
  0x19   : > { %657 = vmatpush1.bf16.msra.mxu0 %v1159_v19  ;;  %v180_v42 = vld [vmem:[%s1315_s8 + $0x40] sm:$0xff]  ;;  %v183_v43 = vld [vmem:[%s1315_s8 + $0x58] sm:$0xff]  ;;  %v186_v51 = vld [vmem:[%s1315_s8 + $0x70] sm:$0xff] }
  0x1a   : > { %795 = vmatpush1.bf16.msra.mxu1 %v1156_v18  ;;  %658 = vmatprep.subr.bf16.mxu0 %v1160_v20  ;;  %v1192_v44 = vld [vmem:[%s1617_s1 + $0x8] ss:$16 sps:$4 sm:$0xff]   ;;  %v1195_v45 = vld [vmem:[%s1617_s1 + $0x1c0] ss:$16 sps:$4 sm:$0xff]   ;;  %v1419_v46 = vpack.c.bf16 %v183_v43, %v180_v42  ;;  %v1196_v47 = vld [vmem:[%s1617_s1 + $0x1a4] ss:$16 sps:$4 sm:$0xff]  }
  0x1b   : > { %796 = vmatprep.subr.bf16.mxu1 %v1164_v21  ;;  %v1200_v48 = vld [vmem:[%s1617_s1 + $0x1ec] ss:$16 sps:$4 sm:$0xff]   ;;  %v1198_v49 = vld [vmem:[%s1617_s1 + $0x1e8] ss:$16 sps:$4 sm:$0xff]   ;;  %v1201_v50 = vld [vmem:[%s1617_s1 + $0x1a0] ss:$16 sps:$4 sm:$0xff]  }
  0x1c   : > { %v189_v52 = vld [vmem:[%s1315_s8 + $0x88] sm:$0xff]  ;;  %v1202_v53 = vld [vmem:[%s1617_s1 + $0x184] ss:$16 sps:$4 sm:$0xff]   ;;  %v1207_v57 = vld [vmem:[%s1617_s1 + $0x180] ss:$16 sps:$4 sm:$0xff]  }
  0x1d   : > { %659 = vmatpush1.bf16.msra.mxu0 %v1165_v23  ;;  %1111 = vmatmul.mubr.msk.bf16.gmra.mxu1 %vm637_vm0, %v1419_v46  ;;  %v1206_v54 = vld [vmem:[%s1617_s1 + $0x1cc] ss:$16 sps:$4 sm:$0xff]   ;;  %v1444_v55 = vpack.c.bf16 %v189_v52, %v186_v51  ;;  %v1204_v56 = vld [vmem:[%s1617_s1 + $0x1c8] ss:$16 sps:$4 sm:$0xff]   ;;  %v1208_v59 = vld [vmem:[%s1617_s1 + $0x164] ss:$16 sps:$4 sm:$0xff]  }
  0x1e   : > { %797 = vmatpush1.bf16.msra.mxu1 %v1162_v22  ;;  %660 = vmatprep.subr.bf16.mxu0 %v1166_v24  ;;  %v173_v58 = vld [vmem:[%s1315_s8 + $0x8] sm:$0xff]  ;;  %v176_v61 = vld [vmem:[%s1315_s8 + $0x20] sm:$0xff]  ;;  %v175_v18 = vld [vmem:[%s1315_s8 + $0x18] sm:$0xff] }
  0x1f   : > { %798 = vmatprep.subr.bf16.mxu1 %v1170_v25  ;;  %773 = vmatprep.mubr.bf16.mxu1 %v1252_v2  ;;  %v1212_v60 = vld [vmem:[%s1617_s1 + $0x1ac] ss:$16 sps:$4 sm:$0xff]   ;;  %v194_v62 = vpack.c.bf16 %v176_v61, %v173_v58  ;;  %v1210_v63 = vld [vmem:[%s1617_s1 + $0x1a8] ss:$16 sps:$4 sm:$0xff]   ;;  %v192_v0 = vld [vmem:[%s1315_s8 + $0xa0] sm:$0x1] }
  0x20   : > { %v1213_v1 = vld [vmem:[%s1617_s1 + $0x160] ss:$16 sps:$4 sm:$0xff]   ;;  %v1214_v3 = vld [vmem:[%s1617_s1 + $0x144] ss:$16 sps:$4 sm:$0xff]   ;;  %v1218_v4 = vld [vmem:[%s1617_s1 + $0x18c] ss:$16 sps:$4 sm:$0xff]   ;;  %v1476_v5 = vpack.c.bf16 %v192_v0, %v192_v0 }
  0x21   : > { %661 = vmatpush1.bf16.msra.mxu0 %v1171_v27  ;;  %682 = vmatprep.mubr.bf16.mxu0 %v194_v62  ;;  %v1216_v6 = vld [vmem:[%s1617_s1 + $0x188] ss:$16 sps:$4 sm:$0xff]   ;;  %v1219_v7 = vld [vmem:[%s1617_s1 + $0x140] ss:$16 sps:$4 sm:$0xff]   ;;  %v1220_v8 = vld [vmem:[%s1617_s1 + $0x124] ss:$16 sps:$4 sm:$0xff]  }
  0x22   : > { %799 = vmatpush1.bf16.msra.mxu1 %v1168_v26  ;;  %662 = vmatprep.subr.bf16.mxu0 %v1172_v28  ;;  %v1224_v9 = vld [vmem:[%s1617_s1 + $0x16c] ss:$16 sps:$4 sm:$0xff]   ;;  %v1222_v10 = vld [vmem:[%s1617_s1 + $0x168] ss:$16 sps:$4 sm:$0xff]   ;;  %v1225_v11 = vld [vmem:[%s1617_s1 + $0x120] ss:$16 sps:$4 sm:$0xff]  }
  0x23   : > { %800 = vmatprep.subr.bf16.mxu1 %v1176_v29  ;;  %v1226_v12 = vld [vmem:[%s1617_s1 + $0x104] ss:$16 sps:$4 sm:$0xff]   ;;  %v1230_v13 = vld [vmem:[%s1617_s1 + $0x14c] ss:$16 sps:$4 sm:$0xff]   ;;  %v1228_v14 = vld [vmem:[%s1617_s1 + $0x148] ss:$16 sps:$4 sm:$0xff]  }
  0x24   : > { %v1231_v16 = vld [vmem:[%s1617_s1 + $0x100] ss:$16 sps:$4 sm:$0xff]   ;;  %v1234_v19 = vld [vmem:[%s1617_s1 + $0x12c] ss:$16 sps:$4 sm:$0xff]   ;;  %v1232_v24 = vld [vmem:[%s1617_s1 + $0x128] ss:$16 sps:$4 sm:$0xff]  }
  0x25   : > { %663 = vmatpush1.bf16.msra.mxu0 %v1177_v31  ;;  %1112 = vmatmul.mubr.msk.bf16.gmra.mxu1 %vm637_vm0, %v1444_v55  ;;  %v172_v17 = vld [vmem:[%s1315_s8] sm:$0xff]  ;;  %v1237_v20 = vld [vmem:[%s1617_s1 + $0x22c] ss:$16 sps:$4 sm:$0xff]   ;;  %v182_v22 = vld [vmem:[%s1315_s8 + $0x50] sm:$0xff] }
  0x26   : > { %801 = vmatpush1.bf16.msra.mxu1 %v1174_v30  ;;  %664 = vmatprep.subr.bf16.mxu0 %v1178_v32  ;;  %v179_v21 = vld [vmem:[%s1315_s8 + $0x38] sm:$0xff]  ;;  %v193_v23 = vpack.c.bf16 %v175_v18, %v172_v17  ;;  %v178_v30 = vld [vmem:[%s1315_s8 + $0x30] sm:$0xff]  ;;  %v181_v31 = vld [vmem:[%s1315_s8 + $0x48] sm:$0xff] }
  0x27   : > { %802 = vmatprep.subr.bf16.mxu1 %v1182_v33  ;;  %783 = vmatprep.mubr.bf16.mxu1 %v1252_v2  ;;  %v1235_v25 = vld [vmem:[%s1617_s1 + $0x228] ss:$16 sps:$4 sm:$0xff]   ;;  %v1240_v26 = vld [vmem:[%s1617_s1 + $0x10c] ss:$16 sps:$4 sm:$0xff]   ;;  %v197_v27 = vpack.c.bf16 %v182_v22, %v179_v21  ;;  %v190_v42 = vld [vmem:[%s1315_s8 + $0x90] sm:$0x1] }
  0x28   : > { %v1243_v28 = vld [vmem:[%s1617_s1 + $0x20c] ss:$16 sps:$4 sm:$0xff]   ;;  %v1238_v29 = vld [vmem:[%s1617_s1 + $0x108] ss:$16 sps:$4 sm:$0xff]   ;;  %v202_v43 = vpack.c.bf16 %v190_v42, %v190_v42 }
  0x29   : > { %665 = vmatpush1.bf16.msra.mxu0 %v1183_v35  ;;  %v1241_v32 = vld [vmem:[%s1617_s1 + $0x208] ss:$16 sps:$4 sm:$0xff]   ;;  %v196_v35 = vpack.c.bf16 %v181_v31, %v178_v30 }
  0x2a   : > { %803 = vmatpush1.bf16.msra.mxu1 %v1180_v34  ;;  %666 = vmatprep.subr.bf16.mxu0 %v1184_v36  ;;  %v185_v33 = vld [vmem:[%s1315_s8 + $0x68] sm:$0xff]  ;;  %v188_v34 = vld [vmem:[%s1315_s8 + $0x80] sm:$0xff] }
  0x2b   : > { %804 = vmatprep.subr.bf16.mxu1 %v1188_v37  ;;  %v200_v36 = vpack.c.bf16 %v188_v34, %v185_v33  ;;  %v184_v37 = vld [vmem:[%s1315_s8 + $0x60] sm:$0xff] }
  0x2d   : > { %667 = vmatpush2.bf16.msra.mxu0 %v1189_v39  ;;  %1113 = vmatmul.mubr.msk.bf16.gmra.mxu1 %vm637_vm0, %v1476_v5  ;;  %v191_v39 = vld [vmem:[%s1315_s8 + $0x98] sm:$0x1] }
  0x2e   : > { %805 = vmatpush1.bf16.msra.mxu1 %v1186_v38  ;;  %668 = vmatprep.subr.bf16.mxu0 %v1190_v40  ;;  %v187_v38 = vld [vmem:[%s1315_s8 + $0x78] sm:$0xff]  ;;  %s1126_s8 = smul.u32 56, %s1621_s13 }
  0x2f   : > { %806 = vmatprep.subr.bf16.mxu1 %v1194_v41  ;;  %824 = vmatprep.mubr.bf16.mxu1 %v194_v62  ;;  %v199_v40 = vpack.c.bf16 %v187_v38, %v184_v37  ;;  %v203_v41 = vpack.c.bf16 %v191_v39, %v191_v39 }
  0x30   : > { %s1593_s21 = scalar_lea.vmem %s1619_s3, %s1126_s8 }
  0x31   : > { %669 = vmatpush2.bf16.msra.mxu0 %v1195_v45 }
  0x32   : > { %807 = vmatpush1.bf16.msra.mxu1 %v1192_v44  ;;  %670 = vmatprep.subr.bf16.mxu0 %v1196_v47 }
  0x33   : > { %808 = vmatprep.subr.bf16.mxu1 %v1200_v48 }
  0x35   : > { %671 = vmatpush2.bf16.msra.mxu0 %v1201_v50 }
  0x36   : > { %809 = vmatpush2.bf16.msra.mxu1 %v1198_v49  ;;  %672 = vmatprep.subr.bf16.mxu0 %v1202_v53 }
  0x37   : > { %810 = vmatprep.subr.bf16.mxu1 %v1206_v54 }
  0x39   : > { %673 = vmatpush2.bf16.msra.mxu0 %v1207_v57 }
  0x3a   : > { %811 = vmatpush2.bf16.msra.mxu1 %v1204_v56  ;;  %674 = vmatprep.subr.bf16.mxu0 %v1208_v59 }
  0x3b   : > { %812 = vmatprep.subr.bf16.mxu1 %v1212_v60 }
  0x3d   : > { %675 = vmatpush2.bf16.msra.mxu0 %v1213_v1 }
  0x3e   : > { %813 = vmatpush2.bf16.msra.mxu1 %v1210_v63  ;;  %676 = vmatprep.subr.bf16.mxu0 %v1214_v3 }
  0x3f   : > { %814 = vmatprep.subr.bf16.mxu1 %v1218_v4 }
  0x41   : > { %677 = vmatpush2.bf16.msra.mxu0 %v1219_v7 }
  0x42   : > { %815 = vmatpush2.bf16.msra.mxu1 %v1216_v6  ;;  %678 = vmatprep.subr.bf16.mxu0 %v1220_v8 }
  0x43   : > { %816 = vmatprep.subr.bf16.mxu1 %v1224_v9 }
  0x45   : > { %679 = vmatpush2.bf16.msra.mxu0 %v1225_v11 }
  0x46   : > { %817 = vmatpush2.bf16.msra.mxu1 %v1222_v10  ;;  %680 = vmatprep.subr.bf16.mxu0 %v1226_v12 }
  0x47   : > { %818 = vmatprep.subr.bf16.mxu1 %v1230_v13 }
  0x49   : > { %681 = vmatpush2.bf16.msra.mxu0 %v1231_v16 }
  0x4a   : > { %819 = vmatpush2.bf16.msra.mxu1 %v1228_v14  ;;  %875 = vmatprep.subr.bf16.mxu0 %v1237_v20 }
  0x4b   : > { %820 = vmatprep.subr.bf16.mxu1 %v1234_v19 }
  0x4c   : > { %683 = vmatmul.mubr.bf16.vlgmr.msra.gmra.mxu0 %v193_v23 }
  0x4d   : > { %876 = vmatpush1.bf16.msra.mxu0 %v1235_v25  ;;  %692 = vmatprep.mubr.bf16.mxu0 %v197_v27 }
  0x4e   : > { %821 = vmatpush2.bf16.msra.mxu1 %v1232_v24  ;;  %877 = vmatprep.subr.bf16.mxu0 %v1243_v28 }
  0x4f   : > { %822 = vmatprep.subr.bf16.mxu1 %v1240_v26 }
  0x51   : > { %878 = vmatpush1.bf16.msra.mxu0 %v1241_v32 }
  0x52   : > { %823 = vmatpush2.bf16.msra.mxu1 %v1238_v29 }
  0x53   : > { %1121 = vmatprep.subr.bf16.mxu1 %v1237_v20 }
  0x54   : > { %693 = vmatmul.mubr.bf16.gmra.mxu0 %v196_v35 }
  0x55   : > { %825 = vmatmul.mubr.bf16.vlgmr.msra.gmra.mxu1 %v193_v23  ;;  %702 = vmatprep.mubr.bf16.mxu0 %v200_v36 }
  0x56   : > { %834 = vmatprep.mubr.bf16.mxu1 %v197_v27  ;;  %1123 = vmatpush1.bf16.msra.mxu1 %v1235_v25 }
  0x57   : > { %1122 = vmatprep.subr.bf16.mxu1 %v1243_v28 }
  0x5a   : > { %1124 = vmatpush1.bf16.msra.mxu1 %v1241_v32 }
  0x5c   : > { %703 = vmatmul.mubr.bf16.gmra.mxu0 %v199_v40 }
  0x5d   : > { %835 = vmatmul.mubr.bf16.gmra.mxu1 %v196_v35  ;;  %712 = vmatprep.mubr.bf16.mxu0 %v203_v41 }
  0x5e   : > { %844 = vmatprep.mubr.bf16.mxu1 %v200_v36 }
  0x64   : > { %713 = vmatmul.mubr.bf16.gmra.mxu0 %v202_v43 }
  0x65   : > { %845 = vmatmul.mubr.bf16.gmra.mxu1 %v199_v40  ;;  %895 = vmatprep.mubr.bf16.mxu0 %v1252_v2 }
  0x66   : > { %854 = vmatprep.mubr.bf16.mxu1 %v203_v41 }
  0x6c   : > { %1114 = vmatmul.mubr.msk.bf16.vlgmr.msra.gmra.mxu0 %vm637_vm0, %v1328_v15 }
  0x6d   : > { %855 = vmatmul.mubr.bf16.gmra.mxu1 %v202_v43  ;;  %905 = vmatprep.mubr.bf16.mxu0 %v1252_v2 }
  0x6e   : > { %925 = vmatprep.mubr.bf16.mxu1 %v1252_v2 }
  0x74   : > { %1115 = vmatmul.mubr.msk.bf16.gmra.mxu0 %vm637_vm0, %v1419_v46 }
  0x75   : > { %1117 = vmatmul.mubr.msk.bf16.vlgmr.msra.gmra.mxu1 %vm637_vm0, %v1476_v5  ;;  %915 = vmatprep.mubr.bf16.mxu0 %v1252_v2 }
  0x7c   : > { %1116 = vmatmul.mubr.msk.bf16.gmra.mxu0 %vm637_vm0, %v1444_v55 }
  0xd5   : > { %v755_v44 = vpop.f32.mrf.mxu1 }
  0xd7   : > { %v757_v45 = vpop.f32.mrf.mxu1 }
  0xd9   : > { %v759_v47 = vpop.f32.mrf.mxu1 }
  0xdb   : > { %v761_v48 = vpop.f32.mrf.mxu1 }
  0xdd   : > { %v765_v15 = vpop.f32.mrf.mxu1 }
  0xdf   : > { %v767_v49 = vpop.f32.mrf.mxu1 }
  0xe1   : > { %v769_v50 = vpop.f32.mrf.mxu1 }
  0xe3   : > { %v771_v51 = vpop.f32.mrf.mxu1 }
  0xe5   : > { %v775_v52 = vpop.f32.mrf.mxu1 }
  0xe7   : > { %v777_v53 = vpop.f32.mrf.mxu1 }
  0xe9   : > { %v779_v54 = vpop.f32.mrf.mxu1 }
  0xeb   : > { %v781_v46 = vpop.f32.mrf.mxu1 }
  0xed   : > { %v1558_v56 = vpop.f32.mrf.mxu1 }
  0xef   : > { %v787_v57 = vpop.f32.mrf.mxu1 }
  0xf1   : > { %v789_v58 = vpop.f32.mrf.mxu1 }
  0xf3   : > { %v790_v2 = vpop.f32.mrf.mxu1 }
 0x10c   : > { %v684_v59 = vpop.f32.mrf.mxu0 }
 0x10d   : > { %v756_v55 = vadd.f32 %v755_v44, %v684_v59 }
 0x10e   : > { %v686_v60 = vpop.f32.mrf.mxu0 }
 0x10f   : > { %v758_v61 = vadd.f32 %v757_v45, %v686_v60 }
 0x110   : > { %v688_v62 = vpop.f32.mrf.mxu0 }
 0x111   : > { %v934_v63 = vmax.f32 %v756_v55, %v758_v61  ;;  %v760_v1 = vadd.f32 %v759_v47, %v688_v62 }
 0x112   : > { %v690_v0 = vpop.f32.mrf.mxu0 }
 0x113   : > { %v762_v3 = vadd.f32 %v761_v48, %v690_v0 }
 0x114   : > { %v694_v4 = vpop.f32.mrf.mxu0 }
 0x115   : > { %v826_v5 = vpop.f32.mrf.mxu1  ;;  %v935_v6 = vmax.f32 %v760_v1, %v762_v3  ;;  %v1560_v9 = vadd.f32 %v765_v15, %v694_v4 }
 0x116   : > { %v696_v7 = vpop.f32.mrf.mxu0 }
 0x117   : > { %v828_v8 = vpop.f32.mrf.mxu1  ;;  %v1562_v10 = vadd.f32 %v767_v49, %v696_v7  ;;  %v1118_v49 = vld [vmem:[%s1618_s2] ss:$0 sm:$0xff] }
 0x118   : > { %v698_v11 = vpop.f32.mrf.mxu0 }
 0x119   : > { %v830_v12 = vpop.f32.mrf.mxu1  ;;  %v936_v13 = vmax.f32 %v1560_v9, %v1562_v10  ;;  %v1566_v17 = vadd.f32 %v769_v50, %v698_v11 }
 0x11a   : > { %v700_v14 = vpop.f32.mrf.mxu0 }
 0x11b   : > { %v832_v16 = vpop.f32.mrf.mxu1  ;;  %v1568_v18 = vadd.f32 %v771_v51, %v700_v14 }
 0x11c   : > { %v704_v19 = vpop.f32.mrf.mxu0 }
 0x11d   : > { %v836_v20 = vpop.f32.mrf.mxu1  ;;  %v937_v21 = vmax.f32 %v1566_v17, %v1568_v18  ;;  %v1572_v24 = vadd.f32 %v775_v52, %v704_v19 }
 0x11e   : > { %v706_v22 = vpop.f32.mrf.mxu0 }
 0x11f   : > { %v838_v23 = vpop.f32.mrf.mxu1  ;;  %v1574_v25 = vadd.f32 %v777_v53, %v706_v22 }
 0x120   : > { %v708_v26 = vpop.f32.mrf.mxu0 }
 0x121   : > { %v840_v27 = vpop.f32.mrf.mxu1  ;;  %v938_v28 = vmax.f32 %v1572_v24, %v1574_v25  ;;  %v1578_v31 = vadd.f32 %v779_v54, %v708_v26 }
 0x122   : > { %v710_v29 = vpop.f32.mrf.mxu0 }
 0x123   : > { %v842_v30 = vpop.f32.mrf.mxu1  ;;  %v1580_v32 = vadd.f32 %v781_v46, %v710_v29 }
 0x124   : > { %v714_v33 = vpop.f32.mrf.mxu0 }
 0x125   : > { %v846_v34 = vpop.f32.mrf.mxu1  ;;  %v939_v35 = vmax.f32 %v1578_v31, %v1580_v32  ;;  %v786_v2 = vadd.f32 %v1558_v56, %v714_v33 }
 0x126   : > { %v716_v36 = vpop.f32.mrf.mxu0 }
 0x127   : > { %v848_v37 = vpop.f32.mrf.mxu1  ;;  %v788_v52 = vadd.f32 %v787_v57, %v716_v36 }
 0x128   : > { %v718_v38 = vpop.f32.mrf.mxu0 }
 0x129   : > { %v850_v39 = vpop.f32.mrf.mxu1 }
 0x12a   : > { %v719_v40 = vpop.f32.mrf.mxu0 }
 0x12b   : > { %v1584_v41 = vpop.f32.mrf.mxu1 }
 0x12c   : > { %v897_v43 = vpop.f32.mrf.mxu0 }
 0x12d   : > { %v856_v42 = vpop.f32.mrf.mxu1  ;;  %v898_v44 = vadd.f32 %v897_v43, %v826_v5 }
 0x12e   : > { %v899_v47 = vpop.f32.mrf.mxu0 }
 0x12f   : > { %v858_v45 = vpop.f32.mrf.mxu1  ;;  %v941_v48 = vmax.f32 %v934_v63, %v898_v44  ;;  %v900_v15 = vadd.f32 %v899_v47, %v828_v8  ;;  %v940_v63 = vmax.f32 %v786_v2, %v788_v52 }
 0x130   : > { %v901_v51 = vpop.f32.mrf.mxu0 }
 0x131   : > { %v860_v50 = vpop.f32.mrf.mxu1  ;;  %v948_v53 = vmax.f32 %v941_v48, %v900_v15  ;;  %v902_v54 = vadd.f32 %v901_v51, %v830_v12 }
 0x132   : > { %v903_v58 = vpop.f32.mrf.mxu0 }
 0x133   : > { %v861_v46 = vpop.f32.mrf.mxu1  ;;  %v962_v59 = vadd.f32 %v1118_v49, %v948_v53  ;;  %v942_v60 = vmax.f32 %v935_v6, %v902_v54  ;;  %v904_v55 = vadd.f32 %v903_v58, %v832_v16 }
 0x134   : > { %v907_v61 = vpop.f32.mrf.mxu0 }
 0x135   : > { %v927_v62 = vpop.f32.mrf.mxu1  ;;  %969 = vst [vmem:[%s1593_s21] sm:$0xff] %v962_v59  ;;  %v949_v57 = vmax.f32 %v942_v60, %v904_v55  ;;  %v908_v0 = vadd.f32 %v907_v61, %v836_v20 }
 0x136   : > { %v928_v1 = vadd.f32 %v927_v62, %v856_v42  ;;  %v909_v3 = vpop.f32.mrf.mxu0 }
 0x137   : > { %v929_v4 = vpop.f32.mrf.mxu1  ;;  %v963_v5 = vadd.f32 %v1118_v49, %v949_v57  ;;  %v943_v7 = vmax.f32 %v936_v13, %v908_v0  ;;  %v910_v9 = vadd.f32 %v909_v3, %v838_v23 }
 0x138   : > { %v947_v8 = vmax.f32 %v940_v63, %v928_v1  ;;  %v930_v10 = vadd.f32 %v929_v4, %v858_v45  ;;  %v911_v56 = vpop.f32.mrf.mxu0 }
 0x139   : > { %v931_v6 = vpop.f32.mrf.mxu1  ;;  %970 = vst [vmem:[%s1593_s21 + $0x8] sm:$0xff] %v963_v5  ;;  %v950_v11 = vmax.f32 %v943_v7, %v910_v9  ;;  %v912_v12 = vadd.f32 %v911_v56, %v840_v27 }
 0x13a   : > { %v954_v14 = vmax.f32 %v947_v8, %v930_v10  ;;  %v913_v16 = vpop.f32.mrf.mxu0 }
 0x13b   : > { %v932_v19 = vpop.f32.mrf.mxu1  ;;  %v964_v20 = vadd.f32 %v1118_v49, %v950_v11  ;;  %v944_v22 = vmax.f32 %v937_v21, %v912_v12  ;;  %v914_v13 = vadd.f32 %v913_v16, %v842_v30 }
 0x13c   : > { %v968_v26 = vadd.f32 %v1118_v49, %v954_v14  ;;  %v917_v29 = vpop.f32.mrf.mxu0 }
 0x13d   : > { %971 = vst [vmem:[%s1593_s21 + $0x10] sm:$0xff] %v964_v20  ;;  %v951_v23 = vmax.f32 %v944_v22, %v914_v13  ;;  %v918_v33 = vadd.f32 %v917_v29, %v846_v34 }
 0x13e   : > { %975 = vst [vmem:[%s1593_s21 + $0x30] sm:$0x1] %v968_v26  ;;  %v919_v36 = vpop.f32.mrf.mxu0 }
 0x13f   : > { %v965_v27 = vadd.f32 %v1118_v49, %v951_v23  ;;  %v945_v38 = vmax.f32 %v938_v28, %v918_v33  ;;  %v920_v40 = vadd.f32 %v919_v36, %v848_v37 }
 0x140   : > { %v921_v42 = vpop.f32.mrf.mxu0 }
 0x141   : > { %972 = vst [vmem:[%s1593_s21 + $0x18] sm:$0xff] %v965_v27  ;;  %v952_v17 = vmax.f32 %v945_v38, %v920_v40  ;;  %v922_v18 = vadd.f32 %v921_v42, %v850_v39 }
 0x142   : > { %v923_v21 = vpop.f32.mrf.mxu0 }
 0x143   : > { %v966_v30 = vadd.f32 %v1118_v49, %v952_v17  ;;  %v946_v43 = vmax.f32 %v939_v35, %v922_v18  ;;  %v924_v34 = vadd.f32 %v923_v21, %v1584_v41 }
 0x145   : > { %973 = vst [vmem:[%s1593_s21 + $0x20] sm:$0xff] %v966_v30  ;;  %v953_v44 = vmax.f32 %v946_v43, %v924_v34 }
 0x147   : > { %v967_v45 = vadd.f32 %v1118_v49, %v953_v44 }
 0x149   : > { %974 = vst [vmem:[%s1593_s21 + $0x28] sm:$0xff] %v967_v45 }
 0x14a PF: > { %s13_s12 = sadd.s32 1, %s1250_s12  }
 0x14b   : > { %p10_p4 = scmp.ge.s32.totalorder %s13_s12, 4  }
 0x14d   :  { %12 = sbr.rel (!%p10_p4) target bundleno = 1 (0x1), region = 62 }

// kernel: archb_forward.5
= control target key start
LH: loop header
LB: loop body
LE: loop exit
PB: predicated region body
PF: predicated region fallthrough
CT: control target
= control target key end

     0   :  { %v8680_v35 = vmov 1983009808   ;;  %v58_v37 = vlaneseq  ;;  %s11495_s0 = inlined_call_operand.vmem [shape: f32[2,6272], index: 0, kind: input, shape index: {}]   ;;  %s11496_s1 = inlined_call_operand.vmem [shape: bf16[6272,256], index: 1, kind: input, shape index: {}]   ;;  %s11497_s2 = inlined_call_operand.vmem [shape: f32[1,256], index: 2, kind: input, shape index: {}]   ;;  %s11498_s3 = inlined_call_operand.vmem [shape: bf16[256,256], index: 3, kind: input, shape index: {}]   ;;  %s11499_s4 = inlined_call_operand.vmem [shape: f32[1,256], index: 4, kind: input, shape index: {}]   ;;  %s11500_s5 = inlined_call_operand.vmem [shape: bf16[256,128], index: 5, kind: input, shape index: {}]   ;;  %s11501_s6 = inlined_call_operand.vmem [shape: f32[1,128], index: 6, kind: input, shape index: {}]   ;;  %s11502_s7 = inlined_call_operand.hbm [shape: f32[2,128], index: 7, kind: output, shape index: {}]  }
   0x1   :  { %v7406_v0 = vld [vmem:[%s11496_s1 + $0x74] ss:$8 sps:$4 sm:$0xff]   ;;  %v7408_v1 = vld [vmem:[%s11496_s1 + $0x70] ss:$8 sps:$4 sm:$0xff]   ;;  %v7412_v4 = vld [vmem:[%s11496_s1 + $0x64] ss:$8 sps:$4 sm:$0xff]   ;;  %v56_v36 = vunpack.c.l.s4 %v8680_v35 }
   0x2   :  { %5079 = vmatprep.subr.bf16.mxu0 %v7406_v0  ;;  %v7409_v2 = vld [vmem:[%s11496_s1 + $0x174] ss:$8 sps:$4 sm:$0xff]   ;;  %v7411_v3 = vld [vmem:[%s11496_s1 + $0x170] ss:$8 sps:$4 sm:$0xff]   ;;  %v7414_v5 = vld [vmem:[%s11496_s1 + $0x60] ss:$8 sps:$4 sm:$0xff]  }
   0x3   :  { %5080 = vmatpush1.bf16.msra.mxu0 %v7408_v1  ;;  %5120 = vmatprep.subr.bf16.mxu1 %v7409_v2  ;;  %v7415_v6 = vld [vmem:[%s11496_s1 + $0x164] ss:$8 sps:$4 sm:$0xff]   ;;  %v7417_v7 = vld [vmem:[%s11496_s1 + $0x160] ss:$8 sps:$4 sm:$0xff]   ;;  %v7418_v8 = vld [vmem:[%s11496_s1 + $0x54] ss:$8 sps:$4 sm:$0xff]   ;;  %v57_v42 = vunpack.c.0.s8 %v56_v36 }
   0x4   :  { %5121 = vmatpush1.bf16.msra.mxu1 %v7411_v3  ;;  %5081 = vmatprep.subr.bf16.mxu0 %v7412_v4  ;;  %v7420_v9 = vld [vmem:[%s11496_s1 + $0x50] ss:$8 sps:$4 sm:$0xff]   ;;  %v7421_v10 = vld [vmem:[%s11496_s1 + $0x154] ss:$8 sps:$4 sm:$0xff]   ;;  %v7424_v11 = vld [vmem:[%s11496_s1 + $0x44] ss:$8 sps:$4 sm:$0xff]  }
   0x5   :  { %5122 = vmatprep.subr.bf16.mxu1 %v7415_v6  ;;  %v7423_v12 = vld [vmem:[%s11496_s1 + $0x150] ss:$8 sps:$4 sm:$0xff]   ;;  %v7427_v13 = vld [vmem:[%s11496_s1 + $0x144] ss:$8 sps:$4 sm:$0xff]   ;;  %v7426_v14 = vld [vmem:[%s11496_s1 + $0x40] ss:$8 sps:$4 sm:$0xff]  }
   0x6   :  { %v7430_v15 = vld [vmem:[%s11496_s1 + $0x34] ss:$8 sps:$4 sm:$0xff]   ;;  %v7429_v16 = vld [vmem:[%s11496_s1 + $0x140] ss:$8 sps:$4 sm:$0xff]   ;;  %v7432_v18 = vld [vmem:[%s11496_s1 + $0x30] ss:$8 sps:$4 sm:$0xff]  }
   0x7   :  { %5082 = vmatpush1.bf16.msra.mxu0 %v7414_v5  ;;  %v7433_v17 = vld [vmem:[%s11496_s1 + $0x134] ss:$8 sps:$4 sm:$0xff]   ;;  %v7436_v19 = vld [vmem:[%s11496_s1 + $0x24] ss:$8 sps:$4 sm:$0xff]   ;;  %v7435_v20 = vld [vmem:[%s11496_s1 + $0x130] ss:$8 sps:$4 sm:$0xff]  }
   0x8   :  { %5083 = vmatprep.subr.bf16.mxu0 %v7418_v8  ;;  %5123 = vmatpush1.bf16.msra.mxu1 %v7417_v7  ;;  %v7439_v21 = vld [vmem:[%s11496_s1 + $0x124] ss:$8 sps:$4 sm:$0xff]   ;;  %v7438_v22 = vld [vmem:[%s11496_s1 + $0x20] ss:$8 sps:$4 sm:$0xff]   ;;  %v7442_v23 = vld [vmem:[%s11496_s1 + $0x14] ss:$8 sps:$4 sm:$0xff]  }
   0x9   :  { %5124 = vmatprep.subr.bf16.mxu1 %v7421_v10  ;;  %v7441_v24 = vld [vmem:[%s11496_s1 + $0x120] ss:$8 sps:$4 sm:$0xff]   ;;  %v7445_v25 = vld [vmem:[%s11496_s1 + $0x114] ss:$8 sps:$4 sm:$0xff]   ;;  %v7444_v26 = vld [vmem:[%s11496_s1 + $0x10] ss:$8 sps:$4 sm:$0xff]  }
   0xa   :  { %v7448_v27 = vld [vmem:[%s11496_s1 + $0x4] ss:$8 sps:$4 sm:$0xff]   ;;  %v7447_v28 = vld [vmem:[%s11496_s1 + $0x110] ss:$8 sps:$4 sm:$0xff]   ;;  %v7450_v30 = vld [vmem:[%s11496_s1] ss:$8 sps:$4 sm:$0xff]  }
   0xb   :  { %5084 = vmatpush1.bf16.msra.mxu0 %v7420_v9  ;;  %v7451_v29 = vld [vmem:[%s11496_s1 + $0x104] ss:$8 sps:$4 sm:$0xff]   ;;  %v7454_v31 = vld [vmem:[%s11496_s1 + $0xf4] ss:$8 sps:$4 sm:$0xff]   ;;  %v7453_v32 = vld [vmem:[%s11496_s1 + $0x100] ss:$8 sps:$4 sm:$0xff]  }
   0xc   :  { %5085 = vmatprep.subr.bf16.mxu0 %v7424_v11  ;;  %5125 = vmatpush1.bf16.msra.mxu1 %v7423_v12  ;;  %v7457_v33 = vld [vmem:[%s11496_s1 + $0x1f4] ss:$8 sps:$4 sm:$0xff]   ;;  %v7456_v34 = vld [vmem:[%s11496_s1 + $0xf0] ss:$8 sps:$4 sm:$0xff]   ;;  %v7460_v38 = vld [vmem:[%s11496_s1 + $0xe4] ss:$8 sps:$4 sm:$0xff]  }
   0xd   :  { %5126 = vmatprep.subr.bf16.mxu1 %v7427_v13  ;;  %v7459_v39 = vld [vmem:[%s11496_s1 + $0x1f0] ss:$8 sps:$4 sm:$0xff]   ;;  %v7463_v40 = vld [vmem:[%s11496_s1 + $0x1e4] ss:$8 sps:$4 sm:$0xff]   ;;  %v7462_v41 = vld [vmem:[%s11496_s1 + $0xe0] ss:$8 sps:$4 sm:$0xff]  }
   0xe   :  { %v8840_v43 = vshrl.u32 %v58_v37, 7  ;;  %v7466_v44 = vld [vmem:[%s11496_s1 + $0xd4] ss:$8 sps:$4 sm:$0xff]   ;;  %v7465_v45 = vld [vmem:[%s11496_s1 + $0x1e0] ss:$8 sps:$4 sm:$0xff]  }
   0xf   :  { %5086 = vmatpush1.bf16.msra.mxu0 %v7426_v14  ;;  %v7469_v46 = vld [vmem:[%s11496_s1 + $0x1d4] ss:$8 sps:$4 sm:$0xff]   ;;  %v7468_v47 = vld [vmem:[%s11496_s1 + $0xd0] ss:$8 sps:$4 sm:$0xff]   ;;  %v7472_v49 = vld [vmem:[%s11496_s1 + $0xc4] ss:$8 sps:$4 sm:$0xff]  }
  0x10   :  { %5087 = vmatprep.subr.bf16.mxu0 %v7430_v15  ;;  %5127 = vmatpush1.bf16.msra.mxu1 %v7429_v16  ;;  %v8855_v48 = vsub.s32 %v57_v42, %v8840_v43  ;;  %v7471_v50 = vld [vmem:[%s11496_s1 + $0x1d0] ss:$8 sps:$4 sm:$0xff]   ;;  %v7475_v51 = vld [vmem:[%s11496_s1 + $0x1c4] ss:$8 sps:$4 sm:$0xff]   ;;  %v7474_v53 = vld [vmem:[%s11496_s1 + $0xc0] ss:$8 sps:$4 sm:$0xff]  }
  0x11   :  { %5128 = vmatprep.subr.bf16.mxu1 %v7433_v17  ;;  %v28_v52 = vld [vmem:[%s11495_s0] sm:$0xff]  ;;  %v7478_v56 = vld [vmem:[%s11496_s1 + $0xb4] ss:$8 sps:$4 sm:$0xff]   ;;  %v7480_v61 = vld [vmem:[%s11496_s1 + $0xb0] ss:$8 sps:$4 sm:$0xff]  }
  0x12   :  { %v61_v54 = vrot.slane %v28_v52, %v8855_v48  ;;  %v54_v55 = vcombine.high %v28_v52, %v28_v52  ;;  %v7477_v57 = vld [vmem:[%s11496_s1 + $0x1c0] ss:$8 sps:$4 sm:$0xff]   ;;  %v7481_v60 = vld [vmem:[%s11496_s1 + $0x1b4] ss:$8 sps:$4 sm:$0xff]   ;;  %v7484_v0 = vld [vmem:[%s11496_s1 + $0xa4] ss:$8 sps:$4 sm:$0xff]  }
  0x13   :  { %5088 = vmatpush1.bf16.msra.mxu0 %v7432_v18  ;;  %v7483_v1 = vld [vmem:[%s11496_s1 + $0x1b0] ss:$8 sps:$4 sm:$0xff]   ;;  %v7487_v3 = vld [vmem:[%s11496_s1 + $0x1a4] ss:$8 sps:$4 sm:$0xff]   ;;  %v7486_v4 = vld [vmem:[%s11496_s1 + $0xa0] ss:$8 sps:$4 sm:$0xff]  }
  0x14   :  { %5089 = vmatprep.subr.bf16.mxu0 %v7436_v19  ;;  %5129 = vmatpush1.bf16.msra.mxu1 %v7435_v20  ;;  %v69_v58 = vcombine.high %v61_v54, %v61_v54  ;;  %v68_v59 = vrot.slane %v54_v55, %v8855_v48  ;;  %v7490_v5 = vld [vmem:[%s11496_s1 + $0x94] ss:$8 sps:$4 sm:$0xff]   ;;  %v7489_v6 = vld [vmem:[%s11496_s1 + $0x1a0] ss:$8 sps:$4 sm:$0xff]   ;;  %v7492_v8 = vld [vmem:[%s11496_s1 + $0x90] ss:$8 sps:$4 sm:$0xff]   ;;  %v314_v15 = vpack.c.bf16 %v61_v54, %v61_v54 }
  0x15   :  { %5130 = vmatprep.subr.bf16.mxu1 %v7439_v21  ;;  %v7493_v7 = vld [vmem:[%s11496_s1 + $0x194] ss:$8 sps:$4 sm:$0xff]   ;;  %v7496_v9 = vld [vmem:[%s11496_s1 + $0x84] ss:$8 sps:$4 sm:$0xff]   ;;  %v7495_v10 = vld [vmem:[%s11496_s1 + $0x190] ss:$8 sps:$4 sm:$0xff]  }
  0x16   :  { %v315_v62 = vpack.c.bf16 %v69_v58, %v69_v58  ;;  %v70_v63 = vcombine.high %v68_v59, %v68_v59  ;;  %v7499_v11 = vld [vmem:[%s11496_s1 + $0x184] ss:$8 sps:$4 sm:$0xff]   ;;  %v7498_v12 = vld [vmem:[%s11496_s1 + $0x80] ss:$8 sps:$4 sm:$0xff]   ;;  %v7504_v13 = vld [vmem:[%s11496_s1 + $0x274] ss:$8 sps:$4 sm:$0xff]   ;;  %v316_v18 = vpack.c.bf16 %v68_v59, %v68_v59 }
  0x17   :  { %5090 = vmatpush1.bf16.msra.mxu0 %v7438_v22  ;;  %v7501_v14 = vld [vmem:[%s11496_s1 + $0x180] ss:$8 sps:$4 sm:$0xff]   ;;  %v7508_v16 = vld [vmem:[%s11496_s1 + $0x374] ss:$8 sps:$4 sm:$0xff]   ;;  %v7502_v17 = vld [vmem:[%s11496_s1 + $0x270] ss:$8 sps:$4 sm:$0xff]  }
  0x18   :  { %5091 = vmatprep.subr.bf16.mxu0 %v7442_v23  ;;  %5131 = vmatpush1.bf16.msra.mxu1 %v7441_v24  ;;  %v317_v2 = vpack.c.bf16 %v70_v63, %v70_v63  ;;  %v7511_v19 = vld [vmem:[%s11496_s1 + $0x264] ss:$8 sps:$4 sm:$0xff]   ;;  %v7506_v20 = vld [vmem:[%s11496_s1 + $0x370] ss:$8 sps:$4 sm:$0xff]   ;;  %v7509_v22 = vld [vmem:[%s11496_s1 + $0x260] ss:$8 sps:$4 sm:$0xff]  }
  0x19   :  { %5132 = vmatprep.subr.bf16.mxu1 %v7445_v25  ;;  %5111 = vmatprep.mubr.bf16.mxu0 %v315_v62  ;;  %v7514_v21 = vld [vmem:[%s11496_s1 + $0x364] ss:$8 sps:$4 sm:$0xff]   ;;  %v7517_v23 = vld [vmem:[%s11496_s1 + $0x254] ss:$8 sps:$4 sm:$0xff]   ;;  %v7512_v24 = vld [vmem:[%s11496_s1 + $0x360] ss:$8 sps:$4 sm:$0xff]  }
  0x1a   :  { %5152 = vmatprep.mubr.bf16.mxu1 %v317_v2  ;;  %v7520_v25 = vld [vmem:[%s11496_s1 + $0x354] ss:$8 sps:$4 sm:$0xff]   ;;  %v7535_v35 = vld [vmem:[%s11496_s1 + $0x224] ss:$8 sps:$4 sm:$0xff]   ;;  %v7530_v36 = vld [vmem:[%s11496_s1 + $0x330] ss:$8 sps:$4 sm:$0xff]  }
  0x1b   :  { %5092 = vmatpush1.bf16.msra.mxu0 %v7444_v26  ;;  %v7515_v26 = vld [vmem:[%s11496_s1 + $0x250] ss:$8 sps:$4 sm:$0xff]   ;;  %v7538_v37 = vld [vmem:[%s11496_s1 + $0x324] ss:$8 sps:$4 sm:$0xff]   ;;  %v7544_v42 = vld [vmem:[%s11496_s1 + $0x314] ss:$8 sps:$4 sm:$0xff]  }
  0x1c   :  { %5093 = vmatprep.subr.bf16.mxu0 %v7448_v27  ;;  %5133 = vmatpush1.bf16.msra.mxu1 %v7447_v28  ;;  %v7523_v27 = vld [vmem:[%s11496_s1 + $0x244] ss:$8 sps:$4 sm:$0xff]   ;;  %v7518_v28 = vld [vmem:[%s11496_s1 + $0x350] ss:$8 sps:$4 sm:$0xff]   ;;  %v7545_v55 = vld [vmem:[%s11496_s1 + $0x200] ss:$8 sps:$4 sm:$0xff]  }
  0x1d   :  { %5134 = vmatprep.subr.bf16.mxu1 %v7451_v29  ;;  %v7526_v29 = vld [vmem:[%s11496_s1 + $0x344] ss:$8 sps:$4 sm:$0xff]   ;;  %v7548_v58 = vld [vmem:[%s11496_s1 + $0x300] ss:$8 sps:$4 sm:$0xff]   ;;  %v7556_v59 = vld [vmem:[%s11496_s1 + $0x3f4] ss:$8 sps:$4 sm:$0xff]  }
  0x1e   :  { %v7550_v52 = vld [vmem:[%s11496_s1 + $0x304] ss:$8 sps:$4 sm:$0xff]   ;;  %v7554_v62 = vld [vmem:[%s11496_s1 + $0x3f0] ss:$8 sps:$4 sm:$0xff]   ;;  %v7560_v2 = vld [vmem:[%s11496_s1 + $0x3e0] ss:$8 sps:$4 sm:$0xff]  }
  0x1f   :  { %5094 = vmatpush1.bf16.msra.mxu0 %v7450_v30  ;;  %v7521_v30 = vld [vmem:[%s11496_s1 + $0x240] ss:$8 sps:$4 sm:$0xff]   ;;  %v7562_v63 = vld [vmem:[%s11496_s1 + $0x3e4] ss:$8 sps:$4 sm:$0xff]  }
  0x20   :  { %5095 = vmatprep.subr.bf16.mxu0 %v7454_v31  ;;  %5135 = vmatpush1.bf16.msra.mxu1 %v7453_v32  ;;  %v7529_v31 = vld [vmem:[%s11496_s1 + $0x234] ss:$8 sps:$4 sm:$0xff]   ;;  %v7524_v32 = vld [vmem:[%s11496_s1 + $0x340] ss:$8 sps:$4 sm:$0xff]  }
  0x21   :  { %5136 = vmatprep.subr.bf16.mxu1 %v7457_v33  ;;  %v7532_v33 = vld [vmem:[%s11496_s1 + $0x334] ss:$8 sps:$4 sm:$0xff]  }
  0x23   :  { %5096 = vmatpush2.bf16.msra.mxu0 %v7456_v34  ;;  %v7527_v34 = vld [vmem:[%s11496_s1 + $0x230] ss:$8 sps:$4 sm:$0xff]  }
  0x24   :  { %5097 = vmatprep.subr.bf16.mxu0 %v7460_v38  ;;  %5137 = vmatpush2.bf16.msra.mxu1 %v7459_v39  ;;  %v7533_v38 = vld [vmem:[%s11496_s1 + $0x220] ss:$8 sps:$4 sm:$0xff]   ;;  %v7541_v39 = vld [vmem:[%s11496_s1 + $0x214] ss:$8 sps:$4 sm:$0xff]  }
  0x25   :  { %5138 = vmatprep.subr.bf16.mxu1 %v7463_v40  ;;  %v7536_v40 = vld [vmem:[%s11496_s1 + $0x320] ss:$8 sps:$4 sm:$0xff]  }
  0x27   :  { %5098 = vmatpush2.bf16.msra.mxu0 %v7462_v41  ;;  %v29_v41 = vld [vmem:[%s11495_s0 + $0x8] sm:$0xff] }
  0x28   :  { %5099 = vmatprep.subr.bf16.mxu0 %v7466_v44  ;;  %5139 = vmatpush2.bf16.msra.mxu1 %v7465_v45  ;;  %v9007_v44 = vrot.slane %v29_v41, %v8855_v48  ;;  %v71_v45 = vcombine.high %v29_v41, %v29_v41  ;;  %v7609_v41 = vld [vmem:[%s11496_s1 + $0x560] ss:$8 sps:$4 sm:$0xff]  }
  0x29   :  { %5140 = vmatprep.subr.bf16.mxu1 %v7469_v46  ;;  %v7539_v46 = vld [vmem:[%s11496_s1 + $0x210] ss:$8 sps:$4 sm:$0xff]  }
  0x2b   :  { %5100 = vmatpush2.bf16.msra.mxu0 %v7468_v47  ;;  %v7547_v47 = vld [vmem:[%s11496_s1 + $0x204] ss:$8 sps:$4 sm:$0xff]  }
  0x2c   :  { %5101 = vmatprep.subr.bf16.mxu0 %v7472_v49  ;;  %5141 = vmatpush2.bf16.msra.mxu1 %v7471_v50  ;;  %v86_v49 = vcombine.high %v9007_v44, %v9007_v44  ;;  %v9018_v50 = vrot.slane %v71_v45, %v8855_v48  ;;  %v7617_v45 = vld [vmem:[%s11496_s1 + $0x554] ss:$8 sps:$4 sm:$0xff]  }
  0x2d   :  { %5142 = vmatprep.subr.bf16.mxu1 %v7475_v51  ;;  %v7542_v51 = vld [vmem:[%s11496_s1 + $0x310] ss:$8 sps:$4 sm:$0xff]  }
  0x2e   :  { %v87_v54 = vcombine.high %v9018_v50, %v9018_v50 }
  0x2f   :  { %5102 = vmatpush2.bf16.msra.mxu0 %v7474_v53  ;;  %v319_v53 = vpack.c.bf16 %v86_v49, %v86_v49  ;;  %v7620_v49 = vld [vmem:[%s11496_s1 + $0x444] ss:$8 sps:$4 sm:$0xff]  }
  0x30   :  { %5103 = vmatprep.subr.bf16.mxu0 %v7478_v56  ;;  %5143 = vmatpush2.bf16.msra.mxu1 %v7477_v57  ;;  %v7553_v56 = vld [vmem:[%s11496_s1 + $0x2f4] ss:$8 sps:$4 sm:$0xff]   ;;  %v321_v57 = vpack.c.bf16 %v87_v54, %v87_v54  ;;  %v7621_v54 = vld [vmem:[%s11496_s1 + $0x540] ss:$8 sps:$4 sm:$0xff]  }
  0x31   :  { %5144 = vmatprep.subr.bf16.mxu1 %v7481_v60  ;;  %v7551_v60 = vld [vmem:[%s11496_s1 + $0x2f0] ss:$8 sps:$4 sm:$0xff]  }
  0x33   :  { %5104 = vmatpush2.bf16.msra.mxu0 %v7480_v61  ;;  %v7559_v61 = vld [vmem:[%s11496_s1 + $0x2e4] ss:$8 sps:$4 sm:$0xff]  }
  0x34   :  { %5105 = vmatprep.subr.bf16.mxu0 %v7484_v0  ;;  %5145 = vmatpush2.bf16.msra.mxu1 %v7483_v1  ;;  %v7557_v0 = vld [vmem:[%s11496_s1 + $0x2e0] ss:$8 sps:$4 sm:$0xff]   ;;  %v7565_v1 = vld [vmem:[%s11496_s1 + $0x2d4] ss:$8 sps:$4 sm:$0xff]  }
  0x35   :  { %5146 = vmatprep.subr.bf16.mxu1 %v7487_v3  ;;  %v7568_v3 = vld [vmem:[%s11496_s1 + $0x3d4] ss:$8 sps:$4 sm:$0xff]  }
  0x37   :  { %5106 = vmatpush2.bf16.msra.mxu0 %v7486_v4  ;;  %v7563_v4 = vld [vmem:[%s11496_s1 + $0x2d0] ss:$8 sps:$4 sm:$0xff]  }
  0x38   :  { %5107 = vmatprep.subr.bf16.mxu0 %v7490_v5  ;;  %5147 = vmatpush2.bf16.msra.mxu1 %v7489_v6  ;;  %v7571_v5 = vld [vmem:[%s11496_s1 + $0x2c4] ss:$8 sps:$4 sm:$0xff]   ;;  %v7566_v6 = vld [vmem:[%s11496_s1 + $0x3d0] ss:$8 sps:$4 sm:$0xff]  }
  0x39   :  { %5148 = vmatprep.subr.bf16.mxu1 %v7493_v7  ;;  %v7574_v7 = vld [vmem:[%s11496_s1 + $0x3c4] ss:$8 sps:$4 sm:$0xff]  }
  0x3b   :  { %5108 = vmatpush2.bf16.msra.mxu0 %v7492_v8  ;;  %v7569_v8 = vld [vmem:[%s11496_s1 + $0x2c0] ss:$8 sps:$4 sm:$0xff]  }
  0x3c   :  { %5109 = vmatprep.subr.bf16.mxu0 %v7496_v9  ;;  %5149 = vmatpush2.bf16.msra.mxu1 %v7495_v10  ;;  %v7577_v9 = vld [vmem:[%s11496_s1 + $0x2b4] ss:$8 sps:$4 sm:$0xff]   ;;  %v7572_v10 = vld [vmem:[%s11496_s1 + $0x3c0] ss:$8 sps:$4 sm:$0xff]  }
  0x3d   :  { %5150 = vmatprep.subr.bf16.mxu1 %v7499_v11  ;;  %v7580_v11 = vld [vmem:[%s11496_s1 + $0x3b4] ss:$8 sps:$4 sm:$0xff]  }
  0x3f   :  { %5110 = vmatpush2.bf16.msra.mxu0 %v7498_v12  ;;  %v7575_v12 = vld [vmem:[%s11496_s1 + $0x2b0] ss:$8 sps:$4 sm:$0xff]  }
  0x40   :  { %5161 = vmatprep.subr.bf16.mxu0 %v7504_v13  ;;  %5151 = vmatpush2.bf16.msra.mxu1 %v7501_v14  ;;  %v7583_v13 = vld [vmem:[%s11496_s1 + $0x2a4] ss:$8 sps:$4 sm:$0xff]   ;;  %v7578_v14 = vld [vmem:[%s11496_s1 + $0x3b0] ss:$8 sps:$4 sm:$0xff]  }
  0x41   :  { %5202 = vmatprep.subr.bf16.mxu1 %v7508_v16  ;;  %v7581_v16 = vld [vmem:[%s11496_s1 + $0x2a0] ss:$8 sps:$4 sm:$0xff]  }
  0x42   :  { %5112 = vmatmul.mubr.bf16.vlgmr.msra.gmra.mxu0 %v314_v15  ;;  %v7586_v15 = vld [vmem:[%s11496_s1 + $0x3a4] ss:$8 sps:$4 sm:$0xff]  }
  0x43   :  { %5162 = vmatpush1.bf16.msra.mxu0 %v7502_v17  ;;  %5153 = vmatmul.mubr.bf16.vlgmr.msra.gmra.mxu1 %v316_v18  ;;  %v7589_v17 = vld [vmem:[%s11496_s1 + $0x294] ss:$8 sps:$4 sm:$0xff]   ;;  %v7584_v18 = vld [vmem:[%s11496_s1 + $0x3a0] ss:$8 sps:$4 sm:$0xff]  }
  0x44   :  { %5163 = vmatprep.subr.bf16.mxu0 %v7511_v19  ;;  %5203 = vmatpush1.bf16.msra.mxu1 %v7506_v20  ;;  %v7592_v19 = vld [vmem:[%s11496_s1 + $0x394] ss:$8 sps:$4 sm:$0xff]   ;;  %v7587_v20 = vld [vmem:[%s11496_s1 + $0x290] ss:$8 sps:$4 sm:$0xff]  }
  0x45   :  { %5204 = vmatprep.subr.bf16.mxu1 %v7514_v21  ;;  %5193 = vmatprep.mubr.bf16.mxu0 %v319_v53  ;;  %v7595_v21 = vld [vmem:[%s11496_s1 + $0x284] ss:$8 sps:$4 sm:$0xff]   ;;  %v7626_v53 = vld [vmem:[%s11496_s1 + $0x434] ss:$8 sps:$4 sm:$0xff]  }
  0x46   :  { %5234 = vmatprep.mubr.bf16.mxu1 %v321_v57  ;;  %v7632_v57 = vld [vmem:[%s11496_s1 + $0x424] ss:$8 sps:$4 sm:$0xff]  }
  0x47   :  { %5164 = vmatpush1.bf16.msra.mxu0 %v7509_v22  ;;  %v7590_v22 = vld [vmem:[%s11496_s1 + $0x390] ss:$8 sps:$4 sm:$0xff]  }
  0x48   :  { %5165 = vmatprep.subr.bf16.mxu0 %v7517_v23  ;;  %5205 = vmatpush1.bf16.msra.mxu1 %v7512_v24  ;;  %v7598_v23 = vld [vmem:[%s11496_s1 + $0x384] ss:$8 sps:$4 sm:$0xff]   ;;  %v7593_v24 = vld [vmem:[%s11496_s1 + $0x280] ss:$8 sps:$4 sm:$0xff]  }
  0x49   :  { %5206 = vmatprep.subr.bf16.mxu1 %v7520_v25  ;;  %v7601_v25 = vld [vmem:[%s11496_s1 + $0x474] ss:$8 sps:$4 sm:$0xff]  }
  0x4b   :  { %5166 = vmatpush1.bf16.msra.mxu0 %v7515_v26  ;;  %v7596_v26 = vld [vmem:[%s11496_s1 + $0x380] ss:$8 sps:$4 sm:$0xff]  }
  0x4c   :  { %5167 = vmatprep.subr.bf16.mxu0 %v7523_v27  ;;  %5207 = vmatpush1.bf16.msra.mxu1 %v7518_v28  ;;  %v318_v27 = vpack.c.bf16 %v9007_v44, %v9007_v44  ;;  %v7605_v28 = vld [vmem:[%s11496_s1 + $0x574] ss:$8 sps:$4 sm:$0xff]  }
  0x4d   :  { %5208 = vmatprep.subr.bf16.mxu1 %v7526_v29  ;;  %v7599_v29 = vld [vmem:[%s11496_s1 + $0x470] ss:$8 sps:$4 sm:$0xff]  }
  0x4f   :  { %5168 = vmatpush1.bf16.msra.mxu0 %v7521_v30  ;;  %v320_v30 = vpack.c.bf16 %v9018_v50, %v9018_v50  ;;  %v7615_v50 = vld [vmem:[%s11496_s1 + $0x550] ss:$8 sps:$4 sm:$0xff]  }
  0x50   :  { %5169 = vmatprep.subr.bf16.mxu0 %v7529_v31  ;;  %5209 = vmatpush1.bf16.msra.mxu1 %v7524_v32  ;;  %v7608_v31 = vld [vmem:[%s11496_s1 + $0x464] ss:$8 sps:$4 sm:$0xff]   ;;  %v30_v32 = vld [vmem:[%s11495_s0 + $0x10] sm:$0xff] }
  0x51   :  { %5210 = vmatprep.subr.bf16.mxu1 %v7532_v33  ;;  %v7603_v33 = vld [vmem:[%s11496_s1 + $0x570] ss:$8 sps:$4 sm:$0xff]  }
  0x53   :  { %5170 = vmatpush1.bf16.msra.mxu0 %v7527_v34  ;;  %v9153_v34 = vrot.slane %v30_v32, %v8855_v48 }
  0x54   :  { %5171 = vmatprep.subr.bf16.mxu0 %v7535_v35  ;;  %5211 = vmatpush1.bf16.msra.mxu1 %v7530_v36  ;;  %v88_v35 = vcombine.high %v30_v32, %v30_v32  ;;  %v7611_v36 = vld [vmem:[%s11496_s1 + $0x564] ss:$8 sps:$4 sm:$0xff]  }
  0x55   :  { %5212 = vmatprep.subr.bf16.mxu1 %v7538_v37  ;;  %v7606_v37 = vld [vmem:[%s11496_s1 + $0x460] ss:$8 sps:$4 sm:$0xff]  }
  0x57   :  { %5172 = vmatpush1.bf16.msra.mxu0 %v7533_v38  ;;  %v103_v38 = vcombine.high %v9153_v34, %v9153_v34 }
  0x58   :  { %5173 = vmatprep.subr.bf16.mxu0 %v7541_v39  ;;  %5213 = vmatpush1.bf16.msra.mxu1 %v7536_v40  ;;  %v9164_v39 = vrot.slane %v88_v35, %v8855_v48  ;;  %v7614_v40 = vld [vmem:[%s11496_s1 + $0x454] ss:$8 sps:$4 sm:$0xff]   ;;  %v7684_v35 = vld [vmem:[%s11496_s1 + $0x490] ss:$8 sps:$4 sm:$0xff]  }
  0x59   :  { %5214 = vmatprep.subr.bf16.mxu1 %v7544_v42  ;;  %v323_v42 = vpack.c.bf16 %v103_v38, %v103_v38  ;;  %v7687_v38 = vld [vmem:[%s11496_s1 + $0x590] ss:$8 sps:$4 sm:$0xff]  }
  0x5a   :  { %v104_v44 = vcombine.high %v9164_v39, %v9164_v39 }
  0x5b   :  { %5174 = vmatpush1.bf16.msra.mxu0 %v7539_v46  ;;  %v7612_v46 = vld [vmem:[%s11496_s1 + $0x450] ss:$8 sps:$4 sm:$0xff]  }
  0x5c   :  { %5175 = vmatprep.subr.bf16.mxu0 %v7547_v47  ;;  %5215 = vmatpush1.bf16.msra.mxu1 %v7542_v51  ;;  %v325_v47 = vpack.c.bf16 %v104_v44, %v104_v44  ;;  %v7623_v51 = vld [vmem:[%s11496_s1 + $0x544] ss:$8 sps:$4 sm:$0xff]  }
  0x5d   :  { %5216 = vmatprep.subr.bf16.mxu1 %v7550_v52  ;;  %v7618_v52 = vld [vmem:[%s11496_s1 + $0x440] ss:$8 sps:$4 sm:$0xff]  }
  0x5f   :  { %5176 = vmatpush1.bf16.msra.mxu0 %v7545_v55  ;;  %v7629_v55 = vld [vmem:[%s11496_s1 + $0x534] ss:$8 sps:$4 sm:$0xff]  }
  0x60   :  { %5177 = vmatprep.subr.bf16.mxu0 %v7553_v56  ;;  %5217 = vmatpush1.bf16.msra.mxu1 %v7548_v58  ;;  %v7624_v56 = vld [vmem:[%s11496_s1 + $0x430] ss:$8 sps:$4 sm:$0xff]  }
  0x61   :  { %5218 = vmatprep.subr.bf16.mxu1 %v7556_v59  ;;  %v7627_v58 = vld [vmem:[%s11496_s1 + $0x530] ss:$8 sps:$4 sm:$0xff]   ;;  %v7635_v59 = vld [vmem:[%s11496_s1 + $0x524] ss:$8 sps:$4 sm:$0xff]  }
  0x63   :  { %5178 = vmatpush2.bf16.msra.mxu0 %v7551_v60  ;;  %v7630_v60 = vld [vmem:[%s11496_s1 + $0x420] ss:$8 sps:$4 sm:$0xff]  }
  0x64   :  { %5179 = vmatprep.subr.bf16.mxu0 %v7559_v61  ;;  %5219 = vmatpush2.bf16.msra.mxu1 %v7554_v62  ;;  %v7638_v61 = vld [vmem:[%s11496_s1 + $0x414] ss:$8 sps:$4 sm:$0xff]   ;;  %v7633_v62 = vld [vmem:[%s11496_s1 + $0x520] ss:$8 sps:$4 sm:$0xff]  }
  0x65   :  { %5220 = vmatprep.subr.bf16.mxu1 %v7562_v63  ;;  %v7641_v63 = vld [vmem:[%s11496_s1 + $0x514] ss:$8 sps:$4 sm:$0xff]  }
  0x67   :  { %5180 = vmatpush2.bf16.msra.mxu0 %v7557_v0  ;;  %v7636_v0 = vld [vmem:[%s11496_s1 + $0x410] ss:$8 sps:$4 sm:$0xff]  }
  0x68   :  { %5181 = vmatprep.subr.bf16.mxu0 %v7565_v1  ;;  %5221 = vmatpush2.bf16.msra.mxu1 %v7560_v2  ;;  %v7644_v1 = vld [vmem:[%s11496_s1 + $0x404] ss:$8 sps:$4 sm:$0xff]   ;;  %v7639_v2 = vld [vmem:[%s11496_s1 + $0x510] ss:$8 sps:$4 sm:$0xff]  }
  0x69   :  { %5222 = vmatprep.subr.bf16.mxu1 %v7568_v3  ;;  %v7647_v3 = vld [vmem:[%s11496_s1 + $0x504] ss:$8 sps:$4 sm:$0xff]  }
  0x6b   :  { %5182 = vmatpush2.bf16.msra.mxu0 %v7563_v4  ;;  %v7642_v4 = vld [vmem:[%s11496_s1 + $0x400] ss:$8 sps:$4 sm:$0xff]  }
  0x6c   :  { %5183 = vmatprep.subr.bf16.mxu0 %v7571_v5  ;;  %5223 = vmatpush2.bf16.msra.mxu1 %v7566_v6  ;;  %v7650_v5 = vld [vmem:[%s11496_s1 + $0x4f4] ss:$8 sps:$4 sm:$0xff]   ;;  %v7645_v6 = vld [vmem:[%s11496_s1 + $0x500] ss:$8 sps:$4 sm:$0xff]  }
  0x6d   :  { %5224 = vmatprep.subr.bf16.mxu1 %v7574_v7  ;;  %v7653_v7 = vld [vmem:[%s11496_s1 + $0x5f4] ss:$8 sps:$4 sm:$0xff]  }
  0x6f   :  { %5184 = vmatpush2.bf16.msra.mxu0 %v7569_v8  ;;  %v7648_v8 = vld [vmem:[%s11496_s1 + $0x4f0] ss:$8 sps:$4 sm:$0xff]  }
  0x70   :  { %5185 = vmatprep.subr.bf16.mxu0 %v7577_v9  ;;  %5225 = vmatpush2.bf16.msra.mxu1 %v7572_v10  ;;  %v7656_v9 = vld [vmem:[%s11496_s1 + $0x4e4] ss:$8 sps:$4 sm:$0xff]   ;;  %v7651_v10 = vld [vmem:[%s11496_s1 + $0x5f0] ss:$8 sps:$4 sm:$0xff]  }
  0x71   :  { %5226 = vmatprep.subr.bf16.mxu1 %v7580_v11  ;;  %v7659_v11 = vld [vmem:[%s11496_s1 + $0x5e4] ss:$8 sps:$4 sm:$0xff]  }
  0x73   :  { %5186 = vmatpush2.bf16.msra.mxu0 %v7575_v12  ;;  %v7654_v12 = vld [vmem:[%s11496_s1 + $0x4e0] ss:$8 sps:$4 sm:$0xff]  }
  0x74   :  { %5187 = vmatprep.subr.bf16.mxu0 %v7583_v13  ;;  %5227 = vmatpush2.bf16.msra.mxu1 %v7578_v14  ;;  %v7662_v13 = vld [vmem:[%s11496_s1 + $0x4d4] ss:$8 sps:$4 sm:$0xff]   ;;  %v7657_v14 = vld [vmem:[%s11496_s1 + $0x5e0] ss:$8 sps:$4 sm:$0xff]  }
  0x75   :  { %5228 = vmatprep.subr.bf16.mxu1 %v7586_v15  ;;  %v7665_v15 = vld [vmem:[%s11496_s1 + $0x5d4] ss:$8 sps:$4 sm:$0xff]  }
  0x77   :  { %5188 = vmatpush2.bf16.msra.mxu0 %v7581_v16  ;;  %v7660_v16 = vld [vmem:[%s11496_s1 + $0x4d0] ss:$8 sps:$4 sm:$0xff]  }
  0x78   :  { %5189 = vmatprep.subr.bf16.mxu0 %v7589_v17  ;;  %5229 = vmatpush2.bf16.msra.mxu1 %v7584_v18  ;;  %v7668_v17 = vld [vmem:[%s11496_s1 + $0x4c4] ss:$8 sps:$4 sm:$0xff]   ;;  %v7663_v18 = vld [vmem:[%s11496_s1 + $0x5d0] ss:$8 sps:$4 sm:$0xff]  }
  0x79   :  { %5230 = vmatprep.subr.bf16.mxu1 %v7592_v19  ;;  %v7671_v19 = vld [vmem:[%s11496_s1 + $0x5c4] ss:$8 sps:$4 sm:$0xff]  }
  0x7b   :  { %5190 = vmatpush2.bf16.msra.mxu0 %v7587_v20  ;;  %v7666_v20 = vld [vmem:[%s11496_s1 + $0x4c0] ss:$8 sps:$4 sm:$0xff]  }
  0x7c   :  { %5191 = vmatprep.subr.bf16.mxu0 %v7595_v21  ;;  %5231 = vmatpush2.bf16.msra.mxu1 %v7590_v22  ;;  %v7674_v21 = vld [vmem:[%s11496_s1 + $0x4b4] ss:$8 sps:$4 sm:$0xff]   ;;  %v7669_v22 = vld [vmem:[%s11496_s1 + $0x5c0] ss:$8 sps:$4 sm:$0xff]  }
  0x7d   :  { %5232 = vmatprep.subr.bf16.mxu1 %v7598_v23  ;;  %v7677_v23 = vld [vmem:[%s11496_s1 + $0x5b4] ss:$8 sps:$4 sm:$0xff]  }
  0x7f   :  { %5192 = vmatpush2.bf16.msra.mxu0 %v7593_v24  ;;  %v7672_v24 = vld [vmem:[%s11496_s1 + $0x4b0] ss:$8 sps:$4 sm:$0xff]  }
  0x80   :  { %5243 = vmatprep.subr.bf16.mxu0 %v7601_v25  ;;  %5233 = vmatpush2.bf16.msra.mxu1 %v7596_v26  ;;  %v7680_v25 = vld [vmem:[%s11496_s1 + $0x4a4] ss:$8 sps:$4 sm:$0xff]   ;;  %v7675_v26 = vld [vmem:[%s11496_s1 + $0x5b0] ss:$8 sps:$4 sm:$0xff]  }
  0x81   :  { %5284 = vmatprep.subr.bf16.mxu1 %v7605_v28  ;;  %v31_v28 = vld [vmem:[%s11495_s0 + $0x18] sm:$0xff] }
  0x82   :  { %5194 = vmatmul.mubr.bf16.vlgmr.msra.gmra.mxu0 %v318_v27  ;;  %v7683_v27 = vld [vmem:[%s11496_s1 + $0x5a4] ss:$8 sps:$4 sm:$0xff]   ;;  %v105_v32 = vcombine.high %v31_v28, %v31_v28 }
  0x83   :  { %5244 = vmatpush1.bf16.msra.mxu0 %v7599_v29  ;;  %5235 = vmatmul.mubr.bf16.vlgmr.msra.gmra.mxu1 %v320_v30  ;;  %v7678_v29 = vld [vmem:[%s11496_s1 + $0x4a0] ss:$8 sps:$4 sm:$0xff]   ;;  %v7686_v30 = vld [vmem:[%s11496_s1 + $0x494] ss:$8 sps:$4 sm:$0xff]  }
  0x84   :  { %5245 = vmatprep.subr.bf16.mxu0 %v7608_v31  ;;  %5285 = vmatpush1.bf16.msra.mxu1 %v7603_v33  ;;  %v7681_v31 = vld [vmem:[%s11496_s1 + $0x5a0] ss:$8 sps:$4 sm:$0xff]   ;;  %v7689_v33 = vld [vmem:[%s11496_s1 + $0x594] ss:$8 sps:$4 sm:$0xff]  }
  0x85   :  { %5286 = vmatprep.subr.bf16.mxu1 %v7611_v36  ;;  %5275 = vmatprep.mubr.bf16.mxu0 %v323_v42  ;;  %v9328_v36 = vrot.slane %v31_v28, %v8855_v48  ;;  %v7690_v42 = vld [vmem:[%s11496_s1 + $0x480] ss:$8 sps:$4 sm:$0xff]   ;;  %v7757_v28 = vld [vmem:[%s11496_s1 + $0x6d0] ss:$8 sps:$4 sm:$0xff]  }
  0x86   :  { %5316 = vmatprep.mubr.bf16.mxu1 %v325_v47 }
  0x87   :  { %5246 = vmatpush1.bf16.msra.mxu0 %v7606_v37  ;;  %v7692_v37 = vld [vmem:[%s11496_s1 + $0x484] ss:$8 sps:$4 sm:$0xff]   ;;  %v120_v44 = vcombine.high %v9328_v36, %v9328_v36 }
  0x88   :  { %5247 = vmatprep.subr.bf16.mxu0 %v7614_v40  ;;  %5287 = vmatpush1.bf16.msra.mxu1 %v7609_v41  ;;  %v9337_v40 = vrot.slane %v105_v32, %v8855_v48  ;;  %v7695_v41 = vld [vmem:[%s11496_s1 + $0x584] ss:$8 sps:$4 sm:$0xff]   ;;  %v7763_v32 = vld [vmem:[%s11496_s1 + $0x6c0] ss:$8 sps:$4 sm:$0xff]  }
  0x89   :  { %5288 = vmatprep.subr.bf16.mxu1 %v7617_v45  ;;  %v7698_v45 = vld [vmem:[%s11496_s1 + $0x674] ss:$8 sps:$4 sm:$0xff]  }
  0x8a   :  { %v121_v47 = vcombine.high %v9337_v40, %v9337_v40 }
  0x8b   :  { %5248 = vmatpush1.bf16.msra.mxu0 %v7612_v46  ;;  %v7693_v46 = vld [vmem:[%s11496_s1 + $0x580] ss:$8 sps:$4 sm:$0xff]  }
  0x8c   :  { %5249 = vmatprep.subr.bf16.mxu0 %v7620_v49  ;;  %5289 = vmatpush1.bf16.msra.mxu1 %v7615_v50  ;;  %v322_v49 = vpack.c.bf16 %v9153_v34, %v9153_v34  ;;  %v7702_v50 = vld [vmem:[%s11496_s1 + $0x774] ss:$8 sps:$4 sm:$0xff]   ;;  %v7700_v34 = vld [vmem:[%s11496_s1 + $0x770] ss:$8 sps:$4 sm:$0xff]  }
  0x8d   :  { %5290 = vmatprep.subr.bf16.mxu1 %v7623_v51  ;;  %v7696_v51 = vld [vmem:[%s11496_s1 + $0x670] ss:$8 sps:$4 sm:$0xff]  }
  0x8f   :  { %5250 = vmatpush1.bf16.msra.mxu0 %v7618_v52  ;;  %v327_v52 = vpack.c.bf16 %v120_v44, %v120_v44  ;;  %v7780_v44 = vld [vmem:[%s11496_s1 + $0x7a4] ss:$8 sps:$4 sm:$0xff]  }
  0x90   :  { %5251 = vmatprep.subr.bf16.mxu0 %v7626_v53  ;;  %5291 = vmatpush1.bf16.msra.mxu1 %v7621_v54  ;;  %v324_v53 = vpack.c.bf16 %v9164_v39, %v9164_v39  ;;  %v7705_v54 = vld [vmem:[%s11496_s1 + $0x664] ss:$8 sps:$4 sm:$0xff]   ;;  %v7703_v39 = vld [vmem:[%s11496_s1 + $0x660] ss:$8 sps:$4 sm:$0xff]  }
  0x91   :  { %5292 = vmatprep.subr.bf16.mxu1 %v7629_v55  ;;  %v329_v55 = vpack.c.bf16 %v121_v47, %v121_v47  ;;  %v7783_v47 = vld [vmem:[%s11496_s1 + $0x694] ss:$8 sps:$4 sm:$0xff]  }
  0x93   :  { %5252 = vmatpush1.bf16.msra.mxu0 %v7624_v56  ;;  %v7708_v56 = vld [vmem:[%s11496_s1 + $0x764] ss:$8 sps:$4 sm:$0xff]  }
  0x94   :  { %5253 = vmatprep.subr.bf16.mxu0 %v7632_v57  ;;  %5293 = vmatpush1.bf16.msra.mxu1 %v7627_v58  ;;  %v7711_v57 = vld [vmem:[%s11496_s1 + $0x654] ss:$8 sps:$4 sm:$0xff]   ;;  %v7706_v58 = vld [vmem:[%s11496_s1 + $0x760] ss:$8 sps:$4 sm:$0xff]  }
  0x95   :  { %5294 = vmatprep.subr.bf16.mxu1 %v7635_v59  ;;  %v7714_v59 = vld [vmem:[%s11496_s1 + $0x754] ss:$8 sps:$4 sm:$0xff]  }
  0x97   :  { %5254 = vmatpush1.bf16.msra.mxu0 %v7630_v60  ;;  %v7709_v60 = vld [vmem:[%s11496_s1 + $0x650] ss:$8 sps:$4 sm:$0xff]  }
  0x98   :  { %5255 = vmatprep.subr.bf16.mxu0 %v7638_v61  ;;  %5295 = vmatpush1.bf16.msra.mxu1 %v7633_v62  ;;  %v7717_v61 = vld [vmem:[%s11496_s1 + $0x644] ss:$8 sps:$4 sm:$0xff]   ;;  %v7712_v62 = vld [vmem:[%s11496_s1 + $0x750] ss:$8 sps:$4 sm:$0xff]  }
  0x99   :  { %5296 = vmatprep.subr.bf16.mxu1 %v7641_v63  ;;  %v7720_v63 = vld [vmem:[%s11496_s1 + $0x744] ss:$8 sps:$4 sm:$0xff]  }
  0x9b   :  { %5256 = vmatpush1.bf16.msra.mxu0 %v7636_v0  ;;  %v7715_v0 = vld [vmem:[%s11496_s1 + $0x640] ss:$8 sps:$4 sm:$0xff]  }
  0x9c   :  { %5257 = vmatprep.subr.bf16.mxu0 %v7644_v1  ;;  %5297 = vmatpush1.bf16.msra.mxu1 %v7639_v2  ;;  %v7723_v1 = vld [vmem:[%s11496_s1 + $0x634] ss:$8 sps:$4 sm:$0xff]   ;;  %v7718_v2 = vld [vmem:[%s11496_s1 + $0x740] ss:$8 sps:$4 sm:$0xff]  }
  0x9d   :  { %5298 = vmatprep.subr.bf16.mxu1 %v7647_v3  ;;  %v7726_v3 = vld [vmem:[%s11496_s1 + $0x734] ss:$8 sps:$4 sm:$0xff]  }
  0x9f   :  { %5258 = vmatpush1.bf16.msra.mxu0 %v7642_v4  ;;  %v7721_v4 = vld [vmem:[%s11496_s1 + $0x630] ss:$8 sps:$4 sm:$0xff]  }
  0xa0   :  { %5259 = vmatprep.subr.bf16.mxu0 %v7650_v5  ;;  %5299 = vmatpush1.bf16.msra.mxu1 %v7645_v6  ;;  %v7729_v5 = vld [vmem:[%s11496_s1 + $0x624] ss:$8 sps:$4 sm:$0xff]   ;;  %v7724_v6 = vld [vmem:[%s11496_s1 + $0x730] ss:$8 sps:$4 sm:$0xff]  }
  0xa1   :  { %5300 = vmatprep.subr.bf16.mxu1 %v7653_v7  ;;  %v7732_v7 = vld [vmem:[%s11496_s1 + $0x724] ss:$8 sps:$4 sm:$0xff]  }
  0xa3   :  { %5260 = vmatpush2.bf16.msra.mxu0 %v7648_v8  ;;  %v7727_v8 = vld [vmem:[%s11496_s1 + $0x620] ss:$8 sps:$4 sm:$0xff]  }
  0xa4   :  { %5261 = vmatprep.subr.bf16.mxu0 %v7656_v9  ;;  %5301 = vmatpush2.bf16.msra.mxu1 %v7651_v10  ;;  %v7735_v9 = vld [vmem:[%s11496_s1 + $0x614] ss:$8 sps:$4 sm:$0xff]   ;;  %v7730_v10 = vld [vmem:[%s11496_s1 + $0x720] ss:$8 sps:$4 sm:$0xff]  }
  0xa5   :  { %5302 = vmatprep.subr.bf16.mxu1 %v7659_v11  ;;  %v7738_v11 = vld [vmem:[%s11496_s1 + $0x714] ss:$8 sps:$4 sm:$0xff]  }
  0xa7   :  { %5262 = vmatpush2.bf16.msra.mxu0 %v7654_v12  ;;  %v7733_v12 = vld [vmem:[%s11496_s1 + $0x610] ss:$8 sps:$4 sm:$0xff]  }
  0xa8   :  { %5263 = vmatprep.subr.bf16.mxu0 %v7662_v13  ;;  %5303 = vmatpush2.bf16.msra.mxu1 %v7657_v14  ;;  %v7741_v13 = vld [vmem:[%s11496_s1 + $0x604] ss:$8 sps:$4 sm:$0xff]   ;;  %v7736_v14 = vld [vmem:[%s11496_s1 + $0x710] ss:$8 sps:$4 sm:$0xff]  }
  0xa9   :  { %5304 = vmatprep.subr.bf16.mxu1 %v7665_v15  ;;  %v7744_v15 = vld [vmem:[%s11496_s1 + $0x704] ss:$8 sps:$4 sm:$0xff]  }
  0xab   :  { %5264 = vmatpush2.bf16.msra.mxu0 %v7660_v16  ;;  %v7739_v16 = vld [vmem:[%s11496_s1 + $0x600] ss:$8 sps:$4 sm:$0xff]  }
  0xac   :  { %5265 = vmatprep.subr.bf16.mxu0 %v7668_v17  ;;  %5305 = vmatpush2.bf16.msra.mxu1 %v7663_v18  ;;  %v7747_v17 = vld [vmem:[%s11496_s1 + $0x6f4] ss:$8 sps:$4 sm:$0xff]   ;;  %v7742_v18 = vld [vmem:[%s11496_s1 + $0x700] ss:$8 sps:$4 sm:$0xff]  }
  0xad   :  { %5306 = vmatprep.subr.bf16.mxu1 %v7671_v19  ;;  %v7750_v19 = vld [vmem:[%s11496_s1 + $0x7f4] ss:$8 sps:$4 sm:$0xff]  }
  0xaf   :  { %5266 = vmatpush2.bf16.msra.mxu0 %v7666_v20  ;;  %v7745_v20 = vld [vmem:[%s11496_s1 + $0x6f0] ss:$8 sps:$4 sm:$0xff]  }
  0xb0   :  { %5267 = vmatprep.subr.bf16.mxu0 %v7674_v21  ;;  %5307 = vmatpush2.bf16.msra.mxu1 %v7669_v22  ;;  %v7753_v21 = vld [vmem:[%s11496_s1 + $0x6e4] ss:$8 sps:$4 sm:$0xff]   ;;  %v7748_v22 = vld [vmem:[%s11496_s1 + $0x7f0] ss:$8 sps:$4 sm:$0xff]  }
  0xb1   :  { %5308 = vmatprep.subr.bf16.mxu1 %v7677_v23  ;;  %v7756_v23 = vld [vmem:[%s11496_s1 + $0x7e4] ss:$8 sps:$4 sm:$0xff]  }
  0xb3   :  { %5268 = vmatpush2.bf16.msra.mxu0 %v7672_v24  ;;  %v7751_v24 = vld [vmem:[%s11496_s1 + $0x6e0] ss:$8 sps:$4 sm:$0xff]  }
  0xb4   :  { %5269 = vmatprep.subr.bf16.mxu0 %v7680_v25  ;;  %5309 = vmatpush2.bf16.msra.mxu1 %v7675_v26  ;;  %v7759_v25 = vld [vmem:[%s11496_s1 + $0x6d4] ss:$8 sps:$4 sm:$0xff]   ;;  %v7754_v26 = vld [vmem:[%s11496_s1 + $0x7e0] ss:$8 sps:$4 sm:$0xff]  }
  0xb5   :  { %5310 = vmatprep.subr.bf16.mxu1 %v7683_v27  ;;  %v7762_v27 = vld [vmem:[%s11496_s1 + $0x7d4] ss:$8 sps:$4 sm:$0xff]  }
  0xb7   :  { %5270 = vmatpush2.bf16.msra.mxu0 %v7678_v29  ;;  %v7765_v29 = vld [vmem:[%s11496_s1 + $0x6c4] ss:$8 sps:$4 sm:$0xff]  }
  0xb8   :  { %5271 = vmatprep.subr.bf16.mxu0 %v7686_v30  ;;  %5311 = vmatpush2.bf16.msra.mxu1 %v7681_v31  ;;  %v7760_v30 = vld [vmem:[%s11496_s1 + $0x7d0] ss:$8 sps:$4 sm:$0xff]   ;;  %v7768_v31 = vld [vmem:[%s11496_s1 + $0x7c4] ss:$8 sps:$4 sm:$0xff]  }
  0xb9   :  { %5312 = vmatprep.subr.bf16.mxu1 %v7689_v33  ;;  %v7771_v33 = vld [vmem:[%s11496_s1 + $0x6b4] ss:$8 sps:$4 sm:$0xff]  }
  0xbb   :  { %5272 = vmatpush2.bf16.msra.mxu0 %v7684_v35  ;;  %v7766_v35 = vld [vmem:[%s11496_s1 + $0x7c0] ss:$8 sps:$4 sm:$0xff]  }
  0xbc   :  { %5273 = vmatprep.subr.bf16.mxu0 %v7692_v37  ;;  %5313 = vmatpush2.bf16.msra.mxu1 %v7687_v38  ;;  %v7774_v37 = vld [vmem:[%s11496_s1 + $0x7b4] ss:$8 sps:$4 sm:$0xff]   ;;  %v7769_v38 = vld [vmem:[%s11496_s1 + $0x6b0] ss:$8 sps:$4 sm:$0xff]  }
  0xbd   :  { %5314 = vmatprep.subr.bf16.mxu1 %v7695_v41  ;;  %v7777_v41 = vld [vmem:[%s11496_s1 + $0x6a4] ss:$8 sps:$4 sm:$0xff]  }
  0xbf   :  { %5274 = vmatpush2.bf16.msra.mxu0 %v7690_v42  ;;  %v7772_v42 = vld [vmem:[%s11496_s1 + $0x7b0] ss:$8 sps:$4 sm:$0xff]  }
  0xc0   :  { %5325 = vmatprep.subr.bf16.mxu0 %v7698_v45  ;;  %5315 = vmatpush2.bf16.msra.mxu1 %v7693_v46  ;;  %v32_v45 = vld [vmem:[%s11495_s0 + $0x20] sm:$0xff] }
  0xc1   :  { %5366 = vmatprep.subr.bf16.mxu1 %v7702_v50  ;;  %v7775_v46 = vld [vmem:[%s11496_s1 + $0x6a0] ss:$8 sps:$4 sm:$0xff]   ;;  %v122_v50 = vcombine.high %v32_v45, %v32_v45 }
  0xc2   :  { %5276 = vmatmul.mubr.bf16.vlgmr.msra.gmra.mxu0 %v322_v49  ;;  %v7778_v49 = vld [vmem:[%s11496_s1 + $0x7a0] ss:$8 sps:$4 sm:$0xff]  }
  0xc3   :  { %5326 = vmatpush1.bf16.msra.mxu0 %v7696_v51  ;;  %5357 = vmatprep.mubr.bf16.mxu0 %v327_v52  ;;  %v7786_v51 = vld [vmem:[%s11496_s1 + $0x794] ss:$8 sps:$4 sm:$0xff]   ;;  %v7781_v52 = vld [vmem:[%s11496_s1 + $0x690] ss:$8 sps:$4 sm:$0xff]  }
  0xc4   :  { %5317 = vmatmul.mubr.bf16.vlgmr.msra.gmra.mxu1 %v324_v53  ;;  %5327 = vmatprep.subr.bf16.mxu0 %v7705_v54  ;;  %v9537_v53 = vrot.slane %v32_v45, %v8855_v48  ;;  %v7789_v54 = vld [vmem:[%s11496_s1 + $0x684] ss:$8 sps:$4 sm:$0xff]   ;;  %v7830_v45 = vld [vmem:[%s11496_s1 + $0x810] ss:$8 sps:$4 sm:$0xff]  }
  0xc5   :  { %5367 = vmatpush1.bf16.msra.mxu1 %v7700_v34  ;;  %5398 = vmatprep.mubr.bf16.mxu1 %v329_v55  ;;  %v7784_v34 = vld [vmem:[%s11496_s1 + $0x790] ss:$8 sps:$4 sm:$0xff]   ;;  %v9546_v55 = vrot.slane %v122_v50, %v8855_v48  ;;  %v7836_v50 = vld [vmem:[%s11496_s1 + $0x800] ss:$8 sps:$4 sm:$0xff]  }
  0xc6   :  { %5368 = vmatprep.subr.bf16.mxu1 %v7708_v56  ;;  %v7792_v56 = vld [vmem:[%s11496_s1 + $0x784] ss:$8 sps:$4 sm:$0xff]  }
  0xc7   :  { %5328 = vmatpush1.bf16.msra.mxu0 %v7703_v39  ;;  %v7787_v39 = vld [vmem:[%s11496_s1 + $0x680] ss:$8 sps:$4 sm:$0xff]  }
  0xc8   :  { %5329 = vmatprep.subr.bf16.mxu0 %v7711_v57  ;;  %v1151_v57 = vsub.s32 0, %v8840_v43 }
  0xc9   :  { %5369 = vmatpush1.bf16.msra.mxu1 %v7706_v58  ;;  %v137_v58 = vcombine.high %v9537_v53, %v9537_v53 }
  0xca   :  { %5370 = vmatprep.subr.bf16.mxu1 %v7714_v59  ;;  %v1147_v59 = vld [vmem:[%s11497_s2] sm:$0x3] }
  0xcb   :  { %5330 = vmatpush1.bf16.msra.mxu0 %v7709_v60  ;;  %v7795_v60 = vld [vmem:[%s11496_s1 + $0x874] ss:$8 sps:$4 sm:$0xff]  }
  0xcc   :  { %5331 = vmatprep.subr.bf16.mxu0 %v7717_v61  ;;  %v7790_v61 = vld [vmem:[%s11496_s1 + $0x780] ss:$8 sps:$4 sm:$0xff]  }
  0xcd   :  { %5371 = vmatpush1.bf16.msra.mxu1 %v7712_v62  ;;  %v1155_v62 = vsub.s32 1, %v8840_v43 }
  0xce   :  { %5372 = vmatprep.subr.bf16.mxu1 %v7720_v63  ;;  %v138_v63 = vcombine.high %v9546_v55, %v9546_v55 }
  0xcf   :  { %5332 = vmatpush1.bf16.msra.mxu0 %v7715_v0  ;;  %v326_v0 = vpack.c.bf16 %v9328_v36, %v9328_v36  ;;  %v7802_v36 = vld [vmem:[%s11496_s1 + $0x864] ss:$8 sps:$4 sm:$0xff]  }
  0xd0   :  { %5333 = vmatprep.subr.bf16.mxu0 %v7723_v1  ;;  %v7799_v1 = vld [vmem:[%s11496_s1 + $0x974] ss:$8 sps:$4 sm:$0xff]  }
  0xd1   :  { %5373 = vmatpush1.bf16.msra.mxu1 %v7718_v2  ;;  %v1152_v2 = vrot.slane %v1147_v59, %v1151_v57 }
  0xd2   :  { %5374 = vmatprep.subr.bf16.mxu1 %v7726_v3  ;;  %v7793_v3 = vld [vmem:[%s11496_s1 + $0x870] ss:$8 sps:$4 sm:$0xff]  }
  0xd3   :  { %5334 = vmatpush1.bf16.msra.mxu0 %v7721_v4  ;;  %v331_v4 = vpack.c.bf16 %v137_v58, %v137_v58  ;;  %v7850_v58 = vld [vmem:[%s11496_s1 + $0x8e4] ss:$8 sps:$4 sm:$0xff]  }
  0xd4   :  { %5335 = vmatprep.subr.bf16.mxu0 %v7729_v5  ;;  %v328_v5 = vpack.c.bf16 %v9337_v40, %v9337_v40  ;;  %v7805_v40 = vld [vmem:[%s11496_s1 + $0x964] ss:$8 sps:$4 sm:$0xff]  }
  0xd5   :  { %5375 = vmatpush1.bf16.msra.mxu1 %v7724_v6  ;;  %v1156_v6 = vrot.slane %v1147_v59, %v1155_v62  ;;  %v7848_v59 = vld [vmem:[%s11496_s1 + $0x8e0] ss:$8 sps:$4 sm:$0xff]  }
  0xd6   :  { %5376 = vmatprep.subr.bf16.mxu1 %v7732_v7  ;;  %v7797_v7 = vld [vmem:[%s11496_s1 + $0x970] ss:$8 sps:$4 sm:$0xff]  }
  0xd7   :  { %5336 = vmatpush1.bf16.msra.mxu0 %v7727_v8  ;;  %v333_v8 = vpack.c.bf16 %v138_v63, %v138_v63  ;;  %v7856_v63 = vld [vmem:[%s11496_s1 + $0x8d4] ss:$8 sps:$4 sm:$0xff]  }
  0xd8   :  { %5337 = vmatprep.subr.bf16.mxu0 %v7735_v9 }
  0xd9   :  { %5377 = vmatpush1.bf16.msra.mxu1 %v7730_v10 }
  0xda   :  { %5378 = vmatprep.subr.bf16.mxu1 %v7738_v11  ;;  %v7800_v11 = vld [vmem:[%s11496_s1 + $0x860] ss:$8 sps:$4 sm:$0xff]  }
  0xdb   :  { %5338 = vmatpush1.bf16.msra.mxu0 %v7733_v12 }
  0xdc   :  { %5339 = vmatprep.subr.bf16.mxu0 %v7741_v13 }
  0xdd   :  { %5379 = vmatpush1.bf16.msra.mxu1 %v7736_v14  ;;  %v7808_v14 = vld [vmem:[%s11496_s1 + $0x854] ss:$8 sps:$4 sm:$0xff]  }
  0xde   :  { %5380 = vmatprep.subr.bf16.mxu1 %v7744_v15 }
  0xdf   :  { %5340 = vmatpush1.bf16.msra.mxu0 %v7739_v16 }
  0xe0   :  { %5341 = vmatprep.subr.bf16.mxu0 %v7747_v17  ;;  %v7803_v17 = vld [vmem:[%s11496_s1 + $0x960] ss:$8 sps:$4 sm:$0xff]  }
  0xe1   :  { %5381 = vmatpush1.bf16.msra.mxu1 %v7742_v18 }
  0xe2   :  { %5382 = vmatprep.subr.bf16.mxu1 %v7750_v19 }
  0xe3   :  { %5342 = vmatpush2.bf16.msra.mxu0 %v7745_v20  ;;  %v7811_v20 = vld [vmem:[%s11496_s1 + $0x954] ss:$8 sps:$4 sm:$0xff]  }
  0xe4   :  { %5343 = vmatprep.subr.bf16.mxu0 %v7753_v21 }
  0xe5   :  { %5383 = vmatpush2.bf16.msra.mxu1 %v7748_v22  ;;  %v7806_v22 = vld [vmem:[%s11496_s1 + $0x850] ss:$8 sps:$4 sm:$0xff]  }
  0xe6   :  { %5384 = vmatprep.subr.bf16.mxu1 %v7756_v23  ;;  %v7809_v23 = vld [vmem:[%s11496_s1 + $0x950] ss:$8 sps:$4 sm:$0xff]  }
  0xe7   :  { %5344 = vmatpush2.bf16.msra.mxu0 %v7751_v24 }
  0xe8   :  { %5345 = vmatprep.subr.bf16.mxu0 %v7759_v25  ;;  %v7814_v25 = vld [vmem:[%s11496_s1 + $0x844] ss:$8 sps:$4 sm:$0xff]  }
  0xe9   :  { %5385 = vmatpush2.bf16.msra.mxu1 %v7754_v26 }
  0xea   :  { %5386 = vmatprep.subr.bf16.mxu1 %v7762_v27  ;;  %v7812_v27 = vld [vmem:[%s11496_s1 + $0x840] ss:$8 sps:$4 sm:$0xff]  }
  0xeb   :  { %5346 = vmatpush2.bf16.msra.mxu0 %v7757_v28  ;;  %v7817_v28 = vld [vmem:[%s11496_s1 + $0x944] ss:$8 sps:$4 sm:$0xff]  }
  0xec   :  { %5347 = vmatprep.subr.bf16.mxu0 %v7765_v29 }
  0xed   :  { %5387 = vmatpush2.bf16.msra.mxu1 %v7760_v30  ;;  %v7815_v30 = vld [vmem:[%s11496_s1 + $0x940] ss:$8 sps:$4 sm:$0xff]  }
  0xee   :  { %5388 = vmatprep.subr.bf16.mxu1 %v7768_v31  ;;  %v7820_v31 = vld [vmem:[%s11496_s1 + $0x834] ss:$8 sps:$4 sm:$0xff]  }
  0xef   :  { %5348 = vmatpush2.bf16.msra.mxu0 %v7763_v32  ;;  %v7818_v32 = vld [vmem:[%s11496_s1 + $0x830] ss:$8 sps:$4 sm:$0xff]  }
  0xf0   :  { %5349 = vmatprep.subr.bf16.mxu0 %v7771_v33  ;;  %v7823_v33 = vld [vmem:[%s11496_s1 + $0x934] ss:$8 sps:$4 sm:$0xff]  }
  0xf1   :  { %5389 = vmatpush2.bf16.msra.mxu1 %v7766_v35  ;;  %v7821_v35 = vld [vmem:[%s11496_s1 + $0x930] ss:$8 sps:$4 sm:$0xff]  }
  0xf2   :  { %5390 = vmatprep.subr.bf16.mxu1 %v7774_v37  ;;  %v7826_v37 = vld [vmem:[%s11496_s1 + $0x824] ss:$8 sps:$4 sm:$0xff]  }
  0xf3   :  { %5350 = vmatpush2.bf16.msra.mxu0 %v7769_v38  ;;  %v7824_v38 = vld [vmem:[%s11496_s1 + $0x820] ss:$8 sps:$4 sm:$0xff]  }
  0xf4   :  { %5351 = vmatprep.subr.bf16.mxu0 %v7777_v41  ;;  %v7829_v41 = vld [vmem:[%s11496_s1 + $0x924] ss:$8 sps:$4 sm:$0xff]  }
  0xf5   :  { %5391 = vmatpush2.bf16.msra.mxu1 %v7772_v42  ;;  %v7827_v42 = vld [vmem:[%s11496_s1 + $0x920] ss:$8 sps:$4 sm:$0xff]  }
  0xf6   :  { %5392 = vmatprep.subr.bf16.mxu1 %v7780_v44  ;;  %v7832_v44 = vld [vmem:[%s11496_s1 + $0x814] ss:$8 sps:$4 sm:$0xff]  }
  0xf7   :  { %5352 = vmatpush2.bf16.msra.mxu0 %v7775_v46  ;;  %v7835_v46 = vld [vmem:[%s11496_s1 + $0x914] ss:$8 sps:$4 sm:$0xff]  }
  0xf8   :  { %5353 = vmatprep.subr.bf16.mxu0 %v7783_v47  ;;  %v7833_v47 = vld [vmem:[%s11496_s1 + $0x910] ss:$8 sps:$4 sm:$0xff]  }
  0xf9   :  { %5393 = vmatpush2.bf16.msra.mxu1 %v7778_v49  ;;  %v7838_v49 = vld [vmem:[%s11496_s1 + $0x804] ss:$8 sps:$4 sm:$0xff]  }
  0xfa   :  { %5394 = vmatprep.subr.bf16.mxu1 %v7786_v51  ;;  %v7841_v51 = vld [vmem:[%s11496_s1 + $0x904] ss:$8 sps:$4 sm:$0xff]  }
  0xfb   :  { %5354 = vmatpush2.bf16.msra.mxu0 %v7781_v52  ;;  %v7839_v52 = vld [vmem:[%s11496_s1 + $0x900] ss:$8 sps:$4 sm:$0xff]  }
  0xfc   :  { %5355 = vmatprep.subr.bf16.mxu0 %v7789_v54  ;;  %v7844_v54 = vld [vmem:[%s11496_s1 + $0x8f4] ss:$8 sps:$4 sm:$0xff]  }
  0xfd   :  { %5395 = vmatpush2.bf16.msra.mxu1 %v7784_v34  ;;  %v7842_v34 = vld [vmem:[%s11496_s1 + $0x8f0] ss:$8 sps:$4 sm:$0xff]  }
  0xfe   :  { %5396 = vmatprep.subr.bf16.mxu1 %v7792_v56  ;;  %v7847_v56 = vld [vmem:[%s11496_s1 + $0x9f4] ss:$8 sps:$4 sm:$0xff]  }
  0xff   :  { %5356 = vmatpush2.bf16.msra.mxu0 %v7787_v39  ;;  %v7845_v39 = vld [vmem:[%s11496_s1 + $0x9f0] ss:$8 sps:$4 sm:$0xff]  }
 0x100   :  { %5407 = vmatprep.subr.bf16.mxu0 %v7795_v60  ;;  %v7853_v60 = vld [vmem:[%s11496_s1 + $0x9e4] ss:$8 sps:$4 sm:$0xff]  }
 0x101   :  { %5397 = vmatpush2.bf16.msra.mxu1 %v7790_v61  ;;  %v7851_v61 = vld [vmem:[%s11496_s1 + $0x9e0] ss:$8 sps:$4 sm:$0xff]  }
 0x102   :  { %v5113_v9 = vpop.f32.mrf.mxu0  ;;  %5358 = vmatmul.mubr.bf16.vlgmr.msra.gmra.mxu0 %v326_v0  ;;  %5448 = vmatprep.subr.bf16.mxu1 %v7799_v1  ;;  %v7854_v0 = vld [vmem:[%s11496_s1 + $0x8d0] ss:$8 sps:$4 sm:$0xff]   ;;  %v7859_v1 = vld [vmem:[%s11496_s1 + $0x9d4] ss:$8 sps:$4 sm:$0xff]  }
 0x103   :  { %v5114_v10 = vadd.f32 %v5113_v9, %v1152_v2  ;;  %5408 = vmatpush1.bf16.msra.mxu0 %v7793_v3  ;;  %5439 = vmatprep.mubr.bf16.mxu0 %v331_v4  ;;  %v5154_v13 = vpop.f32.mrf.mxu1  ;;  %v7857_v2 = vld [vmem:[%s11496_s1 + $0x9d0] ss:$8 sps:$4 sm:$0xff]   ;;  %v7862_v3 = vld [vmem:[%s11496_s1 + $0x8c4] ss:$8 sps:$4 sm:$0xff]   ;;  %v7860_v4 = vld [vmem:[%s11496_s1 + $0x8c0] ss:$8 sps:$4 sm:$0xff]  }
 0x104   :  { %v5115_v12 = vpop.f32.mrf.mxu0  ;;  %5399 = vmatmul.mubr.bf16.vlgmr.msra.gmra.mxu1 %v328_v5  ;;  %5409 = vmatprep.subr.bf16.mxu0 %v7802_v36  ;;  %v7865_v5 = vld [vmem:[%s11496_s1 + $0x9c4] ss:$8 sps:$4 sm:$0xff]   ;;  %v7863_v36 = vld [vmem:[%s11496_s1 + $0x9c0] ss:$8 sps:$4 sm:$0xff]   ;;  %v7869_v9 = vld [vmem:[%s11496_s1 + $0x9b0] ss:$8 sps:$4 sm:$0xff]  }
 0x105   :  { %v5116_v15 = vadd.f32 %v5115_v12, %v1156_v6  ;;  %v9598_v16 = vadd.f32 %v5154_v13, %v5114_v10  ;;  %5449 = vmatpush1.bf16.msra.mxu1 %v7797_v7  ;;  %5480 = vmatprep.mubr.bf16.mxu1 %v333_v8  ;;  %v5156_v19 = vpop.f32.mrf.mxu1  ;;  %v7868_v6 = vld [vmem:[%s11496_s1 + $0x8b4] ss:$8 sps:$4 sm:$0xff]   ;;  %v7866_v7 = vld [vmem:[%s11496_s1 + $0x8b0] ss:$8 sps:$4 sm:$0xff]   ;;  %v7877_v10 = vld [vmem:[%s11496_s1 + $0x9a4] ss:$8 sps:$4 sm:$0xff]  }
 0x106   :  { %v5117_v18 = vpop.f32.mrf.mxu0  ;;  %5450 = vmatprep.subr.bf16.mxu1 %v7805_v40  ;;  %v7871_v8 = vld [vmem:[%s11496_s1 + $0x9b4] ss:$8 sps:$4 sm:$0xff]   ;;  %v7874_v40 = vld [vmem:[%s11496_s1 + $0x8a4] ss:$8 sps:$4 sm:$0xff]   ;;  %v7872_v12 = vld [vmem:[%s11496_s1 + $0x8a0] ss:$8 sps:$4 sm:$0xff]  }
 0x107   :  { %v9606_v21 = vadd.f32 %v5156_v19, %v5116_v15  ;;  %5410 = vmatpush1.bf16.msra.mxu0 %v7800_v11  ;;  %v5158_v26 = vpop.f32.mrf.mxu1  ;;  %v33_v11 = vld [vmem:[%s11495_s0 + $0x28] sm:$0xff]  ;;  %v7880_v13 = vld [vmem:[%s11496_s1 + $0x894] ss:$8 sps:$4 sm:$0xff]   ;;  %v7878_v18 = vld [vmem:[%s11496_s1 + $0x890] ss:$8 sps:$4 sm:$0xff]  }
 0x108   :  { %v5118_v24 = vpop.f32.mrf.mxu0  ;;  %5411 = vmatprep.subr.bf16.mxu0 %v7808_v14  ;;  %v7875_v14 = vld [vmem:[%s11496_s1 + $0x9a0] ss:$8 sps:$4 sm:$0xff]   ;;  %v139_v15 = vcombine.high %v33_v11, %v33_v11  ;;  %v9759_v19 = vrot.slane %v33_v11, %v8855_v48  ;;  %v7935_v11 = vld [vmem:[%s11496_s1 + $0xa04] ss:$8 sps:$4 sm:$0xff]  }
 0x109   :  { %5451 = vmatpush1.bf16.msra.mxu1 %v7803_v17  ;;  %v5159_v29 = vpop.f32.mrf.mxu1  ;;  %v7883_v17 = vld [vmem:[%s11496_s1 + $0x994] ss:$8 sps:$4 sm:$0xff]   ;;  %v7884_v24 = vld [vmem:[%s11496_s1 + $0x880] ss:$8 sps:$4 sm:$0xff]  }
 0x10a   :  { %5452 = vmatprep.subr.bf16.mxu1 %v7811_v20  ;;  %v7886_v20 = vld [vmem:[%s11496_s1 + $0x884] ss:$8 sps:$4 sm:$0xff]   ;;  %v7887_v26 = vld [vmem:[%s11496_s1 + $0x980] ss:$8 sps:$4 sm:$0xff]   ;;  %v7890_v29 = vld [vmem:[%s11496_s1 + $0xa70] ss:$8 sps:$4 sm:$0xff]  }
 0x10b   :  { %5412 = vmatpush1.bf16.msra.mxu0 %v7806_v22  ;;  %v7881_v22 = vld [vmem:[%s11496_s1 + $0x990] ss:$8 sps:$4 sm:$0xff]  }
 0x10c   :  { %5413 = vmatprep.subr.bf16.mxu0 %v7814_v25  ;;  %v7889_v25 = vld [vmem:[%s11496_s1 + $0x984] ss:$8 sps:$4 sm:$0xff]  }
 0x10d   :  { %5453 = vmatpush1.bf16.msra.mxu1 %v7809_v23  ;;  %v9768_v23 = vrot.slane %v139_v15, %v8855_v48  ;;  %v7941_v15 = vld [vmem:[%s11496_s1 + $0xaf4] ss:$8 sps:$4 sm:$0xff]  }
 0x10e   :  { %5454 = vmatprep.subr.bf16.mxu1 %v7817_v28  ;;  %v7892_v28 = vld [vmem:[%s11496_s1 + $0xa74] ss:$8 sps:$4 sm:$0xff]  }
 0x10f   :  { %5414 = vmatpush1.bf16.msra.mxu0 %v7812_v27  ;;  %v154_v27 = vcombine.high %v9759_v19, %v9759_v19 }
 0x110   :  { %5415 = vmatprep.subr.bf16.mxu0 %v7820_v31  ;;  %v330_v31 = vpack.c.bf16 %v9537_v53, %v9537_v53  ;;  %v7897_v53 = vld [vmem:[%s11496_s1 + $0xa60] ss:$8 sps:$4 sm:$0xff]  }
 0x111   :  { %5455 = vmatpush1.bf16.msra.mxu1 %v7815_v30  ;;  %v155_v30 = vcombine.high %v9768_v23, %v9768_v23 }
 0x112   :  { %5456 = vmatprep.subr.bf16.mxu1 %v7823_v33  ;;  %v7894_v33 = vld [vmem:[%s11496_s1 + $0xb70] ss:$8 sps:$4 sm:$0xff]  }
 0x113   :  { %5416 = vmatpush1.bf16.msra.mxu0 %v7818_v32  ;;  %v7896_v32 = vld [vmem:[%s11496_s1 + $0xb74] ss:$8 sps:$4 sm:$0xff]  }
 0x114   :  { %5417 = vmatprep.subr.bf16.mxu0 %v7826_v37  ;;  %v332_v37 = vpack.c.bf16 %v9546_v55, %v9546_v55  ;;  %v7900_v55 = vld [vmem:[%s11496_s1 + $0xb60] ss:$8 sps:$4 sm:$0xff]  }
 0x115   :  { %5457 = vmatpush1.bf16.msra.mxu1 %v7821_v35  ;;  %v335_v35 = vpack.c.bf16 %v154_v27, %v154_v27  ;;  %v7953_v27 = vld [vmem:[%s11496_s1 + $0xad4] ss:$8 sps:$4 sm:$0xff]  }
 0x116   :  { %5458 = vmatprep.subr.bf16.mxu1 %v7829_v41  ;;  %v337_v41 = vpack.c.bf16 %v155_v30, %v155_v30  ;;  %v7954_v30 = vld [vmem:[%s11496_s1 + $0xbd0] ss:$8 sps:$4 sm:$0xff]  }
 0x117   :  { %5418 = vmatpush1.bf16.msra.mxu0 %v7824_v38  ;;  %v7899_v38 = vld [vmem:[%s11496_s1 + $0xa64] ss:$8 sps:$4 sm:$0xff]  }
 0x118   :  { %5419 = vmatprep.subr.bf16.mxu0 %v7832_v44  ;;  %v7902_v44 = vld [vmem:[%s11496_s1 + $0xb64] ss:$8 sps:$4 sm:$0xff]  }
 0x119   :  { %5459 = vmatpush1.bf16.msra.mxu1 %v7827_v42 }
 0x11a   :  { %5460 = vmatprep.subr.bf16.mxu1 %v7835_v46 }
 0x11b   :  { %5420 = vmatpush1.bf16.msra.mxu0 %v7830_v45 }
 0x11c   :  { %5421 = vmatprep.subr.bf16.mxu0 %v7838_v49  ;;  %v7905_v49 = vld [vmem:[%s11496_s1 + $0xa54] ss:$8 sps:$4 sm:$0xff]  }
 0x11d   :  { %5461 = vmatpush1.bf16.msra.mxu1 %v7833_v47 }
 0x11e   :  { %5462 = vmatprep.subr.bf16.mxu1 %v7841_v51 }
 0x11f   :  { %5422 = vmatpush1.bf16.msra.mxu0 %v7836_v50 }
 0x120   :  { %5423 = vmatprep.subr.bf16.mxu0 %v7844_v54 }
 0x121   :  { %5463 = vmatpush1.bf16.msra.mxu1 %v7839_v52 }
 0x122   :  { %5464 = vmatprep.subr.bf16.mxu1 %v7847_v56 }
 0x123   :  { %5424 = vmatpush2.bf16.msra.mxu0 %v7842_v34  ;;  %v7908_v34 = vld [vmem:[%s11496_s1 + $0xb54] ss:$8 sps:$4 sm:$0xff]  }
 0x124   :  { %5425 = vmatprep.subr.bf16.mxu0 %v7850_v58  ;;  %v7911_v58 = vld [vmem:[%s11496_s1 + $0xa44] ss:$8 sps:$4 sm:$0xff]  }
 0x125   :  { %5465 = vmatpush2.bf16.msra.mxu1 %v7845_v39 }
 0x126   :  { %5466 = vmatprep.subr.bf16.mxu1 %v7853_v60  ;;  %v7909_v60 = vld [vmem:[%s11496_s1 + $0xa40] ss:$8 sps:$4 sm:$0xff]  }
 0x127   :  { %5426 = vmatpush2.bf16.msra.mxu0 %v7848_v59 }
 0x128   :  { %5427 = vmatprep.subr.bf16.mxu0 %v7856_v63 }
 0x129   :  { %5467 = vmatpush2.bf16.msra.mxu1 %v7851_v61  ;;  %v7914_v61 = vld [vmem:[%s11496_s1 + $0xb44] ss:$8 sps:$4 sm:$0xff]  }
 0x12a   :  { %5468 = vmatprep.subr.bf16.mxu1 %v7859_v1  ;;  %v7917_v1 = vld [vmem:[%s11496_s1 + $0xa34] ss:$8 sps:$4 sm:$0xff]  }
 0x12b   :  { %5428 = vmatpush2.bf16.msra.mxu0 %v7854_v0  ;;  %v7912_v0 = vld [vmem:[%s11496_s1 + $0xb40] ss:$8 sps:$4 sm:$0xff]  }
 0x12c   :  { %5429 = vmatprep.subr.bf16.mxu0 %v7862_v3  ;;  %v7920_v3 = vld [vmem:[%s11496_s1 + $0xb34] ss:$8 sps:$4 sm:$0xff]  }
 0x12d   :  { %5469 = vmatpush2.bf16.msra.mxu1 %v7857_v2  ;;  %v7915_v2 = vld [vmem:[%s11496_s1 + $0xa30] ss:$8 sps:$4 sm:$0xff]  }
 0x12e   :  { %5470 = vmatprep.subr.bf16.mxu1 %v7865_v5  ;;  %v7923_v5 = vld [vmem:[%s11496_s1 + $0xa24] ss:$8 sps:$4 sm:$0xff]  }
 0x12f   :  { %5430 = vmatpush2.bf16.msra.mxu0 %v7860_v4  ;;  %v7918_v4 = vld [vmem:[%s11496_s1 + $0xb30] ss:$8 sps:$4 sm:$0xff]  }
 0x130   :  { %5431 = vmatprep.subr.bf16.mxu0 %v7868_v6  ;;  %v7926_v6 = vld [vmem:[%s11496_s1 + $0xb24] ss:$8 sps:$4 sm:$0xff]  }
 0x131   :  { %5471 = vmatpush2.bf16.msra.mxu1 %v7863_v36  ;;  %v7921_v36 = vld [vmem:[%s11496_s1 + $0xa20] ss:$8 sps:$4 sm:$0xff]  }
 0x132   :  { %5472 = vmatprep.subr.bf16.mxu1 %v7871_v8  ;;  %v7929_v8 = vld [vmem:[%s11496_s1 + $0xa14] ss:$8 sps:$4 sm:$0xff]  }
 0x133   :  { %5432 = vmatpush2.bf16.msra.mxu0 %v7866_v7  ;;  %v7924_v7 = vld [vmem:[%s11496_s1 + $0xb20] ss:$8 sps:$4 sm:$0xff]  }
 0x134   :  { %5433 = vmatprep.subr.bf16.mxu0 %v7874_v40  ;;  %v7932_v40 = vld [vmem:[%s11496_s1 + $0xb14] ss:$8 sps:$4 sm:$0xff]  }
 0x135   :  { %5473 = vmatpush2.bf16.msra.mxu1 %v7869_v9  ;;  %v7927_v9 = vld [vmem:[%s11496_s1 + $0xa10] ss:$8 sps:$4 sm:$0xff]  }
 0x136   :  { %5474 = vmatprep.subr.bf16.mxu1 %v7877_v10  ;;  %v7930_v10 = vld [vmem:[%s11496_s1 + $0xb10] ss:$8 sps:$4 sm:$0xff]  }
 0x137   :  { %5434 = vmatpush2.bf16.msra.mxu0 %v7872_v12  ;;  %v7933_v12 = vld [vmem:[%s11496_s1 + $0xa00] ss:$8 sps:$4 sm:$0xff]  }
 0x138   :  { %5435 = vmatprep.subr.bf16.mxu0 %v7880_v13  ;;  %v7938_v13 = vld [vmem:[%s11496_s1 + $0xb04] ss:$8 sps:$4 sm:$0xff]  }
 0x139   :  { %5475 = vmatpush2.bf16.msra.mxu1 %v7875_v14  ;;  %v7936_v14 = vld [vmem:[%s11496_s1 + $0xb00] ss:$8 sps:$4 sm:$0xff]  }
 0x13a   :  { %5476 = vmatprep.subr.bf16.mxu1 %v7883_v17  ;;  %v7939_v17 = vld [vmem:[%s11496_s1 + $0xaf0] ss:$8 sps:$4 sm:$0xff]  }
 0x13b   :  { %5436 = vmatpush2.bf16.msra.mxu0 %v7878_v18  ;;  %v7944_v18 = vld [vmem:[%s11496_s1 + $0xbf4] ss:$8 sps:$4 sm:$0xff]  }
 0x13c   :  { %5437 = vmatprep.subr.bf16.mxu0 %v7886_v20  ;;  %v7942_v20 = vld [vmem:[%s11496_s1 + $0xbf0] ss:$8 sps:$4 sm:$0xff]  }
 0x13d   :  { %5477 = vmatpush2.bf16.msra.mxu1 %v7881_v22  ;;  %v7947_v22 = vld [vmem:[%s11496_s1 + $0xae4] ss:$8 sps:$4 sm:$0xff]  }
 0x13e   :  { %5478 = vmatprep.subr.bf16.mxu1 %v7889_v25  ;;  %v7950_v25 = vld [vmem:[%s11496_s1 + $0xbe4] ss:$8 sps:$4 sm:$0xff]  }
 0x13f   :  { %5438 = vmatpush2.bf16.msra.mxu0 %v7884_v24  ;;  %v7945_v24 = vld [vmem:[%s11496_s1 + $0xae0] ss:$8 sps:$4 sm:$0xff]  }
 0x140   :  { %5489 = vmatprep.subr.bf16.mxu0 %v7892_v28  ;;  %v7951_v28 = vld [vmem:[%s11496_s1 + $0xad0] ss:$8 sps:$4 sm:$0xff]  }
 0x141   :  { %5479 = vmatpush2.bf16.msra.mxu1 %v7887_v26  ;;  %v7948_v26 = vld [vmem:[%s11496_s1 + $0xbe0] ss:$8 sps:$4 sm:$0xff]  }
 0x142   :  { %v5195_v42 = vpop.f32.mrf.mxu0  ;;  %5440 = vmatmul.mubr.bf16.vlgmr.msra.gmra.mxu0 %v330_v31  ;;  %5530 = vmatprep.subr.bf16.mxu1 %v7896_v32  ;;  %v7959_v31 = vld [vmem:[%s11496_s1 + $0xac4] ss:$8 sps:$4 sm:$0xff]   ;;  %v7957_v32 = vld [vmem:[%s11496_s1 + $0xac0] ss:$8 sps:$4 sm:$0xff]  }
 0x143   :  { %v5196_v45 = vadd.f32 %v5195_v42, %v9598_v16  ;;  %5490 = vmatpush1.bf16.msra.mxu0 %v7890_v29  ;;  %5521 = vmatprep.mubr.bf16.mxu0 %v335_v35  ;;  %v5236_v47 = vpop.f32.mrf.mxu1  ;;  %v7903_v16 = vld [vmem:[%s11496_s1 + $0xa50] ss:$8 sps:$4 sm:$0xff]   ;;  %v7956_v29 = vld [vmem:[%s11496_s1 + $0xbd4] ss:$8 sps:$4 sm:$0xff]   ;;  %v7960_v35 = vld [vmem:[%s11496_s1 + $0xbc0] ss:$8 sps:$4 sm:$0xff]  }
 0x144   :  { %v5197_v46 = vpop.f32.mrf.mxu0  ;;  %5481 = vmatmul.mubr.bf16.vlgmr.msra.gmra.mxu1 %v332_v37  ;;  %5491 = vmatprep.subr.bf16.mxu0 %v7899_v38  ;;  %v7965_v37 = vld [vmem:[%s11496_s1 + $0xab4] ss:$8 sps:$4 sm:$0xff]   ;;  %v7963_v38 = vld [vmem:[%s11496_s1 + $0xab0] ss:$8 sps:$4 sm:$0xff]   ;;  %v7971_v42 = vld [vmem:[%s11496_s1 + $0xaa4] ss:$8 sps:$4 sm:$0xff]  }
 0x145   :  { %v5198_v50 = vadd.f32 %v5197_v46, %v9606_v21  ;;  %v9816_v51 = vadd.f32 %v5236_v47, %v5196_v45  ;;  %5531 = vmatpush1.bf16.msra.mxu1 %v7894_v33  ;;  %5562 = vmatprep.mubr.bf16.mxu1 %v337_v41  ;;  %v5238_v54 = vpop.f32.mrf.mxu1  ;;  %v7906_v21 = vld [vmem:[%s11496_s1 + $0xb50] ss:$8 sps:$4 sm:$0xff]   ;;  %v7962_v33 = vld [vmem:[%s11496_s1 + $0xbc4] ss:$8 sps:$4 sm:$0xff]   ;;  %v7977_v46 = vld [vmem:[%s11496_s1 + $0xa94] ss:$8 sps:$4 sm:$0xff]  }
 0x146   :  { %v5199_v52 = vpop.f32.mrf.mxu0  ;;  %5532 = vmatprep.subr.bf16.mxu1 %v7902_v44  ;;  %v7966_v41 = vld [vmem:[%s11496_s1 + $0xbb0] ss:$8 sps:$4 sm:$0xff]   ;;  %v7974_v44 = vld [vmem:[%s11496_s1 + $0xba4] ss:$8 sps:$4 sm:$0xff]   ;;  %v7972_v47 = vld [vmem:[%s11496_s1 + $0xba0] ss:$8 sps:$4 sm:$0xff]  }
 0x147   :  { %v9824_v56 = vadd.f32 %v5238_v54, %v5198_v50  ;;  %5492 = vmatpush1.bf16.msra.mxu0 %v7897_v53  ;;  %v5240_v59 = vpop.f32.mrf.mxu1  ;;  %v7968_v53 = vld [vmem:[%s11496_s1 + $0xbb4] ss:$8 sps:$4 sm:$0xff]   ;;  %v7983_v54 = vld [vmem:[%s11496_s1 + $0xa84] ss:$8 sps:$4 sm:$0xff]  }
 0x148   :  { %v5200_v39 = vpop.f32.mrf.mxu0  ;;  %5493 = vmatprep.subr.bf16.mxu0 %v7905_v49  ;;  %v34_v45 = vld [vmem:[%s11495_s0 + $0x30] sm:$0xff]  ;;  %v7984_v59 = vld [vmem:[%s11496_s1 + $0xb80] ss:$8 sps:$4 sm:$0xff]  }
 0x149   :  { %5533 = vmatpush1.bf16.msra.mxu1 %v7900_v55  ;;  %v5241_v63 = vpop.f32.mrf.mxu1  ;;  %v7969_v55 = vld [vmem:[%s11496_s1 + $0xaa0] ss:$8 sps:$4 sm:$0xff]   ;;  %v156_v49 = vcombine.high %v34_v45, %v34_v45  ;;  %v7980_v50 = vld [vmem:[%s11496_s1 + $0xb94] ss:$8 sps:$4 sm:$0xff]   ;;  %v9974_v52 = vrot.slane %v34_v45, %v8855_v48  ;;  %v8032_v45 = vld [vmem:[%s11496_s1 + $0xc04] ss:$8 sps:$4 sm:$0xff]  }
 0x14a   :  { %5534 = vmatprep.subr.bf16.mxu1 %v7908_v34  ;;  %v7978_v34 = vld [vmem:[%s11496_s1 + $0xb90] ss:$8 sps:$4 sm:$0xff]   ;;  %v7981_v39 = vld [vmem:[%s11496_s1 + $0xa80] ss:$8 sps:$4 sm:$0xff]  }
 0x14b   :  { %5494 = vmatpush1.bf16.msra.mxu0 %v7903_v16  ;;  %v7975_v16 = vld [vmem:[%s11496_s1 + $0xa90] ss:$8 sps:$4 sm:$0xff]  }
 0x14c   :  { %5495 = vmatprep.subr.bf16.mxu0 %v7911_v58  ;;  %v7986_v58 = vld [vmem:[%s11496_s1 + $0xb84] ss:$8 sps:$4 sm:$0xff]   ;;  %v7987_v63 = vld [vmem:[%s11496_s1 + $0xc70] ss:$8 sps:$4 sm:$0xff]  }
 0x14d   :  { %5535 = vmatpush1.bf16.msra.mxu1 %v7906_v21  ;;  %v9983_v21 = vrot.slane %v156_v49, %v8855_v48  ;;  %v8038_v49 = vld [vmem:[%s11496_s1 + $0xcf4] ss:$8 sps:$4 sm:$0xff]  }
 0x14e   :  { %5536 = vmatprep.subr.bf16.mxu1 %v7914_v61  ;;  %v7989_v61 = vld [vmem:[%s11496_s1 + $0xc74] ss:$8 sps:$4 sm:$0xff]  }
 0x14f   :  { %5496 = vmatpush1.bf16.msra.mxu0 %v7909_v60  ;;  %v171_v60 = vcombine.high %v9974_v52, %v9974_v52 }
 0x150   :  { %5497 = vmatprep.subr.bf16.mxu0 %v7917_v1  ;;  %v334_v1 = vpack.c.bf16 %v9759_v19, %v9759_v19  ;;  %v7994_v19 = vld [vmem:[%s11496_s1 + $0xc60] ss:$8 sps:$4 sm:$0xff]  }
 0x151   :  { %5537 = vmatpush1.bf16.msra.mxu1 %v7912_v0  ;;  %v172_v0 = vcombine.high %v9983_v21, %v9983_v21 }
 0x152   :  { %5538 = vmatprep.subr.bf16.mxu1 %v7920_v3  ;;  %v7991_v3 = vld [vmem:[%s11496_s1 + $0xd70] ss:$8 sps:$4 sm:$0xff]  }
 0x153   :  { %5498 = vmatpush1.bf16.msra.mxu0 %v7915_v2  ;;  %v7993_v2 = vld [vmem:[%s11496_s1 + $0xd74] ss:$8 sps:$4 sm:$0xff]  }
 0x154   :  { %5499 = vmatprep.subr.bf16.mxu0 %v7923_v5  ;;  %v336_v5 = vpack.c.bf16 %v9768_v23, %v9768_v23  ;;  %v7997_v23 = vld [vmem:[%s11496_s1 + $0xd60] ss:$8 sps:$4 sm:$0xff]  }
 0x155   :  { %5539 = vmatpush1.bf16.msra.mxu1 %v7918_v4  ;;  %v339_v4 = vpack.c.bf16 %v171_v60, %v171_v60  ;;  %v8050_v60 = vld [vmem:[%s11496_s1 + $0xcd4] ss:$8 sps:$4 sm:$0xff]  }
 0x156   :  { %5540 = vmatprep.subr.bf16.mxu1 %v7926_v6  ;;  %v341_v6 = vpack.c.bf16 %v172_v0, %v172_v0  ;;  %v8051_v0 = vld [vmem:[%s11496_s1 + $0xdd0] ss:$8 sps:$4 sm:$0xff]  }
 0x157   :  { %5500 = vmatpush1.bf16.msra.mxu0 %v7921_v36  ;;  %v7996_v36 = vld [vmem:[%s11496_s1 + $0xc64] ss:$8 sps:$4 sm:$0xff]  }
 0x158   :  { %5501 = vmatprep.subr.bf16.mxu0 %v7929_v8  ;;  %v7999_v8 = vld [vmem:[%s11496_s1 + $0xd64] ss:$8 sps:$4 sm:$0xff]  }
 0x159   :  { %5541 = vmatpush1.bf16.msra.mxu1 %v7924_v7 }
 0x15a   :  { %5542 = vmatprep.subr.bf16.mxu1 %v7932_v40 }
 0x15b   :  { %5502 = vmatpush1.bf16.msra.mxu0 %v7927_v9 }
 0x15c   :  { %5503 = vmatprep.subr.bf16.mxu0 %v7935_v11  ;;  %v8002_v11 = vld [vmem:[%s11496_s1 + $0xc54] ss:$8 sps:$4 sm:$0xff]  }
 0x15d   :  { %5543 = vmatpush1.bf16.msra.mxu1 %v7930_v10 }
 0x15e   :  { %5544 = vmatprep.subr.bf16.mxu1 %v7938_v13 }
 0x15f   :  { %5504 = vmatpush1.bf16.msra.mxu0 %v7933_v12 }
 0x160   :  { %5505 = vmatprep.subr.bf16.mxu0 %v7941_v15 }
 0x161   :  { %5545 = vmatpush1.bf16.msra.mxu1 %v7936_v14 }
 0x162   :  { %5546 = vmatprep.subr.bf16.mxu1 %v7944_v18 }
 0x163   :  { %5506 = vmatpush2.bf16.msra.mxu0 %v7939_v17  ;;  %v8005_v17 = vld [vmem:[%s11496_s1 + $0xd54] ss:$8 sps:$4 sm:$0xff]  }
 0x164   :  { %5507 = vmatprep.subr.bf16.mxu0 %v7947_v22  ;;  %v8008_v22 = vld [vmem:[%s11496_s1 + $0xc44] ss:$8 sps:$4 sm:$0xff]  }
 0x165   :  { %5547 = vmatpush2.bf16.msra.mxu1 %v7942_v20 }
 0x166   :  { %5548 = vmatprep.subr.bf16.mxu1 %v7950_v25  ;;  %v8006_v25 = vld [vmem:[%s11496_s1 + $0xc40] ss:$8 sps:$4 sm:$0xff]  }
 0x167   :  { %5508 = vmatpush2.bf16.msra.mxu0 %v7945_v24 }
 0x168   :  { %5509 = vmatprep.subr.bf16.mxu0 %v7953_v27 }
 0x169   :  { %5549 = vmatpush2.bf16.msra.mxu1 %v7948_v26  ;;  %v8011_v26 = vld [vmem:[%s11496_s1 + $0xd44] ss:$8 sps:$4 sm:$0xff]  }
 0x16a   :  { %5550 = vmatprep.subr.bf16.mxu1 %v7956_v29  ;;  %v8014_v29 = vld [vmem:[%s11496_s1 + $0xc34] ss:$8 sps:$4 sm:$0xff]  }
 0x16b   :  { %5510 = vmatpush2.bf16.msra.mxu0 %v7951_v28  ;;  %v8009_v28 = vld [vmem:[%s11496_s1 + $0xd40] ss:$8 sps:$4 sm:$0xff]  }
 0x16c   :  { %5511 = vmatprep.subr.bf16.mxu0 %v7959_v31  ;;  %v8017_v31 = vld [vmem:[%s11496_s1 + $0xd34] ss:$8 sps:$4 sm:$0xff]  }
 0x16d   :  { %5551 = vmatpush2.bf16.msra.mxu1 %v7954_v30  ;;  %v8012_v30 = vld [vmem:[%s11496_s1 + $0xc30] ss:$8 sps:$4 sm:$0xff]  }
 0x16e   :  { %5552 = vmatprep.subr.bf16.mxu1 %v7962_v33  ;;  %v8020_v33 = vld [vmem:[%s11496_s1 + $0xc24] ss:$8 sps:$4 sm:$0xff]  }
 0x16f   :  { %5512 = vmatpush2.bf16.msra.mxu0 %v7957_v32  ;;  %v8015_v32 = vld [vmem:[%s11496_s1 + $0xd30] ss:$8 sps:$4 sm:$0xff]  }
 0x170   :  { %5513 = vmatprep.subr.bf16.mxu0 %v7965_v37  ;;  %v8023_v37 = vld [vmem:[%s11496_s1 + $0xd24] ss:$8 sps:$4 sm:$0xff]  }
 0x171   :  { %5553 = vmatpush2.bf16.msra.mxu1 %v7960_v35  ;;  %v8018_v35 = vld [vmem:[%s11496_s1 + $0xc20] ss:$8 sps:$4 sm:$0xff]  }
 0x172   :  { %5554 = vmatprep.subr.bf16.mxu1 %v7968_v53  ;;  %v8026_v53 = vld [vmem:[%s11496_s1 + $0xc14] ss:$8 sps:$4 sm:$0xff]  }
 0x173   :  { %5514 = vmatpush2.bf16.msra.mxu0 %v7963_v38  ;;  %v8021_v38 = vld [vmem:[%s11496_s1 + $0xd20] ss:$8 sps:$4 sm:$0xff]  }
 0x174   :  { %5515 = vmatprep.subr.bf16.mxu0 %v7971_v42  ;;  %v8029_v42 = vld [vmem:[%s11496_s1 + $0xd14] ss:$8 sps:$4 sm:$0xff]  }
 0x175   :  { %5555 = vmatpush2.bf16.msra.mxu1 %v7966_v41  ;;  %v8024_v41 = vld [vmem:[%s11496_s1 + $0xc10] ss:$8 sps:$4 sm:$0xff]  }
 0x176   :  { %5556 = vmatprep.subr.bf16.mxu1 %v7974_v44  ;;  %v8027_v44 = vld [vmem:[%s11496_s1 + $0xd10] ss:$8 sps:$4 sm:$0xff]  }
 0x177   :  { %5516 = vmatpush2.bf16.msra.mxu0 %v7969_v55  ;;  %v8030_v55 = vld [vmem:[%s11496_s1 + $0xc00] ss:$8 sps:$4 sm:$0xff]  }
 0x178   :  { %5517 = vmatprep.subr.bf16.mxu0 %v7977_v46  ;;  %v8035_v46 = vld [vmem:[%s11496_s1 + $0xd04] ss:$8 sps:$4 sm:$0xff]  }
 0x179   :  { %5557 = vmatpush2.bf16.msra.mxu1 %v7972_v47  ;;  %v8033_v47 = vld [vmem:[%s11496_s1 + $0xd00] ss:$8 sps:$4 sm:$0xff]  }
 0x17a   :  { %5558 = vmatprep.subr.bf16.mxu1 %v7980_v50  ;;  %v8036_v50 = vld [vmem:[%s11496_s1 + $0xcf0] ss:$8 sps:$4 sm:$0xff]  }
 0x17b   :  { %5518 = vmatpush2.bf16.msra.mxu0 %v7975_v16  ;;  %v8041_v16 = vld [vmem:[%s11496_s1 + $0xdf4] ss:$8 sps:$4 sm:$0xff]  }
 0x17c   :  { %5519 = vmatprep.subr.bf16.mxu0 %v7983_v54  ;;  %v8039_v54 = vld [vmem:[%s11496_s1 + $0xdf0] ss:$8 sps:$4 sm:$0xff]  }
 0x17d   :  { %5559 = vmatpush2.bf16.msra.mxu1 %v7978_v34  ;;  %v8044_v34 = vld [vmem:[%s11496_s1 + $0xce4] ss:$8 sps:$4 sm:$0xff]  }
 0x17e   :  { %5560 = vmatprep.subr.bf16.mxu1 %v7986_v58  ;;  %v8047_v58 = vld [vmem:[%s11496_s1 + $0xde4] ss:$8 sps:$4 sm:$0xff]  }
 0x17f   :  { %5520 = vmatpush2.bf16.msra.mxu0 %v7981_v39  ;;  %v8042_v39 = vld [vmem:[%s11496_s1 + $0xce0] ss:$8 sps:$4 sm:$0xff]  }
 0x180   :  { %5571 = vmatprep.subr.bf16.mxu0 %v7989_v61  ;;  %v8048_v61 = vld [vmem:[%s11496_s1 + $0xcd0] ss:$8 sps:$4 sm:$0xff]  }
 0x181   :  { %5561 = vmatpush2.bf16.msra.mxu1 %v7984_v59  ;;  %v8045_v59 = vld [vmem:[%s11496_s1 + $0xde0] ss:$8 sps:$4 sm:$0xff]  }
 0x182   :  { %v5277_v7 = vpop.f32.mrf.mxu0  ;;  %5522 = vmatmul.mubr.bf16.vlgmr.msra.gmra.mxu0 %v334_v1  ;;  %5612 = vmatprep.subr.bf16.mxu1 %v7993_v2  ;;  %v8056_v1 = vld [vmem:[%s11496_s1 + $0xcc4] ss:$8 sps:$4 sm:$0xff]   ;;  %v8054_v2 = vld [vmem:[%s11496_s1 + $0xcc0] ss:$8 sps:$4 sm:$0xff]  }
 0x183   :  { %v5278_v9 = vadd.f32 %v5277_v7, %v9816_v51  ;;  %5572 = vmatpush1.bf16.msra.mxu0 %v7987_v63  ;;  %5603 = vmatprep.mubr.bf16.mxu0 %v339_v4  ;;  %v8000_v51 = vld [vmem:[%s11496_s1 + $0xc50] ss:$8 sps:$4 sm:$0xff]   ;;  %v8053_v63 = vld [vmem:[%s11496_s1 + $0xdd4] ss:$8 sps:$4 sm:$0xff]   ;;  %v8057_v4 = vld [vmem:[%s11496_s1 + $0xdc0] ss:$8 sps:$4 sm:$0xff]  }
 0x184   :  { %v5279_v40 = vpop.f32.mrf.mxu0  ;;  %v5318_v10 = vpop.f32.mrf.mxu1  ;;  %5563 = vmatmul.mubr.bf16.vlgmr.msra.gmra.mxu1 %v336_v5  ;;  %5573 = vmatprep.subr.bf16.mxu0 %v7996_v36  ;;  %v8062_v5 = vld [vmem:[%s11496_s1 + $0xcb4] ss:$8 sps:$4 sm:$0xff]   ;;  %v8060_v36 = vld [vmem:[%s11496_s1 + $0xcb0] ss:$8 sps:$4 sm:$0xff]   ;;  %v8068_v7 = vld [vmem:[%s11496_s1 + $0xca4] ss:$8 sps:$4 sm:$0xff]  }
 0x185   :  { %v5280_v12 = vadd.f32 %v5279_v40, %v9824_v56  ;;  %v10031_v13 = vadd.f32 %v5318_v10, %v5278_v9  ;;  %5613 = vmatpush1.bf16.msra.mxu1 %v7991_v3  ;;  %5644 = vmatprep.mubr.bf16.mxu1 %v341_v6  ;;  %v8003_v56 = vld [vmem:[%s11496_s1 + $0xd50] ss:$8 sps:$4 sm:$0xff]   ;;  %v8059_v3 = vld [vmem:[%s11496_s1 + $0xdc4] ss:$8 sps:$4 sm:$0xff]   ;;  %v8074_v40 = vld [vmem:[%s11496_s1 + $0xc94] ss:$8 sps:$4 sm:$0xff]  }
 0x186   :  { %v5281_v14 = vpop.f32.mrf.mxu0  ;;  %v5320_v15 = vpop.f32.mrf.mxu1  ;;  %5614 = vmatprep.subr.bf16.mxu1 %v7999_v8  ;;  %v8063_v6 = vld [vmem:[%s11496_s1 + $0xdb0] ss:$8 sps:$4 sm:$0xff]   ;;  %v8071_v8 = vld [vmem:[%s11496_s1 + $0xda4] ss:$8 sps:$4 sm:$0xff]   ;;  %v8069_v10 = vld [vmem:[%s11496_s1 + $0xda0] ss:$8 sps:$4 sm:$0xff]  }
 0x187   :  { %v10039_v18 = vadd.f32 %v5320_v15, %v5280_v12  ;;  %5574 = vmatpush1.bf16.msra.mxu0 %v7994_v19  ;;  %v8065_v19 = vld [vmem:[%s11496_s1 + $0xdb4] ss:$8 sps:$4 sm:$0xff]   ;;  %v8080_v15 = vld [vmem:[%s11496_s1 + $0xc84] ss:$8 sps:$4 sm:$0xff]  }
 0x188   :  { %v5282_v20 = vpop.f32.mrf.mxu0  ;;  %5575 = vmatprep.subr.bf16.mxu0 %v8002_v11  ;;  %v5322_v24 = vpop.f32.mrf.mxu1  ;;  %v35_v9 = vld [vmem:[%s11495_s0 + $0x38] sm:$0xff] }
 0x189   :  { %5615 = vmatpush1.bf16.msra.mxu1 %v7997_v23  ;;  %v8066_v23 = vld [vmem:[%s11496_s1 + $0xca0] ss:$8 sps:$4 sm:$0xff]   ;;  %v173_v11 = vcombine.high %v35_v9, %v35_v9  ;;  %v8077_v12 = vld [vmem:[%s11496_s1 + $0xd94] ss:$8 sps:$4 sm:$0xff]   ;;  %v10189_v14 = vrot.slane %v35_v9, %v8855_v48  ;;  %v8083_v20 = vld [vmem:[%s11496_s1 + $0xd84] ss:$8 sps:$4 sm:$0xff]  }
 0x18a   :  { %5616 = vmatprep.subr.bf16.mxu1 %v8005_v17  ;;  %v5323_v27 = vpop.f32.mrf.mxu1  ;;  %v8075_v17 = vld [vmem:[%s11496_s1 + $0xd90] ss:$8 sps:$4 sm:$0xff]  }
 0x18b   :  { %5576 = vmatpush1.bf16.msra.mxu0 %v8000_v51  ;;  %v8072_v51 = vld [vmem:[%s11496_s1 + $0xc90] ss:$8 sps:$4 sm:$0xff]   ;;  %v188_v24 = vcombine.high %v10189_v14, %v10189_v14 }
 0x18c   :  { %5577 = vmatprep.subr.bf16.mxu0 %v8008_v22  ;;  %v8078_v22 = vld [vmem:[%s11496_s1 + $0xc80] ss:$8 sps:$4 sm:$0xff]   ;;  %v8124_v9 = vld [vmem:[%s11496_s1 + $0xf10] ss:$8 sps:$4 sm:$0xff]  }
 0x18d   :  { %5617 = vmatpush1.bf16.msra.mxu1 %v8003_v56  ;;  %v10198_v56 = vrot.slane %v173_v11, %v8855_v48  ;;  %v8130_v11 = vld [vmem:[%s11496_s1 + $0xf00] ss:$8 sps:$4 sm:$0xff]  }
 0x18e   :  { %5618 = vmatprep.subr.bf16.mxu1 %v8011_v26  ;;  %v8081_v26 = vld [vmem:[%s11496_s1 + $0xd80] ss:$8 sps:$4 sm:$0xff]  }
 0x18f   :  { %5578 = vmatpush1.bf16.msra.mxu0 %v8006_v25  ;;  %v8086_v25 = vld [vmem:[%s11496_s1 + $0xe74] ss:$8 sps:$4 sm:$0xff]   ;;  %v189_v27 = vcombine.high %v10198_v56, %v10198_v56 }
 0x190   :  { %5579 = vmatprep.subr.bf16.mxu0 %v8014_v29  ;;  %v8090_v29 = vld [vmem:[%s11496_s1 + $0xf74] ss:$8 sps:$4 sm:$0xff]  }
 0x191   :  { %5619 = vmatpush1.bf16.msra.mxu1 %v8009_v28  ;;  %v338_v28 = vpack.c.bf16 %v9974_v52, %v9974_v52  ;;  %v8088_v52 = vld [vmem:[%s11496_s1 + $0xf70] ss:$8 sps:$4 sm:$0xff]  }
 0x192   :  { %5620 = vmatprep.subr.bf16.mxu1 %v8017_v31  ;;  %v343_v31 = vpack.c.bf16 %v188_v24, %v188_v24  ;;  %v8147_v24 = vld [vmem:[%s11496_s1 + $0xed4] ss:$8 sps:$4 sm:$0xff]  }
 0x193   :  { %5580 = vmatpush1.bf16.msra.mxu0 %v8012_v30  ;;  %v8084_v30 = vld [vmem:[%s11496_s1 + $0xe70] ss:$8 sps:$4 sm:$0xff]  }
 0x194   :  { %5581 = vmatprep.subr.bf16.mxu0 %v8020_v33  ;;  %v8093_v33 = vld [vmem:[%s11496_s1 + $0xe64] ss:$8 sps:$4 sm:$0xff]  }
 0x195   :  { %5621 = vmatpush1.bf16.msra.mxu1 %v8015_v32  ;;  %v340_v32 = vpack.c.bf16 %v9983_v21, %v9983_v21  ;;  %v8091_v21 = vld [vmem:[%s11496_s1 + $0xe60] ss:$8 sps:$4 sm:$0xff]  }
 0x196   :  { %5622 = vmatprep.subr.bf16.mxu1 %v8023_v37 }
 0x197   :  { %5582 = vmatpush1.bf16.msra.mxu0 %v8018_v35  ;;  %v345_v35 = vpack.c.bf16 %v189_v27, %v189_v27  ;;  %v8145_v27 = vld [vmem:[%s11496_s1 + $0xed0] ss:$8 sps:$4 sm:$0xff]  }
 0x198   :  { %5583 = vmatprep.subr.bf16.mxu0 %v8026_v53 }
 0x199   :  { %5623 = vmatpush1.bf16.msra.mxu1 %v8021_v38  ;;  %v8096_v38 = vld [vmem:[%s11496_s1 + $0xf64] ss:$8 sps:$4 sm:$0xff]  }
 0x19a   :  { %5624 = vmatprep.subr.bf16.mxu1 %v8029_v42 }
 0x19b   :  { %5584 = vmatpush1.bf16.msra.mxu0 %v8024_v41 }
 0x19c   :  { %5585 = vmatprep.subr.bf16.mxu0 %v8032_v45 }
 0x19d   :  { %5625 = vmatpush1.bf16.msra.mxu1 %v8027_v44  ;;  %v8099_v44 = vld [vmem:[%s11496_s1 + $0xe54] ss:$8 sps:$4 sm:$0xff]  }
 0x19e   :  { %5626 = vmatprep.subr.bf16.mxu1 %v8035_v46 }
 0x19f   :  { %5586 = vmatpush1.bf16.msra.mxu0 %v8030_v55 }
 0x1a0   :  { %5587 = vmatprep.subr.bf16.mxu0 %v8038_v49  ;;  %v8102_v49 = vld [vmem:[%s11496_s1 + $0xf54] ss:$8 sps:$4 sm:$0xff]  }
 0x1a1   :  { %5627 = vmatpush1.bf16.msra.mxu1 %v8033_v47 }
 0x1a2   :  { %5628 = vmatprep.subr.bf16.mxu1 %v8041_v16 }
 0x1a3   :  { %5588 = vmatpush2.bf16.msra.mxu0 %v8036_v50 }
 0x1a4   :  { %5589 = vmatprep.subr.bf16.mxu0 %v8044_v34 }
 0x1a5   :  { %5629 = vmatpush2.bf16.msra.mxu1 %v8039_v54  ;;  %v8105_v54 = vld [vmem:[%s11496_s1 + $0xe44] ss:$8 sps:$4 sm:$0xff]  }
 0x1a6   :  { %5630 = vmatprep.subr.bf16.mxu1 %v8047_v58  ;;  %v8108_v58 = vld [vmem:[%s11496_s1 + $0xf44] ss:$8 sps:$4 sm:$0xff]  }
 0x1a7   :  { %5590 = vmatpush2.bf16.msra.mxu0 %v8042_v39  ;;  %v8100_v39 = vld [vmem:[%s11496_s1 + $0xf50] ss:$8 sps:$4 sm:$0xff]  }
 0x1a8   :  { %5591 = vmatprep.subr.bf16.mxu0 %v8050_v60  ;;  %v8103_v60 = vld [vmem:[%s11496_s1 + $0xe40] ss:$8 sps:$4 sm:$0xff]  }
 0x1a9   :  { %5631 = vmatpush2.bf16.msra.mxu1 %v8045_v59 }
 0x1aa   :  { %5632 = vmatprep.subr.bf16.mxu1 %v8053_v63  ;;  %v8106_v63 = vld [vmem:[%s11496_s1 + $0xf40] ss:$8 sps:$4 sm:$0xff]  }
 0x1ab   :  { %5592 = vmatpush2.bf16.msra.mxu0 %v8048_v61  ;;  %v8111_v61 = vld [vmem:[%s11496_s1 + $0xe34] ss:$8 sps:$4 sm:$0xff]  }
 0x1ac   :  { %5593 = vmatprep.subr.bf16.mxu0 %v8056_v1  ;;  %v8109_v1 = vld [vmem:[%s11496_s1 + $0xe30] ss:$8 sps:$4 sm:$0xff]  }
 0x1ad   :  { %5633 = vmatpush2.bf16.msra.mxu1 %v8051_v0  ;;  %v8114_v0 = vld [vmem:[%s11496_s1 + $0xf34] ss:$8 sps:$4 sm:$0xff]  }
 0x1ae   :  { %5634 = vmatprep.subr.bf16.mxu1 %v8059_v3  ;;  %v8112_v3 = vld [vmem:[%s11496_s1 + $0xf30] ss:$8 sps:$4 sm:$0xff]  }
 0x1af   :  { %5594 = vmatpush2.bf16.msra.mxu0 %v8054_v2  ;;  %v8117_v2 = vld [vmem:[%s11496_s1 + $0xe24] ss:$8 sps:$4 sm:$0xff]  }
 0x1b0   :  { %5595 = vmatprep.subr.bf16.mxu0 %v8062_v5  ;;  %v8115_v5 = vld [vmem:[%s11496_s1 + $0xe20] ss:$8 sps:$4 sm:$0xff]  }
 0x1b1   :  { %5635 = vmatpush2.bf16.msra.mxu1 %v8057_v4  ;;  %v8120_v4 = vld [vmem:[%s11496_s1 + $0xf24] ss:$8 sps:$4 sm:$0xff]  }
 0x1b2   :  { %5636 = vmatprep.subr.bf16.mxu1 %v8065_v19  ;;  %v8118_v19 = vld [vmem:[%s11496_s1 + $0xf20] ss:$8 sps:$4 sm:$0xff]  }
 0x1b3   :  { %5596 = vmatpush2.bf16.msra.mxu0 %v8060_v36  ;;  %v8123_v36 = vld [vmem:[%s11496_s1 + $0xe14] ss:$8 sps:$4 sm:$0xff]  }
 0x1b4   :  { %5597 = vmatprep.subr.bf16.mxu0 %v8068_v7  ;;  %v8121_v7 = vld [vmem:[%s11496_s1 + $0xe10] ss:$8 sps:$4 sm:$0xff]  }
 0x1b5   :  { %5637 = vmatpush2.bf16.msra.mxu1 %v8063_v6  ;;  %v8126_v6 = vld [vmem:[%s11496_s1 + $0xf14] ss:$8 sps:$4 sm:$0xff]  }
 0x1b6   :  { %5638 = vmatprep.subr.bf16.mxu1 %v8071_v8  ;;  %v8129_v8 = vld [vmem:[%s11496_s1 + $0xe04] ss:$8 sps:$4 sm:$0xff]  }
 0x1b7   :  { %5598 = vmatpush2.bf16.msra.mxu0 %v8066_v23  ;;  %v8132_v23 = vld [vmem:[%s11496_s1 + $0xf04] ss:$8 sps:$4 sm:$0xff]  }
 0x1b8   :  { %5599 = vmatprep.subr.bf16.mxu0 %v8074_v40  ;;  %v8127_v40 = vld [vmem:[%s11496_s1 + $0xe00] ss:$8 sps:$4 sm:$0xff]  }
 0x1b9   :  { %5639 = vmatpush2.bf16.msra.mxu1 %v8069_v10  ;;  %v8135_v10 = vld [vmem:[%s11496_s1 + $0xef4] ss:$8 sps:$4 sm:$0xff]  }
 0x1ba   :  { %5640 = vmatprep.subr.bf16.mxu1 %v8077_v12  ;;  %v8138_v12 = vld [vmem:[%s11496_s1 + $0xff4] ss:$8 sps:$4 sm:$0xff]  }
 0x1bb   :  { %5600 = vmatpush2.bf16.msra.mxu0 %v8072_v51  ;;  %v8133_v51 = vld [vmem:[%s11496_s1 + $0xef0] ss:$8 sps:$4 sm:$0xff]  }
 0x1bc   :  { %5601 = vmatprep.subr.bf16.mxu0 %v8080_v15  ;;  %v8141_v15 = vld [vmem:[%s11496_s1 + $0xee4] ss:$8 sps:$4 sm:$0xff]  }
 0x1bd   :  { %5641 = vmatpush2.bf16.msra.mxu1 %v8075_v17  ;;  %v8136_v17 = vld [vmem:[%s11496_s1 + $0xff0] ss:$8 sps:$4 sm:$0xff]  }
 0x1be   :  { %5642 = vmatprep.subr.bf16.mxu1 %v8083_v20  ;;  %v8144_v20 = vld [vmem:[%s11496_s1 + $0xfe4] ss:$8 sps:$4 sm:$0xff]  }
 0x1bf   :  { %5602 = vmatpush2.bf16.msra.mxu0 %v8078_v22  ;;  %v8139_v22 = vld [vmem:[%s11496_s1 + $0xee0] ss:$8 sps:$4 sm:$0xff]  }
 0x1c0   :  { %5653 = vmatprep.subr.bf16.mxu0 %v8086_v25  ;;  %v8142_v25 = vld [vmem:[%s11496_s1 + $0xfe0] ss:$8 sps:$4 sm:$0xff]  }
 0x1c1   :  { %5643 = vmatpush2.bf16.msra.mxu1 %v8081_v26  ;;  %v8150_v26 = vld [vmem:[%s11496_s1 + $0xfd4] ss:$8 sps:$4 sm:$0xff]  }
 0x1c2   :  { %v5359_v37 = vpop.f32.mrf.mxu0  ;;  %5604 = vmatmul.mubr.bf16.vlgmr.msra.gmra.mxu0 %v338_v28  ;;  %5694 = vmatprep.subr.bf16.mxu1 %v8090_v29  ;;  %v8153_v28 = vld [vmem:[%s11496_s1 + $0xec4] ss:$8 sps:$4 sm:$0xff]   ;;  %v8148_v29 = vld [vmem:[%s11496_s1 + $0xfd0] ss:$8 sps:$4 sm:$0xff]  }
 0x1c3   :  { %v5360_v53 = vadd.f32 %v5359_v37, %v10031_v13  ;;  %5654 = vmatpush1.bf16.msra.mxu0 %v8084_v30  ;;  %5685 = vmatprep.mubr.bf16.mxu0 %v343_v31  ;;  %v8094_v13 = vld [vmem:[%s11496_s1 + $0xf60] ss:$8 sps:$4 sm:$0xff]   ;;  %v8156_v30 = vld [vmem:[%s11496_s1 + $0xfc4] ss:$8 sps:$4 sm:$0xff]  }
 0x1c4   :  { %v5361_v41 = vpop.f32.mrf.mxu0  ;;  %v5400_v42 = vpop.f32.mrf.mxu1  ;;  %5645 = vmatmul.mubr.bf16.vlgmr.msra.gmra.mxu1 %v340_v32  ;;  %5655 = vmatprep.subr.bf16.mxu0 %v8093_v33  ;;  %v8151_v31 = vld [vmem:[%s11496_s1 + $0xec0] ss:$8 sps:$4 sm:$0xff]   ;;  %v8159_v32 = vld [vmem:[%s11496_s1 + $0xeb4] ss:$8 sps:$4 sm:$0xff]  }
 0x1c5   :  { %v5362_v45 = vadd.f32 %v5361_v41, %v10039_v18  ;;  %v10243_v55 = vadd.f32 %v5400_v42, %v5360_v53  ;;  %5695 = vmatpush1.bf16.msra.mxu1 %v8088_v52  ;;  %5726 = vmatprep.mubr.bf16.mxu1 %v345_v35  ;;  %v8097_v18 = vld [vmem:[%s11496_s1 + $0xe50] ss:$8 sps:$4 sm:$0xff]   ;;  %v8154_v33 = vld [vmem:[%s11496_s1 + $0xfc0] ss:$8 sps:$4 sm:$0xff]  }
 0x1c6   :  { %v5363_v46 = vpop.f32.mrf.mxu0  ;;  %v5402_v47 = vpop.f32.mrf.mxu1  ;;  %5696 = vmatprep.subr.bf16.mxu1 %v8096_v38 }
 0x1c7   :  { %v10251_v50 = vadd.f32 %v5402_v47, %v5362_v45  ;;  %5656 = vmatpush1.bf16.msra.mxu0 %v8091_v21 }
 0x1c8   :  { %v5364_v16 = vpop.f32.mrf.mxu0  ;;  %5657 = vmatprep.subr.bf16.mxu0 %v8099_v44  ;;  %v5404_v34 = vpop.f32.mrf.mxu1 }
 0x1c9   :  { %5697 = vmatpush1.bf16.msra.mxu1 %v8094_v13 }
 0x1ca   :  { %5698 = vmatprep.subr.bf16.mxu1 %v8102_v49  ;;  %v5405_v59 = vpop.f32.mrf.mxu1 }
 0x1cb   :  { %5658 = vmatpush1.bf16.msra.mxu0 %v8097_v18 }
 0x1cc   :  { %5659 = vmatprep.subr.bf16.mxu0 %v8105_v54 }
 0x1cd   :  { %5699 = vmatpush1.bf16.msra.mxu1 %v8100_v39 }
 0x1ce   :  { %5700 = vmatprep.subr.bf16.mxu1 %v8108_v58 }
 0x1cf   :  { %5660 = vmatpush1.bf16.msra.mxu0 %v8103_v60 }
 0x1d0   :  { %5661 = vmatprep.subr.bf16.mxu0 %v8111_v61 }
 0x1d1   :  { %5701 = vmatpush1.bf16.msra.mxu1 %v8106_v63 }
 0x1d2   :  { %5702 = vmatprep.subr.bf16.mxu1 %v8114_v0 }
 0x1d3   :  { %5662 = vmatpush1.bf16.msra.mxu0 %v8109_v1 }
 0x1d4   :  { %5663 = vmatprep.subr.bf16.mxu0 %v8117_v2 }
 0x1d5   :  { %5703 = vmatpush1.bf16.msra.mxu1 %v8112_v3 }
 0x1d6   :  { %5704 = vmatprep.subr.bf16.mxu1 %v8120_v4 }
 0x1d7   :  { %5664 = vmatpush1.bf16.msra.mxu0 %v8115_v5 }
 0x1d8   :  { %5665 = vmatprep.subr.bf16.mxu0 %v8123_v36 }
 0x1d9   :  { %5705 = vmatpush1.bf16.msra.mxu1 %v8118_v19 }
 0x1da   :  { %5706 = vmatprep.subr.bf16.mxu1 %v8126_v6 }
 0x1db   :  { %5666 = vmatpush1.bf16.msra.mxu0 %v8121_v7 }
 0x1dc   :  { %5667 = vmatprep.subr.bf16.mxu0 %v8129_v8 }
 0x1dd   :  { %5707 = vmatpush1.bf16.msra.mxu1 %v8124_v9 }
 0x1de   :  { %5708 = vmatprep.subr.bf16.mxu1 %v8132_v23 }
 0x1df   :  { %5668 = vmatpush1.bf16.msra.mxu0 %v8127_v40 }
 0x1e0   :  { %5669 = vmatprep.subr.bf16.mxu0 %v8135_v10 }
 0x1e1   :  { %5709 = vmatpush1.bf16.msra.mxu1 %v8130_v11 }
 0x1e2   :  { %5710 = vmatprep.subr.bf16.mxu1 %v8138_v12 }
 0x1e3   :  { %5670 = vmatpush2.bf16.msra.mxu0 %v8133_v51 }
 0x1e4   :  { %5671 = vmatprep.subr.bf16.mxu0 %v8141_v15 }
 0x1e5   :  { %5711 = vmatpush2.bf16.msra.mxu1 %v8136_v17 }
 0x1e6   :  { %5712 = vmatprep.subr.bf16.mxu1 %v8144_v20 }
 0x1e7   :  { %5672 = vmatpush2.bf16.msra.mxu0 %v8139_v22 }
 0x1e8   :  { %5673 = vmatprep.subr.bf16.mxu0 %v8147_v24 }
 0x1e9   :  { %5713 = vmatpush2.bf16.msra.mxu1 %v8142_v25 }
 0x1ea   :  { %5714 = vmatprep.subr.bf16.mxu1 %v8150_v26 }
 0x1eb   :  { %5674 = vmatpush2.bf16.msra.mxu0 %v8145_v27 }
 0x1ec   :  { %5675 = vmatprep.subr.bf16.mxu0 %v8153_v28 }
 0x1ed   :  { %5715 = vmatpush2.bf16.msra.mxu1 %v8148_v29 }
 0x1ee   :  { %12 = vsyncpa [#allocation3], 0  ;;  %5716 = vmatprep.subr.bf16.mxu1 %v8156_v30  ;;  %v8162_v52 = vld [vmem:[%s11496_s1 + $0xfb4] ss:$8 sps:$4 sm:$0xff]   ;;  %v8157_v35 = vld [vmem:[%s11496_s1 + $0xeb0] ss:$8 sps:$4 sm:$0xff]   ;;  %v342_v61 = vpack.c.bf16 %v10189_v14, %v10189_v14  ;;  %v344_v2 = vpack.c.bf16 %v10198_v56, %v10198_v56 }
 0x1ef   :  { %5676 = vmatpush2.bf16.msra.mxu0 %v8151_v31  ;;  %v8165_v37 = vld [vmem:[%s11496_s1 + $0xea4] ss:$8 sps:$4 sm:$0xff]   ;;  %v8160_v38 = vld [vmem:[%s11496_s1 + $0xfb0] ss:$8 sps:$4 sm:$0xff]   ;;  %v8163_v41 = vld [vmem:[%s11496_s1 + $0xea0] ss:$8 sps:$4 sm:$0xff]  }
 0x1f0   :  { %5677 = vmatprep.subr.bf16.mxu0 %v8159_v32  ;;  %v8168_v53 = vld [vmem:[%s11496_s1 + $0xfa4] ss:$8 sps:$4 sm:$0xff]   ;;  %v8171_v42 = vld [vmem:[%s11496_s1 + $0xe94] ss:$8 sps:$4 sm:$0xff]   ;;  %v8166_v44 = vld [vmem:[%s11496_s1 + $0xfa0] ss:$8 sps:$4 sm:$0xff]  }
 0x1f1   :  { %5717 = vmatpush2.bf16.msra.mxu1 %v8154_v33  ;;  %v36_v21 = vld [vmem:[%s11495_s0 + $0x40] sm:$0xff]  ;;  %v8174_v13 = vld [vmem:[%s11496_s1 + $0xf94] ss:$8 sps:$4 sm:$0xff]   ;;  %v8169_v46 = vld [vmem:[%s11496_s1 + $0xe90] ss:$8 sps:$4 sm:$0xff]   ;;  %s8682_s29 = smov [#allocation2]  }
 0x1f2   :  { %5718 = vmatprep.subr.bf16.mxu1 %v8162_v52  ;;  %v190_v45 = vcombine.high %v36_v21, %v36_v21  ;;  %v10404_v47 = vrot.slane %v36_v21, %v8855_v48  ;;  %v8177_v49 = vld [vmem:[%s11496_s1 + $0xe84] ss:$8 sps:$4 sm:$0xff]   ;;  %v8172_v18 = vld [vmem:[%s11496_s1 + $0xf90] ss:$8 sps:$4 sm:$0xff]   ;;  %v8175_v34 = vld [vmem:[%s11496_s1 + $0xe80] ss:$8 sps:$4 sm:$0xff]  }
 0x1f3   :  { %5678 = vmatpush2.bf16.msra.mxu0 %v8157_v35  ;;  %v8180_v54 = vld [vmem:[%s11496_s1 + $0xf84] ss:$8 sps:$4 sm:$0xff]   ;;  %v8183_v58 = vld [vmem:[%s11496_s1 + $0x1074] ss:$8 sps:$4 sm:$0xff]   ;;  %v8178_v59 = vld [vmem:[%s11496_s1 + $0xf80] ss:$8 sps:$4 sm:$0xff]  }
 0x1f4   :  { %5679 = vmatprep.subr.bf16.mxu0 %v8165_v37  ;;  %v10413_v16 = vrot.slane %v190_v45, %v8855_v48  ;;  %v205_v39 = vcombine.high %v10404_v47, %v10404_v47  ;;  %v8187_v63 = vld [vmem:[%s11496_s1 + $0x1174] ss:$8 sps:$4 sm:$0xff]   ;;  %v8181_v0 = vld [vmem:[%s11496_s1 + $0x1070] ss:$8 sps:$4 sm:$0xff]   ;;  %v8190_v3 = vld [vmem:[%s11496_s1 + $0x1064] ss:$8 sps:$4 sm:$0xff]  }
 0x1f5   :  { %5719 = vmatpush2.bf16.msra.mxu1 %v8160_v38  ;;  %v8185_v14 = vld [vmem:[%s11496_s1 + $0x1170] ss:$8 sps:$4 sm:$0xff]   ;;  %v8193_v36 = vld [vmem:[%s11496_s1 + $0x1164] ss:$8 sps:$4 sm:$0xff]   ;;  %v8188_v56 = vld [vmem:[%s11496_s1 + $0x1060] ss:$8 sps:$4 sm:$0xff]  }
 0x1f6   :  { %5720 = vmatprep.subr.bf16.mxu1 %v8168_v53  ;;  %v206_v60 = vcombine.high %v10413_v16, %v10413_v16  ;;  %v347_v1 = vpack.c.bf16 %v205_v39, %v205_v39  ;;  %v8196_v8 = vld [vmem:[%s11496_s1 + $0x1054] ss:$8 sps:$4 sm:$0xff]   ;;  %v8202_v15 = vld [vmem:[%s11496_s1 + $0x1044] ss:$8 sps:$4 sm:$0xff]   ;;  %v8197_v20 = vld [vmem:[%s11496_s1 + $0x1150] ss:$8 sps:$4 sm:$0xff]  }
 0x1f7   :  { %5680 = vmatpush2.bf16.msra.mxu0 %v8163_v41  ;;  %v8199_v11 = vld [vmem:[%s11496_s1 + $0x1154] ss:$8 sps:$4 sm:$0xff]   ;;  %v8205_v22 = vld [vmem:[%s11496_s1 + $0x1144] ss:$8 sps:$4 sm:$0xff]   ;;  %v8200_v25 = vld [vmem:[%s11496_s1 + $0x1040] ss:$8 sps:$4 sm:$0xff]  }
 0x1f8   :  { %5681 = vmatprep.subr.bf16.mxu0 %v8171_v42  ;;  %v349_v4 = vpack.c.bf16 %v206_v60, %v206_v60  ;;  %v8208_v26 = vld [vmem:[%s11496_s1 + $0x1034] ss:$8 sps:$4 sm:$0xff]   ;;  %v8203_v27 = vld [vmem:[%s11496_s1 + $0x1140] ss:$8 sps:$4 sm:$0xff]   ;;  %v8206_v29 = vld [vmem:[%s11496_s1 + $0x1030] ss:$8 sps:$4 sm:$0xff]  }
 0x1f9   :  { %5721 = vmatpush2.bf16.msra.mxu1 %v8166_v44  ;;  %v8211_v28 = vld [vmem:[%s11496_s1 + $0x1134] ss:$8 sps:$4 sm:$0xff]   ;;  %v8214_v30 = vld [vmem:[%s11496_s1 + $0x1024] ss:$8 sps:$4 sm:$0xff]   ;;  %v8209_v31 = vld [vmem:[%s11496_s1 + $0x1130] ss:$8 sps:$4 sm:$0xff]  }
 0x1fa   :  { %5722 = vmatprep.subr.bf16.mxu1 %v8174_v13  ;;  %v8217_v32 = vld [vmem:[%s11496_s1 + $0x1124] ss:$8 sps:$4 sm:$0xff]   ;;  %v8212_v33 = vld [vmem:[%s11496_s1 + $0x1020] ss:$8 sps:$4 sm:$0xff]   ;;  %v8220_v52 = vld [vmem:[%s11496_s1 + $0x1014] ss:$8 sps:$4 sm:$0xff]  }
 0x1fb   :  { %5682 = vmatpush2.bf16.msra.mxu0 %v8169_v46  ;;  %v8215_v35 = vld [vmem:[%s11496_s1 + $0x1120] ss:$8 sps:$4 sm:$0xff]   ;;  %v8223_v37 = vld [vmem:[%s11496_s1 + $0x1114] ss:$8 sps:$4 sm:$0xff]   ;;  %v8218_v38 = vld [vmem:[%s11496_s1 + $0x1010] ss:$8 sps:$4 sm:$0xff]  }
 0x1fc   :  { %5683 = vmatprep.subr.bf16.mxu0 %v8177_v49  ;;  %v8226_v53 = vld [vmem:[%s11496_s1 + $0x1004] ss:$8 sps:$4 sm:$0xff]   ;;  %v8221_v21 = vld [vmem:[%s11496_s1 + $0x1110] ss:$8 sps:$4 sm:$0xff]   ;;  %v8224_v42 = vld [vmem:[%s11496_s1 + $0x1000] ss:$8 sps:$4 sm:$0xff]  }
 0x1fd   :  { %5723 = vmatpush2.bf16.msra.mxu1 %v8172_v18  ;;  %v8229_v41 = vld [vmem:[%s11496_s1 + $0x1104] ss:$8 sps:$4 sm:$0xff]   ;;  %v8232_v44 = vld [vmem:[%s11496_s1 + $0x10f4] ss:$8 sps:$4 sm:$0xff]   ;;  %v8227_v45 = vld [vmem:[%s11496_s1 + $0x1100] ss:$8 sps:$4 sm:$0xff]  }
 0x1fe   :  { %5724 = vmatprep.subr.bf16.mxu1 %v8180_v54  ;;  %v8235_v13 = vld [vmem:[%s11496_s1 + $0x11f4] ss:$8 sps:$4 sm:$0xff]   ;;  %v8230_v46 = vld [vmem:[%s11496_s1 + $0x10f0] ss:$8 sps:$4 sm:$0xff]   ;;  %v8238_v49 = vld [vmem:[%s11496_s1 + $0x10e4] ss:$8 sps:$4 sm:$0xff]  }
 0x1ff   :  { %5684 = vmatpush2.bf16.msra.mxu0 %v8175_v34  ;;  %v8233_v18 = vld [vmem:[%s11496_s1 + $0x11f0] ss:$8 sps:$4 sm:$0xff]   ;;  %v8241_v54 = vld [vmem:[%s11496_s1 + $0x11e4] ss:$8 sps:$4 sm:$0xff]   ;;  %v8236_v34 = vld [vmem:[%s11496_s1 + $0x10e0] ss:$8 sps:$4 sm:$0xff]  }
 0x200   :  { %5735 = vmatprep.subr.bf16.mxu0 %v8183_v58  ;;  %v8244_v39 = vld [vmem:[%s11496_s1 + $0x10d4] ss:$8 sps:$4 sm:$0xff]   ;;  %v8239_v58 = vld [vmem:[%s11496_s1 + $0x11e0] ss:$8 sps:$4 sm:$0xff]   ;;  %v8242_v60 = vld [vmem:[%s11496_s1 + $0x10d0] ss:$8 sps:$4 sm:$0xff]  }
 0x201   :  { %5725 = vmatpush2.bf16.msra.mxu1 %v8178_v59  ;;  %v8247_v59 = vld [vmem:[%s11496_s1 + $0x11d4] ss:$8 sps:$4 sm:$0xff]  }
 0x202   :  { %v5441_v5 = vpop.f32.mrf.mxu0  ;;  %5686 = vmatmul.mubr.bf16.vlgmr.msra.gmra.mxu0 %v342_v61  ;;  %5776 = vmatprep.subr.bf16.mxu1 %v8187_v63  ;;  %v8250_v61 = vld [vmem:[%s11496_s1 + $0x10c4] ss:$8 sps:$4 sm:$0xff]   ;;  %v8245_v63 = vld [vmem:[%s11496_s1 + $0x11d0] ss:$8 sps:$4 sm:$0xff]  }
 0x203   :  { %v5442_v19 = vadd.f32 %v5441_v5, %v10243_v55  ;;  %5736 = vmatpush1.bf16.msra.mxu0 %v8181_v0  ;;  %5767 = vmatprep.mubr.bf16.mxu0 %v347_v1  ;;  %v8191_v55 = vld [vmem:[%s11496_s1 + $0x1160] ss:$8 sps:$4 sm:$0xff]   ;;  %v8253_v0 = vld [vmem:[%s11496_s1 + $0x11c4] ss:$8 sps:$4 sm:$0xff]  }
 0x204   :  { %v5443_v6 = vpop.f32.mrf.mxu0  ;;  %v5482_v7 = vpop.f32.mrf.mxu1  ;;  %5727 = vmatmul.mubr.bf16.vlgmr.msra.gmra.mxu1 %v344_v2  ;;  %5737 = vmatprep.subr.bf16.mxu0 %v8190_v3  ;;  %v8248_v1 = vld [vmem:[%s11496_s1 + $0x10c0] ss:$8 sps:$4 sm:$0xff]   ;;  %v8256_v2 = vld [vmem:[%s11496_s1 + $0x10b4] ss:$8 sps:$4 sm:$0xff]   ;;  %v8262_v5 = vld [vmem:[%s11496_s1 + $0x10a4] ss:$8 sps:$4 sm:$0xff]  }
 0x205   :  { %v5444_v9 = vadd.f32 %v5443_v6, %v10251_v50  ;;  %v10458_v23 = vadd.f32 %v5482_v7, %v5442_v19  ;;  %5777 = vmatpush1.bf16.msra.mxu1 %v8185_v14  ;;  %5808 = vmatprep.mubr.bf16.mxu1 %v349_v4  ;;  %v8194_v50 = vld [vmem:[%s11496_s1 + $0x1050] ss:$8 sps:$4 sm:$0xff]   ;;  %v8251_v3 = vld [vmem:[%s11496_s1 + $0x11c0] ss:$8 sps:$4 sm:$0xff]   ;;  %v8259_v14 = vld [vmem:[%s11496_s1 + $0x11b4] ss:$8 sps:$4 sm:$0xff]  }
 0x206   :  { %v5445_v40 = vpop.f32.mrf.mxu0  ;;  %v5484_v10 = vpop.f32.mrf.mxu1  ;;  %5778 = vmatprep.subr.bf16.mxu1 %v8193_v36  ;;  %v8254_v4 = vld [vmem:[%s11496_s1 + $0x10b0] ss:$8 sps:$4 sm:$0xff]   ;;  %v8265_v19 = vld [vmem:[%s11496_s1 + $0x11a4] ss:$8 sps:$4 sm:$0xff]   ;;  %v8260_v6 = vld [vmem:[%s11496_s1 + $0x10a0] ss:$8 sps:$4 sm:$0xff]  }
 0x207   :  { %v10466_v12 = vadd.f32 %v5484_v10, %v5444_v9  ;;  %5738 = vmatpush1.bf16.msra.mxu0 %v8188_v56  ;;  %v8257_v36 = vld [vmem:[%s11496_s1 + $0x11b0] ss:$8 sps:$4 sm:$0xff]   ;;  %v37_v56 = vld [vmem:[%s11495_s0 + $0x48] sm:$0xff]  ;;  %v8268_v7 = vld [vmem:[%s11496_s1 + $0x1094] ss:$8 sps:$4 sm:$0xff]  }
 0x208   :  { %v5446_v51 = vpop.f32.mrf.mxu0  ;;  %5739 = vmatprep.subr.bf16.mxu0 %v8196_v8  ;;  %v5486_v17 = vpop.f32.mrf.mxu1  ;;  %v8263_v8 = vld [vmem:[%s11496_s1 + $0x11a0] ss:$8 sps:$4 sm:$0xff]   ;;  %v207_v9 = vcombine.high %v37_v56, %v37_v56  ;;  %v8266_v40 = vld [vmem:[%s11496_s1 + $0x1090] ss:$8 sps:$4 sm:$0xff]   ;;  %v10619_v10 = vrot.slane %v37_v56, %v8855_v48 }
 0x209   :  { %5779 = vmatpush1.bf16.msra.mxu1 %v8191_v55  ;;  %v8271_v55 = vld [vmem:[%s11496_s1 + $0x1194] ss:$8 sps:$4 sm:$0xff]   ;;  %v8272_v17 = vld [vmem:[%s11496_s1 + $0x1080] ss:$8 sps:$4 sm:$0xff]   ;;  %v8318_v56 = vld [vmem:[%s11496_s1 + $0x1310] ss:$8 sps:$4 sm:$0xff]  }
 0x20a   :  { %5780 = vmatprep.subr.bf16.mxu1 %v8199_v11  ;;  %v5487_v24 = vpop.f32.mrf.mxu1  ;;  %v8274_v11 = vld [vmem:[%s11496_s1 + $0x1084] ss:$8 sps:$4 sm:$0xff]   ;;  %v10628_v51 = vrot.slane %v207_v9, %v8855_v48  ;;  %v8324_v9 = vld [vmem:[%s11496_s1 + $0x1300] ss:$8 sps:$4 sm:$0xff]  }
 0x20b   :  { %5740 = vmatpush1.bf16.msra.mxu0 %v8194_v50  ;;  %v8269_v50 = vld [vmem:[%s11496_s1 + $0x1190] ss:$8 sps:$4 sm:$0xff]   ;;  %v8275_v24 = vld [vmem:[%s11496_s1 + $0x1180] ss:$8 sps:$4 sm:$0xff]  }
 0x20c   :  { %5741 = vmatprep.subr.bf16.mxu0 %v8202_v15  ;;  %v8277_v15 = vld [vmem:[%s11496_s1 + $0x1184] ss:$8 sps:$4 sm:$0xff]  }
 0x20d   :  { %5781 = vmatpush1.bf16.msra.mxu1 %v8197_v20  ;;  %v222_v20 = vcombine.high %v10619_v10, %v10619_v10 }
 0x20e   :  { %5782 = vmatprep.subr.bf16.mxu1 %v8205_v22  ;;  %v8280_v22 = vld [vmem:[%s11496_s1 + $0x1274] ss:$8 sps:$4 sm:$0xff]  }
 0x20f   :  { %5742 = vmatpush1.bf16.msra.mxu0 %v8200_v25  ;;  %v223_v25 = vcombine.high %v10628_v51, %v10628_v51 }
 0x210   :  { %5743 = vmatprep.subr.bf16.mxu0 %v8208_v26  ;;  %v346_v26 = vpack.c.bf16 %v10404_v47, %v10404_v47  ;;  %v8282_v47 = vld [vmem:[%s11496_s1 + $0x1370] ss:$8 sps:$4 sm:$0xff]  }
 0x211   :  { %5783 = vmatpush1.bf16.msra.mxu1 %v8203_v27  ;;  %v8284_v27 = vld [vmem:[%s11496_s1 + $0x1374] ss:$8 sps:$4 sm:$0xff]  }
 0x212   :  { %5784 = vmatprep.subr.bf16.mxu1 %v8211_v28  ;;  %v8278_v28 = vld [vmem:[%s11496_s1 + $0x1270] ss:$8 sps:$4 sm:$0xff]  }
 0x213   :  { %5744 = vmatpush1.bf16.msra.mxu0 %v8206_v29  ;;  %v351_v29 = vpack.c.bf16 %v222_v20, %v222_v20  ;;  %v8341_v20 = vld [vmem:[%s11496_s1 + $0x12d4] ss:$8 sps:$4 sm:$0xff]  }
 0x214   :  { %5745 = vmatprep.subr.bf16.mxu0 %v8214_v30  ;;  %v348_v30 = vpack.c.bf16 %v10413_v16, %v10413_v16  ;;  %v8285_v16 = vld [vmem:[%s11496_s1 + $0x1260] ss:$8 sps:$4 sm:$0xff]  }
 0x215   :  { %5785 = vmatpush1.bf16.msra.mxu1 %v8209_v31  ;;  %v8287_v31 = vld [vmem:[%s11496_s1 + $0x1264] ss:$8 sps:$4 sm:$0xff]  }
 0x216   :  { %5786 = vmatprep.subr.bf16.mxu1 %v8217_v32  ;;  %v353_v32 = vpack.c.bf16 %v223_v25, %v223_v25  ;;  %v8339_v25 = vld [vmem:[%s11496_s1 + $0x12d0] ss:$8 sps:$4 sm:$0xff]  }
 0x217   :  { %5746 = vmatpush1.bf16.msra.mxu0 %v8212_v33 }
 0x218   :  { %5747 = vmatprep.subr.bf16.mxu0 %v8220_v52  ;;  %v8290_v52 = vld [vmem:[%s11496_s1 + $0x1364] ss:$8 sps:$4 sm:$0xff]  }
 0x219   :  { %5787 = vmatpush1.bf16.msra.mxu1 %v8215_v35 }
 0x21a   :  { %5788 = vmatprep.subr.bf16.mxu1 %v8223_v37 }
 0x21b   :  { %5748 = vmatpush1.bf16.msra.mxu0 %v8218_v38 }
 0x21c   :  { %5749 = vmatprep.subr.bf16.mxu0 %v8226_v53  ;;  %v8293_v53 = vld [vmem:[%s11496_s1 + $0x1254] ss:$8 sps:$4 sm:$0xff]  }
 0x21d   :  { %5789 = vmatpush1.bf16.msra.mxu1 %v8221_v21 }
 0x21e   :  { %5790 = vmatprep.subr.bf16.mxu1 %v8229_v41 }
 0x21f   :  { %5750 = vmatpush1.bf16.msra.mxu0 %v8224_v42 }
 0x220   :  { %5751 = vmatprep.subr.bf16.mxu0 %v8232_v44 }
 0x221   :  { %5791 = vmatpush1.bf16.msra.mxu1 %v8227_v45  ;;  %v8296_v45 = vld [vmem:[%s11496_s1 + $0x1354] ss:$8 sps:$4 sm:$0xff]  }
 0x222   :  { %5792 = vmatprep.subr.bf16.mxu1 %v8235_v13 }
 0x223   :  { %5752 = vmatpush2.bf16.msra.mxu0 %v8230_v46 }
 0x224   :  { %5753 = vmatprep.subr.bf16.mxu0 %v8238_v49  ;;  %v8299_v49 = vld [vmem:[%s11496_s1 + $0x1244] ss:$8 sps:$4 sm:$0xff]  }
 0x225   :  { %5793 = vmatpush2.bf16.msra.mxu1 %v8233_v18 }
 0x226   :  { %5794 = vmatprep.subr.bf16.mxu1 %v8241_v54  ;;  %v8294_v54 = vld [vmem:[%s11496_s1 + $0x1350] ss:$8 sps:$4 sm:$0xff]  }
 0x227   :  { %5754 = vmatpush2.bf16.msra.mxu0 %v8236_v34  ;;  %v8302_v34 = vld [vmem:[%s11496_s1 + $0x1344] ss:$8 sps:$4 sm:$0xff]  }
 0x228   :  { %5755 = vmatprep.subr.bf16.mxu0 %v8244_v39 }
 0x229   :  { %5795 = vmatpush2.bf16.msra.mxu1 %v8239_v58  ;;  %v8297_v58 = vld [vmem:[%s11496_s1 + $0x1240] ss:$8 sps:$4 sm:$0xff]  }
 0x22a   :  { %5796 = vmatprep.subr.bf16.mxu1 %v8247_v59  ;;  %v8305_v59 = vld [vmem:[%s11496_s1 + $0x1234] ss:$8 sps:$4 sm:$0xff]  }
 0x22b   :  { %5756 = vmatpush2.bf16.msra.mxu0 %v8242_v60  ;;  %v8300_v60 = vld [vmem:[%s11496_s1 + $0x1340] ss:$8 sps:$4 sm:$0xff]  }
 0x22c   :  { %5757 = vmatprep.subr.bf16.mxu0 %v8250_v61  ;;  %v8308_v61 = vld [vmem:[%s11496_s1 + $0x1334] ss:$8 sps:$4 sm:$0xff]  }
 0x22d   :  { %5797 = vmatpush2.bf16.msra.mxu1 %v8245_v63  ;;  %v8303_v63 = vld [vmem:[%s11496_s1 + $0x1230] ss:$8 sps:$4 sm:$0xff]  }
 0x22e   :  { %5798 = vmatprep.subr.bf16.mxu1 %v8253_v0  ;;  %v8311_v0 = vld [vmem:[%s11496_s1 + $0x1224] ss:$8 sps:$4 sm:$0xff]  }
 0x22f   :  { %5758 = vmatpush2.bf16.msra.mxu0 %v8248_v1  ;;  %v8306_v1 = vld [vmem:[%s11496_s1 + $0x1330] ss:$8 sps:$4 sm:$0xff]  }
 0x230   :  { %5759 = vmatprep.subr.bf16.mxu0 %v8256_v2  ;;  %v8314_v2 = vld [vmem:[%s11496_s1 + $0x1324] ss:$8 sps:$4 sm:$0xff]  }
 0x231   :  { %5799 = vmatpush2.bf16.msra.mxu1 %v8251_v3  ;;  %v8309_v3 = vld [vmem:[%s11496_s1 + $0x1220] ss:$8 sps:$4 sm:$0xff]  }
 0x232   :  { %5800 = vmatprep.subr.bf16.mxu1 %v8259_v14  ;;  %v8317_v14 = vld [vmem:[%s11496_s1 + $0x1214] ss:$8 sps:$4 sm:$0xff]  }
 0x233   :  { %5760 = vmatpush2.bf16.msra.mxu0 %v8254_v4  ;;  %v8312_v4 = vld [vmem:[%s11496_s1 + $0x1320] ss:$8 sps:$4 sm:$0xff]  }
 0x234   :  { %5761 = vmatprep.subr.bf16.mxu0 %v8262_v5  ;;  %v8320_v5 = vld [vmem:[%s11496_s1 + $0x1314] ss:$8 sps:$4 sm:$0xff]  }
 0x235   :  { %5801 = vmatpush2.bf16.msra.mxu1 %v8257_v36  ;;  %v8315_v36 = vld [vmem:[%s11496_s1 + $0x1210] ss:$8 sps:$4 sm:$0xff]  }
 0x236   :  { %5802 = vmatprep.subr.bf16.mxu1 %v8265_v19  ;;  %v8323_v19 = vld [vmem:[%s11496_s1 + $0x1204] ss:$8 sps:$4 sm:$0xff]  }
 0x237   :  { %5762 = vmatpush2.bf16.msra.mxu0 %v8260_v6  ;;  %v8326_v6 = vld [vmem:[%s11496_s1 + $0x1304] ss:$8 sps:$4 sm:$0xff]  }
 0x238   :  { %5763 = vmatprep.subr.bf16.mxu0 %v8268_v7  ;;  %v8321_v7 = vld [vmem:[%s11496_s1 + $0x1200] ss:$8 sps:$4 sm:$0xff]  }
 0x239   :  { %5803 = vmatpush2.bf16.msra.mxu1 %v8263_v8  ;;  %v8329_v8 = vld [vmem:[%s11496_s1 + $0x12f4] ss:$8 sps:$4 sm:$0xff]  }
 0x23a   :  { %5804 = vmatprep.subr.bf16.mxu1 %v8271_v55  ;;  %v8332_v55 = vld [vmem:[%s11496_s1 + $0x13f4] ss:$8 sps:$4 sm:$0xff]  }
 0x23b   :  { %5764 = vmatpush2.bf16.msra.mxu0 %v8266_v40  ;;  %v8327_v40 = vld [vmem:[%s11496_s1 + $0x12f0] ss:$8 sps:$4 sm:$0xff]  }
 0x23c   :  { %5765 = vmatprep.subr.bf16.mxu0 %v8274_v11  ;;  %v8335_v11 = vld [vmem:[%s11496_s1 + $0x12e4] ss:$8 sps:$4 sm:$0xff]  }
 0x23d   :  { %5805 = vmatpush2.bf16.msra.mxu1 %v8269_v50  ;;  %v8330_v50 = vld [vmem:[%s11496_s1 + $0x13f0] ss:$8 sps:$4 sm:$0xff]  }
 0x23e   :  { %5806 = vmatprep.subr.bf16.mxu1 %v8277_v15  ;;  %v8338_v15 = vld [vmem:[%s11496_s1 + $0x13e4] ss:$8 sps:$4 sm:$0xff]  }
 0x23f   :  { %5766 = vmatpush2.bf16.msra.mxu0 %v8272_v17  ;;  %v8333_v17 = vld [vmem:[%s11496_s1 + $0x12e0] ss:$8 sps:$4 sm:$0xff]  }
 0x240   :  { %5817 = vmatprep.subr.bf16.mxu0 %v8280_v22  ;;  %v8336_v22 = vld [vmem:[%s11496_s1 + $0x13e0] ss:$8 sps:$4 sm:$0xff]  }
 0x241   :  { %5807 = vmatpush2.bf16.msra.mxu1 %v8275_v24  ;;  %v8344_v24 = vld [vmem:[%s11496_s1 + $0x13d4] ss:$8 sps:$4 sm:$0xff]  }
 0x242   :  { %v5523_v33 = vpop.f32.mrf.mxu0  ;;  %5768 = vmatmul.mubr.bf16.vlgmr.msra.gmra.mxu0 %v346_v26  ;;  %5858 = vmatprep.subr.bf16.mxu1 %v8284_v27  ;;  %v8347_v26 = vld [vmem:[%s11496_s1 + $0x12c4] ss:$8 sps:$4 sm:$0xff]   ;;  %v8342_v27 = vld [vmem:[%s11496_s1 + $0x13d0] ss:$8 sps:$4 sm:$0xff]  }
 0x243   :  { %v5524_v35 = vadd.f32 %v5523_v33, %v10458_v23  ;;  %5818 = vmatpush1.bf16.msra.mxu0 %v8278_v28  ;;  %5849 = vmatprep.mubr.bf16.mxu0 %v351_v29  ;;  %v8288_v23 = vld [vmem:[%s11496_s1 + $0x1360] ss:$8 sps:$4 sm:$0xff]   ;;  %v8350_v28 = vld [vmem:[%s11496_s1 + $0x13c4] ss:$8 sps:$4 sm:$0xff]  }
 0x244   :  { %v5525_v37 = vpop.f32.mrf.mxu0  ;;  %v5564_v38 = vpop.f32.mrf.mxu1  ;;  %5809 = vmatmul.mubr.bf16.vlgmr.msra.gmra.mxu1 %v348_v30  ;;  %5819 = vmatprep.subr.bf16.mxu0 %v8287_v31  ;;  %v8345_v29 = vld [vmem:[%s11496_s1 + $0x12c0] ss:$8 sps:$4 sm:$0xff]   ;;  %v8353_v30 = vld [vmem:[%s11496_s1 + $0x12b4] ss:$8 sps:$4 sm:$0xff]   ;;  %v8359_v33 = vld [vmem:[%s11496_s1 + $0x12a4] ss:$8 sps:$4 sm:$0xff]  }
 0x245   :  { %v5526_v21 = vadd.f32 %v5525_v37, %v10466_v12  ;;  %v10673_v41 = vadd.f32 %v5564_v38, %v5524_v35  ;;  %5859 = vmatpush1.bf16.msra.mxu1 %v8282_v47  ;;  %5890 = vmatprep.mubr.bf16.mxu1 %v353_v32  ;;  %v8291_v12 = vld [vmem:[%s11496_s1 + $0x1250] ss:$8 sps:$4 sm:$0xff]   ;;  %v8348_v31 = vld [vmem:[%s11496_s1 + $0x13c0] ss:$8 sps:$4 sm:$0xff]   ;;  %v8356_v47 = vld [vmem:[%s11496_s1 + $0x13b4] ss:$8 sps:$4 sm:$0xff]  }
 0x246   :  { %v5527_v42 = vpop.f32.mrf.mxu0  ;;  %v5566_v44 = vpop.f32.mrf.mxu1  ;;  %5860 = vmatprep.subr.bf16.mxu1 %v8290_v52  ;;  %v8351_v32 = vld [vmem:[%s11496_s1 + $0x12b0] ss:$8 sps:$4 sm:$0xff]   ;;  %v8362_v35 = vld [vmem:[%s11496_s1 + $0x13a4] ss:$8 sps:$4 sm:$0xff]   ;;  %v8357_v37 = vld [vmem:[%s11496_s1 + $0x12a0] ss:$8 sps:$4 sm:$0xff]  }
 0x247   :  { %v10681_v13 = vadd.f32 %v5566_v44, %v5526_v21  ;;  %5820 = vmatpush1.bf16.msra.mxu0 %v8285_v16  ;;  %v8354_v52 = vld [vmem:[%s11496_s1 + $0x13b0] ss:$8 sps:$4 sm:$0xff]   ;;  %v8365_v38 = vld [vmem:[%s11496_s1 + $0x1294] ss:$8 sps:$4 sm:$0xff]  }
 0x248   :  { %v5528_v46 = vpop.f32.mrf.mxu0  ;;  %5821 = vmatprep.subr.bf16.mxu0 %v8293_v53  ;;  %v5568_v18 = vpop.f32.mrf.mxu1  ;;  %v38_v16 = vld [vmem:[%s11495_s0 + $0x50] sm:$0xff]  ;;  %v8360_v53 = vld [vmem:[%s11496_s1 + $0x13a0] ss:$8 sps:$4 sm:$0xff]  }
 0x249   :  { %5861 = vmatpush1.bf16.msra.mxu1 %v8288_v23  ;;  %v224_v21 = vcombine.high %v38_v16, %v38_v16  ;;  %v8368_v23 = vld [vmem:[%s11496_s1 + $0x1394] ss:$8 sps:$4 sm:$0xff]   ;;  %v8363_v42 = vld [vmem:[%s11496_s1 + $0x1290] ss:$8 sps:$4 sm:$0xff]   ;;  %v10834_v44 = vrot.slane %v38_v16, %v8855_v48  ;;  %v8369_v18 = vld [vmem:[%s11496_s1 + $0x1280] ss:$8 sps:$4 sm:$0xff]  }
 0x24a   :  { %5862 = vmatprep.subr.bf16.mxu1 %v8296_v45  ;;  %v5569_v39 = vpop.f32.mrf.mxu1  ;;  %v8371_v45 = vld [vmem:[%s11496_s1 + $0x1284] ss:$8 sps:$4 sm:$0xff]   ;;  %v8415_v16 = vld [vmem:[%s11496_s1 + $0x1510] ss:$8 sps:$4 sm:$0xff]  }
 0x24b   :  { %5822 = vmatpush1.bf16.msra.mxu0 %v8291_v12  ;;  %v8366_v12 = vld [vmem:[%s11496_s1 + $0x1390] ss:$8 sps:$4 sm:$0xff]   ;;  %v10843_v46 = vrot.slane %v224_v21, %v8855_v48  ;;  %v8372_v39 = vld [vmem:[%s11496_s1 + $0x1380] ss:$8 sps:$4 sm:$0xff]  }
 0x24c   :  { %5823 = vmatprep.subr.bf16.mxu0 %v8299_v49  ;;  %v8374_v49 = vld [vmem:[%s11496_s1 + $0x1384] ss:$8 sps:$4 sm:$0xff]   ;;  %v8421_v21 = vld [vmem:[%s11496_s1 + $0x1500] ss:$8 sps:$4 sm:$0xff]  }
 0x24d   :  { %5863 = vmatpush1.bf16.msra.mxu1 %v8294_v54  ;;  %v239_v54 = vcombine.high %v10834_v44, %v10834_v44 }
 0x24e   :  { %5864 = vmatprep.subr.bf16.mxu1 %v8302_v34  ;;  %v8377_v34 = vld [vmem:[%s11496_s1 + $0x1474] ss:$8 sps:$4 sm:$0xff]  }
 0x24f   :  { %5824 = vmatpush1.bf16.msra.mxu0 %v8297_v58  ;;  %v240_v58 = vcombine.high %v10843_v46, %v10843_v46 }
 0x250   :  { %5825 = vmatprep.subr.bf16.mxu0 %v8305_v59  ;;  %v350_v59 = vpack.c.bf16 %v10619_v10, %v10619_v10  ;;  %v8379_v10 = vld [vmem:[%s11496_s1 + $0x1570] ss:$8 sps:$4 sm:$0xff]  }
 0x251   :  { %5865 = vmatpush1.bf16.msra.mxu1 %v8300_v60  ;;  %v8381_v60 = vld [vmem:[%s11496_s1 + $0x1574] ss:$8 sps:$4 sm:$0xff]  }
 0x252   :  { %5866 = vmatprep.subr.bf16.mxu1 %v8308_v61  ;;  %v8375_v61 = vld [vmem:[%s11496_s1 + $0x1470] ss:$8 sps:$4 sm:$0xff]  }
 0x253   :  { %5826 = vmatpush1.bf16.msra.mxu0 %v8303_v63  ;;  %v355_v63 = vpack.c.bf16 %v239_v54, %v239_v54  ;;  %v8438_v54 = vld [vmem:[%s11496_s1 + $0x14d4] ss:$8 sps:$4 sm:$0xff]  }
 0x254   :  { %5827 = vmatprep.subr.bf16.mxu0 %v8311_v0  ;;  %v352_v0 = vpack.c.bf16 %v10628_v51, %v10628_v51  ;;  %v8382_v51 = vld [vmem:[%s11496_s1 + $0x1460] ss:$8 sps:$4 sm:$0xff]  }
 0x255   :  { %5867 = vmatpush1.bf16.msra.mxu1 %v8306_v1  ;;  %v8384_v1 = vld [vmem:[%s11496_s1 + $0x1464] ss:$8 sps:$4 sm:$0xff]  }
 0x256   :  { %5868 = vmatprep.subr.bf16.mxu1 %v8314_v2  ;;  %v357_v2 = vpack.c.bf16 %v240_v58, %v240_v58  ;;  %v8436_v58 = vld [vmem:[%s11496_s1 + $0x14d0] ss:$8 sps:$4 sm:$0xff]  }
 0x257   :  { %5828 = vmatpush1.bf16.msra.mxu0 %v8309_v3 }
 0x258   :  { %5829 = vmatprep.subr.bf16.mxu0 %v8317_v14  ;;  %v8387_v14 = vld [vmem:[%s11496_s1 + $0x1564] ss:$8 sps:$4 sm:$0xff]  }
 0x259   :  { %5869 = vmatpush1.bf16.msra.mxu1 %v8312_v4 }
 0x25a   :  { %5870 = vmatprep.subr.bf16.mxu1 %v8320_v5 }
 0x25b   :  { %5830 = vmatpush1.bf16.msra.mxu0 %v8315_v36 }
 0x25c   :  { %5831 = vmatprep.subr.bf16.mxu0 %v8323_v19  ;;  %v8390_v19 = vld [vmem:[%s11496_s1 + $0x1454] ss:$8 sps:$4 sm:$0xff]  }
 0x25d   :  { %5871 = vmatpush1.bf16.msra.mxu1 %v8318_v56 }
 0x25e   :  { %5872 = vmatprep.subr.bf16.mxu1 %v8326_v6 }
 0x25f   :  { %5832 = vmatpush1.bf16.msra.mxu0 %v8321_v7 }
 0x260   :  { %5833 = vmatprep.subr.bf16.mxu0 %v8329_v8 }
 0x261   :  { %5873 = vmatpush1.bf16.msra.mxu1 %v8324_v9  ;;  %v8393_v9 = vld [vmem:[%s11496_s1 + $0x1554] ss:$8 sps:$4 sm:$0xff]  }
 0x262   :  { %5874 = vmatprep.subr.bf16.mxu1 %v8332_v55 }
 0x263   :  { %5834 = vmatpush2.bf16.msra.mxu0 %v8327_v40 }
 0x264   :  { %5835 = vmatprep.subr.bf16.mxu0 %v8335_v11  ;;  %v8396_v11 = vld [vmem:[%s11496_s1 + $0x1444] ss:$8 sps:$4 sm:$0xff]  }
 0x265   :  { %5875 = vmatpush2.bf16.msra.mxu1 %v8330_v50 }
 0x266   :  { %5876 = vmatprep.subr.bf16.mxu1 %v8338_v15  ;;  %v8391_v15 = vld [vmem:[%s11496_s1 + $0x1550] ss:$8 sps:$4 sm:$0xff]  }
 0x267   :  { %5836 = vmatpush2.bf16.msra.mxu0 %v8333_v17  ;;  %v8399_v17 = vld [vmem:[%s11496_s1 + $0x1544] ss:$8 sps:$4 sm:$0xff]  }
 0x268   :  { %5837 = vmatprep.subr.bf16.mxu0 %v8341_v20 }
 0x269   :  { %5877 = vmatpush2.bf16.msra.mxu1 %v8336_v22  ;;  %v8394_v22 = vld [vmem:[%s11496_s1 + $0x1440] ss:$8 sps:$4 sm:$0xff]  }
 0x26a   :  { %5878 = vmatprep.subr.bf16.mxu1 %v8344_v24  ;;  %v8402_v24 = vld [vmem:[%s11496_s1 + $0x1434] ss:$8 sps:$4 sm:$0xff]  }
 0x26b   :  { %5838 = vmatpush2.bf16.msra.mxu0 %v8339_v25  ;;  %v8397_v25 = vld [vmem:[%s11496_s1 + $0x1540] ss:$8 sps:$4 sm:$0xff]  }
 0x26c   :  { %5839 = vmatprep.subr.bf16.mxu0 %v8347_v26  ;;  %v8405_v26 = vld [vmem:[%s11496_s1 + $0x1534] ss:$8 sps:$4 sm:$0xff]  }
 0x26d   :  { %5879 = vmatpush2.bf16.msra.mxu1 %v8342_v27  ;;  %v8400_v27 = vld [vmem:[%s11496_s1 + $0x1430] ss:$8 sps:$4 sm:$0xff]  }
 0x26e   :  { %5880 = vmatprep.subr.bf16.mxu1 %v8350_v28  ;;  %v8408_v28 = vld [vmem:[%s11496_s1 + $0x1424] ss:$8 sps:$4 sm:$0xff]  }
 0x26f   :  { %5840 = vmatpush2.bf16.msra.mxu0 %v8345_v29  ;;  %v8403_v29 = vld [vmem:[%s11496_s1 + $0x1530] ss:$8 sps:$4 sm:$0xff]  }
 0x270   :  { %5841 = vmatprep.subr.bf16.mxu0 %v8353_v30  ;;  %v8411_v30 = vld [vmem:[%s11496_s1 + $0x1524] ss:$8 sps:$4 sm:$0xff]  }
 0x271   :  { %5881 = vmatpush2.bf16.msra.mxu1 %v8348_v31  ;;  %v8406_v31 = vld [vmem:[%s11496_s1 + $0x1420] ss:$8 sps:$4 sm:$0xff]  }
 0x272   :  { %5882 = vmatprep.subr.bf16.mxu1 %v8356_v47  ;;  %v8414_v47 = vld [vmem:[%s11496_s1 + $0x1414] ss:$8 sps:$4 sm:$0xff]  }
 0x273   :  { %5842 = vmatpush2.bf16.msra.mxu0 %v8351_v32  ;;  %v8409_v32 = vld [vmem:[%s11496_s1 + $0x1520] ss:$8 sps:$4 sm:$0xff]  }
 0x274   :  { %5843 = vmatprep.subr.bf16.mxu0 %v8359_v33  ;;  %v8417_v33 = vld [vmem:[%s11496_s1 + $0x1514] ss:$8 sps:$4 sm:$0xff]  }
 0x275   :  { %5883 = vmatpush2.bf16.msra.mxu1 %v8354_v52  ;;  %v8412_v52 = vld [vmem:[%s11496_s1 + $0x1410] ss:$8 sps:$4 sm:$0xff]  }
 0x276   :  { %5884 = vmatprep.subr.bf16.mxu1 %v8362_v35  ;;  %v8420_v35 = vld [vmem:[%s11496_s1 + $0x1404] ss:$8 sps:$4 sm:$0xff]  }
 0x277   :  { %5844 = vmatpush2.bf16.msra.mxu0 %v8357_v37  ;;  %v8423_v37 = vld [vmem:[%s11496_s1 + $0x1504] ss:$8 sps:$4 sm:$0xff]  }
 0x278   :  { %5845 = vmatprep.subr.bf16.mxu0 %v8365_v38  ;;  %v8418_v38 = vld [vmem:[%s11496_s1 + $0x1400] ss:$8 sps:$4 sm:$0xff]  }
 0x279   :  { %5885 = vmatpush2.bf16.msra.mxu1 %v8360_v53  ;;  %v8426_v53 = vld [vmem:[%s11496_s1 + $0x14f4] ss:$8 sps:$4 sm:$0xff]  }
 0x27a   :  { %5886 = vmatprep.subr.bf16.mxu1 %v8368_v23  ;;  %v8429_v23 = vld [vmem:[%s11496_s1 + $0x15f4] ss:$8 sps:$4 sm:$0xff]  }
 0x27b   :  { %5846 = vmatpush2.bf16.msra.mxu0 %v8363_v42  ;;  %v8424_v42 = vld [vmem:[%s11496_s1 + $0x14f0] ss:$8 sps:$4 sm:$0xff]  }
 0x27c   :  { %5847 = vmatprep.subr.bf16.mxu0 %v8371_v45  ;;  %v8432_v45 = vld [vmem:[%s11496_s1 + $0x14e4] ss:$8 sps:$4 sm:$0xff]  }
 0x27d   :  { %5887 = vmatpush2.bf16.msra.mxu1 %v8366_v12  ;;  %v8427_v12 = vld [vmem:[%s11496_s1 + $0x15f0] ss:$8 sps:$4 sm:$0xff]  }
 0x27e   :  { %5888 = vmatprep.subr.bf16.mxu1 %v8374_v49  ;;  %v8435_v49 = vld [vmem:[%s11496_s1 + $0x15e4] ss:$8 sps:$4 sm:$0xff]  }
 0x27f   :  { %5848 = vmatpush2.bf16.msra.mxu0 %v8369_v18  ;;  %v8430_v18 = vld [vmem:[%s11496_s1 + $0x14e0] ss:$8 sps:$4 sm:$0xff]  }
 0x280   :  { %5899 = vmatprep.subr.bf16.mxu0 %v8377_v34  ;;  %v8433_v34 = vld [vmem:[%s11496_s1 + $0x15e0] ss:$8 sps:$4 sm:$0xff]  }
 0x281   :  { %5889 = vmatpush2.bf16.msra.mxu1 %v8372_v39  ;;  %v8441_v39 = vld [vmem:[%s11496_s1 + $0x15d4] ss:$8 sps:$4 sm:$0xff]  }
 0x282   :  { %v5605_v3 = vpop.f32.mrf.mxu0  ;;  %5850 = vmatmul.mubr.bf16.vlgmr.msra.gmra.mxu0 %v350_v59  ;;  %5940 = vmatprep.subr.bf16.mxu1 %v8381_v60  ;;  %v8444_v59 = vld [vmem:[%s11496_s1 + $0x14c4] ss:$8 sps:$4 sm:$0xff]   ;;  %v8439_v60 = vld [vmem:[%s11496_s1 + $0x15d0] ss:$8 sps:$4 sm:$0xff]  }
 0x283   :  { %v5606_v4 = vadd.f32 %v5605_v3, %v10673_v41  ;;  %5900 = vmatpush1.bf16.msra.mxu0 %v8375_v61  ;;  %5931 = vmatprep.mubr.bf16.mxu0 %v355_v63  ;;  %v8385_v41 = vld [vmem:[%s11496_s1 + $0x1560] ss:$8 sps:$4 sm:$0xff]   ;;  %v8447_v61 = vld [vmem:[%s11496_s1 + $0x15c4] ss:$8 sps:$4 sm:$0xff]  }
 0x284   :  { %v5607_v5 = vpop.f32.mrf.mxu0  ;;  %v5646_v36 = vpop.f32.mrf.mxu1  ;;  %5891 = vmatmul.mubr.bf16.vlgmr.msra.gmra.mxu1 %v352_v0  ;;  %5901 = vmatprep.subr.bf16.mxu0 %v8384_v1  ;;  %v8442_v63 = vld [vmem:[%s11496_s1 + $0x14c0] ss:$8 sps:$4 sm:$0xff]   ;;  %v8450_v0 = vld [vmem:[%s11496_s1 + $0x14b4] ss:$8 sps:$4 sm:$0xff]   ;;  %v8456_v3 = vld [vmem:[%s11496_s1 + $0x14a4] ss:$8 sps:$4 sm:$0xff]  }
 0x285   :  { %v5608_v56 = vadd.f32 %v5607_v5, %v10681_v13  ;;  %v10888_v6 = vadd.f32 %v5646_v36, %v5606_v4  ;;  %5941 = vmatpush1.bf16.msra.mxu1 %v8379_v10  ;;  %5972 = vmatprep.mubr.bf16.mxu1 %v357_v2  ;;  %v8388_v13 = vld [vmem:[%s11496_s1 + $0x1450] ss:$8 sps:$4 sm:$0xff]   ;;  %v8445_v1 = vld [vmem:[%s11496_s1 + $0x15c0] ss:$8 sps:$4 sm:$0xff]   ;;  %v8453_v10 = vld [vmem:[%s11496_s1 + $0x15b4] ss:$8 sps:$4 sm:$0xff]  }
 0x286   :  { %v5609_v7 = vpop.f32.mrf.mxu0  ;;  %v5648_v8 = vpop.f32.mrf.mxu1  ;;  %5942 = vmatprep.subr.bf16.mxu1 %v8387_v14  ;;  %v8448_v2 = vld [vmem:[%s11496_s1 + $0x14b0] ss:$8 sps:$4 sm:$0xff]   ;;  %v8459_v4 = vld [vmem:[%s11496_s1 + $0x15a4] ss:$8 sps:$4 sm:$0xff]   ;;  %v8454_v5 = vld [vmem:[%s11496_s1 + $0x14a0] ss:$8 sps:$4 sm:$0xff]  }
 0x287   :  { %v10896_v55 = vadd.f32 %v5648_v8, %v5608_v56  ;;  %5902 = vmatpush1.bf16.msra.mxu0 %v8382_v51  ;;  %v8451_v14 = vld [vmem:[%s11496_s1 + $0x15b0] ss:$8 sps:$4 sm:$0xff]   ;;  %v8462_v36 = vld [vmem:[%s11496_s1 + $0x1494] ss:$8 sps:$4 sm:$0xff]  }
 0x288   :  { %v5610_v40 = vpop.f32.mrf.mxu0  ;;  %5903 = vmatprep.subr.bf16.mxu0 %v8390_v19  ;;  %v5650_v50 = vpop.f32.mrf.mxu1  ;;  %v39_v51 = vld [vmem:[%s11495_s0 + $0x58] sm:$0xff]  ;;  %v8457_v19 = vld [vmem:[%s11496_s1 + $0x15a0] ss:$8 sps:$4 sm:$0xff]  }
 0x289   :  { %5943 = vmatpush1.bf16.msra.mxu1 %v8385_v41  ;;  %v241_v56 = vcombine.high %v39_v51, %v39_v51  ;;  %v8465_v41 = vld [vmem:[%s11496_s1 + $0x1594] ss:$8 sps:$4 sm:$0xff]   ;;  %v8460_v7 = vld [vmem:[%s11496_s1 + $0x1490] ss:$8 sps:$4 sm:$0xff]   ;;  %v11049_v8 = vrot.slane %v39_v51, %v8855_v48  ;;  %v8466_v50 = vld [vmem:[%s11496_s1 + $0x1480] ss:$8 sps:$4 sm:$0xff]  }
 0x28a   :  { %5944 = vmatprep.subr.bf16.mxu1 %v8393_v9  ;;  %v5651_v20 = vpop.f32.mrf.mxu1  ;;  %v8468_v9 = vld [vmem:[%s11496_s1 + $0x1484] ss:$8 sps:$4 sm:$0xff]  }
 0x28b   :  { %5904 = vmatpush1.bf16.msra.mxu0 %v8388_v13  ;;  %v8463_v13 = vld [vmem:[%s11496_s1 + $0x1590] ss:$8 sps:$4 sm:$0xff]   ;;  %v11058_v40 = vrot.slane %v241_v56, %v8855_v48  ;;  %v8469_v48 = vld [vmem:[%s11496_s1 + $0x1580] ss:$8 sps:$4 sm:$0xff]   ;;  %v8520_v51 = vld [vmem:[%s11496_s1 + $0x1704] ss:$8 sps:$4 sm:$0xff]  }
 0x28c   :  { %5905 = vmatprep.subr.bf16.mxu0 %v8396_v11  ;;  %v8471_v11 = vld [vmem:[%s11496_s1 + $0x1584] ss:$8 sps:$4 sm:$0xff]   ;;  %v8526_v56 = vld [vmem:[%s11496_s1 + $0x17f4] ss:$8 sps:$4 sm:$0xff]  }
 0x28d   :  { %5945 = vmatpush1.bf16.msra.mxu1 %v8391_v15  ;;  %v256_v15 = vcombine.high %v11049_v8, %v11049_v8  ;;  %v257_v20 = vcombine.high %v11058_v40, %v11058_v40 }
 0x28e   :  { %5946 = vmatprep.subr.bf16.mxu1 %v8399_v17  ;;  %v8474_v17 = vld [vmem:[%s11496_s1 + $0x1674] ss:$8 sps:$4 sm:$0xff]  }
 0x28f   :  { %5906 = vmatpush1.bf16.msra.mxu0 %v8394_v22  ;;  %v354_v22 = vpack.c.bf16 %v10834_v44, %v10834_v44  ;;  %v8476_v44 = vld [vmem:[%s11496_s1 + $0x1770] ss:$8 sps:$4 sm:$0xff]  }
 0x290   :  { %5907 = vmatprep.subr.bf16.mxu0 %v8402_v24  ;;  %v8478_v24 = vld [vmem:[%s11496_s1 + $0x1774] ss:$8 sps:$4 sm:$0xff]  }
 0x291   :  { %5947 = vmatpush1.bf16.msra.mxu1 %v8397_v25  ;;  %v8472_v25 = vld [vmem:[%s11496_s1 + $0x1670] ss:$8 sps:$4 sm:$0xff]  }
 0x292   :  { %5948 = vmatprep.subr.bf16.mxu1 %v8405_v26  ;;  %v359_v26 = vpack.c.bf16 %v256_v15, %v256_v15  ;;  %v8530_v15 = vld [vmem:[%s11496_s1 + $0x17e0] ss:$8 sps:$4 sm:$0xff]  }
 0x293   :  { %5908 = vmatpush1.bf16.msra.mxu0 %v8400_v27  ;;  %v356_v27 = vpack.c.bf16 %v10843_v46, %v10843_v46  ;;  %v8479_v46 = vld [vmem:[%s11496_s1 + $0x1660] ss:$8 sps:$4 sm:$0xff]  }
 0x294   :  { %5909 = vmatprep.subr.bf16.mxu0 %v8408_v28  ;;  %v8481_v28 = vld [vmem:[%s11496_s1 + $0x1664] ss:$8 sps:$4 sm:$0xff]  }
 0x295   :  { %5949 = vmatpush1.bf16.msra.mxu1 %v8403_v29  ;;  %v361_v29 = vpack.c.bf16 %v257_v20, %v257_v20  ;;  %v8541_v20 = vld [vmem:[%s11496_s1 + $0x16c4] ss:$8 sps:$4 sm:$0xff]  }
 0x296   :  { %5950 = vmatprep.subr.bf16.mxu1 %v8411_v30 }
 0x297   :  { %5910 = vmatpush1.bf16.msra.mxu0 %v8406_v31  ;;  %v8484_v31 = vld [vmem:[%s11496_s1 + $0x1764] ss:$8 sps:$4 sm:$0xff]  }
 0x298   :  { %5911 = vmatprep.subr.bf16.mxu0 %v8414_v47 }
 0x299   :  { %5951 = vmatpush1.bf16.msra.mxu1 %v8409_v32 }
 0x29a   :  { %5952 = vmatprep.subr.bf16.mxu1 %v8417_v33 }
 0x29b   :  { %5912 = vmatpush1.bf16.msra.mxu0 %v8412_v52  ;;  %v8487_v52 = vld [vmem:[%s11496_s1 + $0x1654] ss:$8 sps:$4 sm:$0xff]  }
 0x29c   :  { %5913 = vmatprep.subr.bf16.mxu0 %v8420_v35 }
 0x29d   :  { %5953 = vmatpush1.bf16.msra.mxu1 %v8415_v16 }
 0x29e   :  { %5954 = vmatprep.subr.bf16.mxu1 %v8423_v37 }
 0x29f   :  { %5914 = vmatpush1.bf16.msra.mxu0 %v8418_v38 }
 0x2a0   :  { %5915 = vmatprep.subr.bf16.mxu0 %v8426_v53  ;;  %v8490_v53 = vld [vmem:[%s11496_s1 + $0x1754] ss:$8 sps:$4 sm:$0xff]  }
 0x2a1   :  { %5955 = vmatpush1.bf16.msra.mxu1 %v8421_v21 }
 0x2a2   :  { %5956 = vmatprep.subr.bf16.mxu1 %v8429_v23 }
 0x2a3   :  { %5916 = vmatpush2.bf16.msra.mxu0 %v8424_v42  ;;  %v8493_v42 = vld [vmem:[%s11496_s1 + $0x1644] ss:$8 sps:$4 sm:$0xff]  }
 0x2a4   :  { %5917 = vmatprep.subr.bf16.mxu0 %v8432_v45 }
 0x2a5   :  { %5957 = vmatpush2.bf16.msra.mxu1 %v8427_v12  ;;  %v8488_v12 = vld [vmem:[%s11496_s1 + $0x1750] ss:$8 sps:$4 sm:$0xff]  }
 0x2a6   :  { %5958 = vmatprep.subr.bf16.mxu1 %v8435_v49  ;;  %v8496_v49 = vld [vmem:[%s11496_s1 + $0x1744] ss:$8 sps:$4 sm:$0xff]  }
 0x2a7   :  { %5918 = vmatpush2.bf16.msra.mxu0 %v8430_v18 }
 0x2a8   :  { %5919 = vmatprep.subr.bf16.mxu0 %v8438_v54  ;;  %v8491_v54 = vld [vmem:[%s11496_s1 + $0x1640] ss:$8 sps:$4 sm:$0xff]  }
 0x2a9   :  { %5959 = vmatpush2.bf16.msra.mxu1 %v8433_v34  ;;  %v8499_v34 = vld [vmem:[%s11496_s1 + $0x1634] ss:$8 sps:$4 sm:$0xff]  }
 0x2aa   :  { %5960 = vmatprep.subr.bf16.mxu1 %v8441_v39  ;;  %v8494_v39 = vld [vmem:[%s11496_s1 + $0x1740] ss:$8 sps:$4 sm:$0xff]  }
 0x2ab   :  { %5920 = vmatpush2.bf16.msra.mxu0 %v8436_v58  ;;  %v8502_v58 = vld [vmem:[%s11496_s1 + $0x1734] ss:$8 sps:$4 sm:$0xff]  }
 0x2ac   :  { %5921 = vmatprep.subr.bf16.mxu0 %v8444_v59  ;;  %v8497_v59 = vld [vmem:[%s11496_s1 + $0x1630] ss:$8 sps:$4 sm:$0xff]  }
 0x2ad   :  { %5961 = vmatpush2.bf16.msra.mxu1 %v8439_v60  ;;  %v8505_v60 = vld [vmem:[%s11496_s1 + $0x1624] ss:$8 sps:$4 sm:$0xff]  }
 0x2ae   :  { %5962 = vmatprep.subr.bf16.mxu1 %v8447_v61  ;;  %v8500_v61 = vld [vmem:[%s11496_s1 + $0x1730] ss:$8 sps:$4 sm:$0xff]  }
 0x2af   :  { %5922 = vmatpush2.bf16.msra.mxu0 %v8442_v63  ;;  %v8508_v63 = vld [vmem:[%s11496_s1 + $0x1724] ss:$8 sps:$4 sm:$0xff]  }
 0x2b0   :  { %5923 = vmatprep.subr.bf16.mxu0 %v8450_v0  ;;  %v8503_v0 = vld [vmem:[%s11496_s1 + $0x1620] ss:$8 sps:$4 sm:$0xff]  }
 0x2b1   :  { %5963 = vmatpush2.bf16.msra.mxu1 %v8445_v1  ;;  %v8511_v1 = vld [vmem:[%s11496_s1 + $0x1614] ss:$8 sps:$4 sm:$0xff]  }
 0x2b2   :  { %5964 = vmatprep.subr.bf16.mxu1 %v8453_v10  ;;  %v8506_v10 = vld [vmem:[%s11496_s1 + $0x1720] ss:$8 sps:$4 sm:$0xff]  }
 0x2b3   :  { %5924 = vmatpush2.bf16.msra.mxu0 %v8448_v2  ;;  %v8514_v2 = vld [vmem:[%s11496_s1 + $0x1714] ss:$8 sps:$4 sm:$0xff]  }
 0x2b4   :  { %5925 = vmatprep.subr.bf16.mxu0 %v8456_v3  ;;  %v8509_v3 = vld [vmem:[%s11496_s1 + $0x1610] ss:$8 sps:$4 sm:$0xff]  }
 0x2b5   :  { %5965 = vmatpush2.bf16.msra.mxu1 %v8451_v14  ;;  %v8517_v14 = vld [vmem:[%s11496_s1 + $0x1604] ss:$8 sps:$4 sm:$0xff]  }
 0x2b6   :  { %5966 = vmatprep.subr.bf16.mxu1 %v8459_v4  ;;  %v8512_v4 = vld [vmem:[%s11496_s1 + $0x1710] ss:$8 sps:$4 sm:$0xff]  }
 0x2b7   :  { %5926 = vmatpush2.bf16.msra.mxu0 %v8454_v5  ;;  %v8515_v5 = vld [vmem:[%s11496_s1 + $0x1600] ss:$8 sps:$4 sm:$0xff]  }
 0x2b8   :  { %5927 = vmatprep.subr.bf16.mxu0 %v8462_v36  ;;  %v8523_v36 = vld [vmem:[%s11496_s1 + $0x16f4] ss:$8 sps:$4 sm:$0xff]  }
 0x2b9   :  { %5967 = vmatpush2.bf16.msra.mxu1 %v8457_v19  ;;  %v8518_v19 = vld [vmem:[%s11496_s1 + $0x1700] ss:$8 sps:$4 sm:$0xff]  }
 0x2ba   :  { %5968 = vmatprep.subr.bf16.mxu1 %v8465_v41  ;;  %v8521_v41 = vld [vmem:[%s11496_s1 + $0x16f0] ss:$8 sps:$4 sm:$0xff]  }
 0x2bb   :  { %5928 = vmatpush2.bf16.msra.mxu0 %v8460_v7  ;;  %v8529_v7 = vld [vmem:[%s11496_s1 + $0x16e4] ss:$8 sps:$4 sm:$0xff]  }
 0x2bc   :  { %5929 = vmatprep.subr.bf16.mxu0 %v8468_v9  ;;  %v8524_v9 = vld [vmem:[%s11496_s1 + $0x17f0] ss:$8 sps:$4 sm:$0xff]  }
 0x2bd   :  { %5969 = vmatpush2.bf16.msra.mxu1 %v8463_v13  ;;  %v8532_v13 = vld [vmem:[%s11496_s1 + $0x17e4] ss:$8 sps:$4 sm:$0xff]  }
 0x2be   :  { %5970 = vmatprep.subr.bf16.mxu1 %v8471_v11  ;;  %v8527_v11 = vld [vmem:[%s11496_s1 + $0x16e0] ss:$8 sps:$4 sm:$0xff]  }
 0x2bf   :  { %5930 = vmatpush2.bf16.msra.mxu0 %v8466_v50  ;;  %v8535_v50 = vld [vmem:[%s11496_s1 + $0x16d4] ss:$8 sps:$4 sm:$0xff]  }
 0x2c0   :  { %5981 = vmatprep.subr.bf16.mxu0 %v8474_v17  ;;  %v8538_v17 = vld [vmem:[%s11496_s1 + $0x17d4] ss:$8 sps:$4 sm:$0xff]  }
 0x2c1   :  { %5971 = vmatpush2.bf16.msra.mxu1 %v8469_v48  ;;  %v8533_v48 = vld [vmem:[%s11496_s1 + $0x16d0] ss:$8 sps:$4 sm:$0xff]  }
 0x2c2   :  { %v5687_v30 = vpop.f32.mrf.mxu0  ;;  %5932 = vmatmul.mubr.bf16.vlgmr.msra.gmra.mxu0 %v354_v22  ;;  %6022 = vmatprep.subr.bf16.mxu1 %v8478_v24  ;;  %v8536_v22 = vld [vmem:[%s11496_s1 + $0x17d0] ss:$8 sps:$4 sm:$0xff]   ;;  %v8544_v24 = vld [vmem:[%s11496_s1 + $0x17c4] ss:$8 sps:$4 sm:$0xff]  }
 0x2c3   :  { %v5688_v47 = vadd.f32 %v5687_v30, %v10888_v6  ;;  %5982 = vmatpush1.bf16.msra.mxu0 %v8472_v25  ;;  %6013 = vmatprep.mubr.bf16.mxu0 %v359_v26  ;;  %v8482_v6 = vld [vmem:[%s11496_s1 + $0x1760] ss:$8 sps:$4 sm:$0xff]   ;;  %v8547_v26 = vld [vmem:[%s11496_s1 + $0x16b4] ss:$8 sps:$4 sm:$0xff]   ;;  %v8548_v30 = vld [vmem:[%s11496_s1 + $0x17b0] ss:$8 sps:$4 sm:$0xff]  }
 0x2c4   :  { %v5689_v32 = vpop.f32.mrf.mxu0  ;;  %v5728_v33 = vpop.f32.mrf.mxu1  ;;  %5973 = vmatmul.mubr.bf16.vlgmr.msra.gmra.mxu1 %v356_v27  ;;  %5983 = vmatprep.subr.bf16.mxu0 %v8481_v28  ;;  %v8539_v25 = vld [vmem:[%s11496_s1 + $0x16c0] ss:$8 sps:$4 sm:$0xff]   ;;  %v8550_v28 = vld [vmem:[%s11496_s1 + $0x17b4] ss:$8 sps:$4 sm:$0xff]  }
 0x2c5   :  { %v5690_v35 = vadd.f32 %v5689_v32, %v10896_v55  ;;  %v11103_v16 = vadd.f32 %v5728_v33, %v5688_v47  ;;  %6023 = vmatpush1.bf16.msra.mxu1 %v8476_v44  ;;  %6054 = vmatprep.mubr.bf16.mxu1 %v361_v29  ;;  %v8485_v55 = vld [vmem:[%s11496_s1 + $0x1650] ss:$8 sps:$4 sm:$0xff]   ;;  %v8542_v27 = vld [vmem:[%s11496_s1 + $0x17c0] ss:$8 sps:$4 sm:$0xff]   ;;  %v8553_v29 = vld [vmem:[%s11496_s1 + $0x16a4] ss:$8 sps:$4 sm:$0xff]  }
 0x2c6   :  { %v5691_v37 = vpop.f32.mrf.mxu0  ;;  %v5730_v38 = vpop.f32.mrf.mxu1  ;;  %6024 = vmatprep.subr.bf16.mxu1 %v8484_v31  ;;  %v8545_v44 = vld [vmem:[%s11496_s1 + $0x16b0] ss:$8 sps:$4 sm:$0xff]   ;;  %v8556_v31 = vld [vmem:[%s11496_s1 + $0x17a4] ss:$8 sps:$4 sm:$0xff]   ;;  %v8551_v47 = vld [vmem:[%s11496_s1 + $0x16a0] ss:$8 sps:$4 sm:$0xff]  }
 0x2c7   :  { %v11111_v21 = vadd.f32 %v5730_v38, %v5690_v35  ;;  %5984 = vmatpush1.bf16.msra.mxu0 %v8479_v46  ;;  %v8559_v46 = vld [vmem:[%s11496_s1 + $0x1694] ss:$8 sps:$4 sm:$0xff]   ;;  %v8554_v32 = vld [vmem:[%s11496_s1 + $0x17a0] ss:$8 sps:$4 sm:$0xff]   ;;  %v8565_v35 = vld [vmem:[%s11496_s1 + $0x1684] ss:$8 sps:$4 sm:$0xff]  }
 0x2c8   :  { %v5692_v23 = vpop.f32.mrf.mxu0  ;;  %5985 = vmatprep.subr.bf16.mxu0 %v8487_v52  ;;  %v5732_v45 = vpop.f32.mrf.mxu1  ;;  %v8562_v33 = vld [vmem:[%s11496_s1 + $0x1794] ss:$8 sps:$4 sm:$0xff]   ;;  %v8557_v52 = vld [vmem:[%s11496_s1 + $0x1690] ss:$8 sps:$4 sm:$0xff]   ;;  %v8568_v37 = vld [vmem:[%s11496_s1 + $0x1784] ss:$8 sps:$4 sm:$0xff]  }
 0x2c9   :  { %6025 = vmatpush1.bf16.msra.mxu1 %v8482_v6  ;;  %v8560_v6 = vld [vmem:[%s11496_s1 + $0x1790] ss:$8 sps:$4 sm:$0xff]   ;;  %v8563_v38 = vld [vmem:[%s11496_s1 + $0x1680] ss:$8 sps:$4 sm:$0xff]   ;;  %v358_v23 = vpack.c.bf16 %v11049_v8, %v11049_v8  ;;  %v360_v45 = vpack.c.bf16 %v11058_v40, %v11058_v40  ;;  %v8578_v40 = vld [vmem:[%s11496_s1 + $0x1854] ss:$8 sps:$4 sm:$0xff]  }
 0x2ca   :  { %6026 = vmatprep.subr.bf16.mxu1 %v8490_v53  ;;  %v5733_v18 = vpop.f32.mrf.mxu1  ;;  %v8571_v53 = vld [vmem:[%s11496_s1 + $0x1874] ss:$8 sps:$4 sm:$0xff]   ;;  %v8573_v8 = vld [vmem:[%s11496_s1 + $0x1860] ss:$8 sps:$4 sm:$0xff]  }
 0x2cb   :  { %5986 = vmatpush1.bf16.msra.mxu0 %v8485_v55  ;;  %v8566_v55 = vld [vmem:[%s11496_s1 + $0x1780] ss:$8 sps:$4 sm:$0xff]  }
 0x2cc   :  { %5987 = vmatprep.subr.bf16.mxu0 %v8493_v42  ;;  %v8569_v42 = vld [vmem:[%s11496_s1 + $0x1870] ss:$8 sps:$4 sm:$0xff]  }
 0x2cd   :  { %6027 = vmatpush1.bf16.msra.mxu1 %v8488_v12  ;;  %v8575_v12 = vld [vmem:[%s11496_s1 + $0x1864] ss:$8 sps:$4 sm:$0xff]  }
 0x2ce   :  { %6028 = vmatprep.subr.bf16.mxu1 %v8496_v49 }
 0x2cf   :  { %5988 = vmatpush1.bf16.msra.mxu0 %v8491_v54  ;;  %v8681_v54 = vmov 0  }
 0x2d0   :  { %5989 = vmatprep.subr.bf16.mxu0 %v8499_v34 }
 0x2d1   :  { %6029 = vmatpush1.bf16.msra.mxu1 %v8494_v39 }
 0x2d2   :  { %6030 = vmatprep.subr.bf16.mxu1 %v8502_v58 }
 0x2d3   :  { %5990 = vmatpush1.bf16.msra.mxu0 %v8497_v59 }
 0x2d4   :  { %5991 = vmatprep.subr.bf16.mxu0 %v8505_v60 }
 0x2d5   :  { %6031 = vmatpush1.bf16.msra.mxu1 %v8500_v61 }
 0x2d6   :  { %6032 = vmatprep.subr.bf16.mxu1 %v8508_v63  ;;  %v8576_v63 = vld [vmem:[%s11496_s1 + $0x1850] ss:$8 sps:$4 sm:$0xff]  }
 0x2d7   :  { %5992 = vmatpush1.bf16.msra.mxu0 %v8503_v0 }
 0x2d8   :  { %5993 = vmatprep.subr.bf16.mxu0 %v8511_v1  ;;  %v8581_v1 = vld [vmem:[%s11496_s1 + $0x1844] ss:$8 sps:$4 sm:$0xff]  }
 0x2d9   :  { %6033 = vmatpush1.bf16.msra.mxu1 %v8506_v10 }
 0x2da   :  { %6034 = vmatprep.subr.bf16.mxu1 %v8514_v2 }
 0x2db   :  { %5994 = vmatpush1.bf16.msra.mxu0 %v8509_v3  ;;  %v8596_v3 = vld [vmem:[%s11498_s3 + $0x74] ss:$8 sps:$4 sm:$0xff]  }
 0x2dc   :  { %5995 = vmatprep.subr.bf16.mxu0 %v8517_v14  ;;  %v8579_v14 = vld [vmem:[%s11496_s1 + $0x1840] ss:$8 sps:$4 sm:$0xff]  }
 0x2dd   :  { %6035 = vmatpush1.bf16.msra.mxu1 %v8512_v4  ;;  %v8599_v4 = vld [vmem:[%s11498_s3 + $0x64] ss:$8 sps:$4 sm:$0xff]  }
 0x2de   :  { %6036 = vmatprep.subr.bf16.mxu1 %v8520_v51  ;;  %v8584_v51 = vld [vmem:[%s11496_s1 + $0x1834] ss:$8 sps:$4 sm:$0xff]  }
 0x2df   :  { %5996 = vmatpush1.bf16.msra.mxu0 %v8515_v5  ;;  %v8597_v5 = vld [vmem:[%s11498_s3 + $0x60] ss:$8 sps:$4 sm:$0xff]  }
 0x2e0   :  { %5997 = vmatprep.subr.bf16.mxu0 %v8523_v36  ;;  %v8602_v36 = vld [vmem:[%s11498_s3 + $0x54] ss:$8 sps:$4 sm:$0xff]  }
 0x2e1   :  { %6037 = vmatpush1.bf16.msra.mxu1 %v8518_v19  ;;  %v8582_v19 = vld [vmem:[%s11496_s1 + $0x1830] ss:$8 sps:$4 sm:$0xff]  }
 0x2e2   :  { %6038 = vmatprep.subr.bf16.mxu1 %v8526_v56  ;;  %v8587_v56 = vld [vmem:[%s11496_s1 + $0x1824] ss:$8 sps:$4 sm:$0xff]  }
 0x2e3   :  { %5998 = vmatpush2.bf16.msra.mxu0 %v8521_v41  ;;  %v8600_v41 = vld [vmem:[%s11498_s3 + $0x50] ss:$8 sps:$4 sm:$0xff]  }
 0x2e4   :  { %5999 = vmatprep.subr.bf16.mxu0 %v8529_v7  ;;  %v8605_v7 = vld [vmem:[%s11498_s3 + $0x44] ss:$8 sps:$4 sm:$0xff]  }
 0x2e5   :  { %6039 = vmatpush2.bf16.msra.mxu1 %v8524_v9  ;;  %v8585_v9 = vld [vmem:[%s11496_s1 + $0x1820] ss:$8 sps:$4 sm:$0xff]  }
 0x2e6   :  { %6040 = vmatprep.subr.bf16.mxu1 %v8532_v13  ;;  %v8590_v13 = vld [vmem:[%s11496_s1 + $0x1814] ss:$8 sps:$4 sm:$0xff]  }
 0x2e7   :  { %6000 = vmatpush2.bf16.msra.mxu0 %v8527_v11  ;;  %v8603_v11 = vld [vmem:[%s11498_s3 + $0x40] ss:$8 sps:$4 sm:$0xff]  }
 0x2e8   :  { %6001 = vmatprep.subr.bf16.mxu0 %v8535_v50  ;;  %v8608_v50 = vld [vmem:[%s11498_s3 + $0x34] ss:$8 sps:$4 sm:$0xff]  }
 0x2e9   :  { %6041 = vmatpush2.bf16.msra.mxu1 %v8530_v15  ;;  %v8588_v15 = vld [vmem:[%s11496_s1 + $0x1810] ss:$8 sps:$4 sm:$0xff]  }
 0x2ea   :  { %6042 = vmatprep.subr.bf16.mxu1 %v8538_v17  ;;  %v8593_v17 = vld [vmem:[%s11496_s1 + $0x1804] ss:$8 sps:$4 sm:$0xff]  }
 0x2eb   :  { %6002 = vmatpush2.bf16.msra.mxu0 %v8533_v48  ;;  %v8606_v48 = vld [vmem:[%s11498_s3 + $0x30] ss:$8 sps:$4 sm:$0xff]  }
 0x2ec   :  { %6003 = vmatprep.subr.bf16.mxu0 %v8541_v20  ;;  %v8611_v20 = vld [vmem:[%s11498_s3 + $0x24] ss:$8 sps:$4 sm:$0xff]  }
 0x2ed   :  { %6043 = vmatpush2.bf16.msra.mxu1 %v8536_v22  ;;  %v8591_v22 = vld [vmem:[%s11496_s1 + $0x1800] ss:$8 sps:$4 sm:$0xff]  }
 0x2ee   :  { %6044 = vmatprep.subr.bf16.mxu1 %v8544_v24  ;;  %v6547_v24 = vld.sshfl [vmem:[%s11495_s0 + $0x60] sm:$0x3 pattern:$0x76325410] }
 0x2ef   :  { %6004 = vmatpush2.bf16.msra.mxu0 %v8539_v25  ;;  %v8609_v25 = vld [vmem:[%s11498_s3 + $0x20] ss:$8 sps:$4 sm:$0xff]  }
 0x2f0   :  { %6005 = vmatprep.subr.bf16.mxu0 %v8547_v26  ;;  %v362_v26 = vpack.c.bf16 %v6547_v24, %v6547_v24 }
 0x2f1   :  { %6045 = vmatpush2.bf16.msra.mxu1 %v8542_v27 }
 0x2f2   :  { %6046 = vmatprep.subr.bf16.mxu1 %v8550_v28  ;;  %v8614_v28 = vld [vmem:[%s11498_s3 + $0x14] ss:$8 sps:$4 sm:$0xff]  }
 0x2f3   :  { %6006 = vmatpush2.bf16.msra.mxu0 %v8545_v44 }
 0x2f4   :  { %6007 = vmatprep.subr.bf16.mxu0 %v8553_v29  ;;  %v8612_v29 = vld [vmem:[%s11498_s3 + $0x10] ss:$8 sps:$4 sm:$0xff]  }
 0x2f5   :  { %6047 = vmatpush2.bf16.msra.mxu1 %v8548_v30 }
 0x2f6   :  { %6048 = vmatprep.subr.bf16.mxu1 %v8556_v31 }
 0x2f7   :  { %6008 = vmatpush2.bf16.msra.mxu0 %v8551_v47 }
 0x2f8   :  { %6009 = vmatprep.subr.bf16.mxu0 %v8559_v46 }
 0x2f9   :  { %6049 = vmatpush2.bf16.msra.mxu1 %v8554_v32 }
 0x2fa   :  { %6050 = vmatprep.subr.bf16.mxu1 %v8562_v33 }
 0x2fb   :  { %6010 = vmatpush2.bf16.msra.mxu0 %v8557_v52  ;;  %v8617_v52 = vld [vmem:[%s11498_s3 + $0x4] ss:$8 sps:$4 sm:$0xff]  }
 0x2fc   :  { %6011 = vmatprep.subr.bf16.mxu0 %v8565_v35 }
 0x2fd   :  { %6051 = vmatpush2.bf16.msra.mxu1 %v8560_v6  ;;  %v8615_v6 = vld [vmem:[%s11498_s3] ss:$8 sps:$4 sm:$0xff]  }
 0x2fe   :  { %6052 = vmatprep.subr.bf16.mxu1 %v8568_v37 }
 0x2ff   :  { %6012 = vmatpush2.bf16.msra.mxu0 %v8563_v38 }
 0x300   :  { %6063 = vmatprep.subr.bf16.mxu0 %v8571_v53  ;;  %v8620_v53 = vld [vmem:[%s11498_s3 + $0xf4] ss:$8 sps:$4 sm:$0xff]  }
 0x301   :  { %6053 = vmatpush2.bf16.msra.mxu1 %v8566_v55  ;;  %v8618_v55 = vld [vmem:[%s11498_s3 + $0xf0] ss:$8 sps:$4 sm:$0xff]  }
 0x302   :  { %v5769_v49 = vpop.f32.mrf.mxu0  ;;  %6014 = vmatmul.mubr.bf16.vlgmr.msra.gmra.mxu0 %v358_v23  ;;  %6312 = vmatprep.subr.bf16.mxu1 %v8596_v3  ;;  %v8649_v3 = vld [vmem:[%s11500_s5 + $0x20] sm:$0xff]  }
 0x303   :  { %v5770_v18 = vadd.f32 %v5769_v49, %v11103_v16  ;;  %6064 = vmatpush1.bf16.msra.mxu0 %v8569_v42  ;;  %6095 = vmatprep.mubr.bf16.mxu0 %v8681_v54  ;;  %v8623_v42 = vld [vmem:[%s11498_s3 + $0xe4] ss:$8 sps:$4 sm:$0xff]   ;;  %v8624_v49 = vld [vmem:[%s11498_s3 + $0xd0] ss:$8 sps:$4 sm:$0xff]   ;;  %v8632_v54 = vld [vmem:[%s11498_s3 + $0xb4] ss:$8 sps:$4 sm:$0xff]  }
 0x304   :  { %v5771_v34 = vpop.f32.mrf.mxu0  ;;  %v5810_v39 = vpop.f32.mrf.mxu1  ;;  %6055 = vmatmul.mubr.bf16.vlgmr.msra.gmra.mxu1 %v360_v45  ;;  %6065 = vmatprep.subr.bf16.mxu0 %v8575_v12  ;;  %v8621_v45 = vld [vmem:[%s11498_s3 + $0xe0] ss:$8 sps:$4 sm:$0xff]   ;;  %v8626_v12 = vld [vmem:[%s11498_s3 + $0xd4] ss:$8 sps:$4 sm:$0xff]  }
 0x305   :  { %v5772_v58 = vadd.f32 %v5771_v34, %v11111_v21  ;;  %v5811_v59 = vadd.f32 %v5810_v39, %v5770_v18  ;;  %v8594_v21 = vld [vmem:[%s11498_s3 + $0x70] ss:$8 sps:$4 sm:$0xff]   ;;  %v8629_v18 = vld [vmem:[%s11498_s3 + $0xc4] ss:$8 sps:$4 sm:$0xff]  }
 0x306   :  { %v5773_v60 = vpop.f32.mrf.mxu0  ;;  %v5812_v16 = vpop.f32.mrf.mxu1  ;;  %6313 = vmatpush1.bf16.msra.mxu1 %v8594_v21  ;;  %v8630_v34 = vld [vmem:[%s11498_s3 + $0xb0] ss:$8 sps:$4 sm:$0xff]   ;;  %v8635_v39 = vld [vmem:[%s11498_s3 + $0xa4] ss:$8 sps:$4 sm:$0xff]  }
 0x307   :  { %v5813_v61 = vadd.f32 %v5812_v16, %v5772_v58  ;;  %6066 = vmatpush1.bf16.msra.mxu0 %v8573_v8  ;;  %6314 = vmatprep.subr.bf16.mxu1 %v8599_v4  ;;  %v8627_v8 = vld [vmem:[%s11498_s3 + $0xc0] ss:$8 sps:$4 sm:$0xff]   ;;  %v8638_v58 = vld [vmem:[%s11498_s3 + $0x94] ss:$8 sps:$4 sm:$0xff]   ;;  %v8641_v60 = vld [vmem:[%s11498_s3 + $0x84] ss:$8 sps:$4 sm:$0xff]  }
 0x308   :  { %v5774_v0 = vpop.f32.mrf.mxu0  ;;  %6067 = vmatprep.subr.bf16.mxu0 %v8578_v40  ;;  %v5814_v10 = vpop.f32.mrf.mxu1  ;;  %v8633_v40 = vld [vmem:[%s11498_s3 + $0xa0] ss:$8 sps:$4 sm:$0xff]   ;;  %v8651_v4 = vld [vmem:[%s11500_s5 + $0x18] sm:$0xff]  }
 0x309   :  { %v8639_v16 = vld [vmem:[%s11498_s3 + $0x80] ss:$8 sps:$4 sm:$0xff]   ;;  %v8644_v0 = vld [vmem:[%s11500_s5 + $0x70] sm:$0xff]  }
 0x30a   :  { %v5815_v2 = vpop.f32.mrf.mxu1  ;;  %6315 = vmatpush1.bf16.msra.mxu1 %v8597_v5  ;;  %v8646_v10 = vld [vmem:[%s11500_s5 + $0x68] sm:$0xff]   ;;  %v8648_v21 = vld [vmem:[%s11500_s5 + $0x60] sm:$0xff]   ;;  %v8653_v5 = vld [vmem:[%s11500_s5 + $0x10] sm:$0xff]  }
 0x30b   :  { %6068 = vmatpush1.bf16.msra.mxu0 %v8576_v63  ;;  %6316 = vmatprep.subr.bf16.mxu1 %v8602_v36  ;;  %v8643_v63 = vld [vmem:[%s11500_s5 + $0x38] sm:$0xff]   ;;  %v8647_v2 = vld [vmem:[%s11500_s5 + $0x28] sm:$0xff]  }
 0x30c   :  { %6069 = vmatprep.subr.bf16.mxu0 %v8581_v1  ;;  %v8645_v1 = vld [vmem:[%s11500_s5 + $0x30] sm:$0xff]  }
 0x30e   :  { %6317 = vmatpush1.bf16.msra.mxu1 %v8600_v41 }
 0x30f   :  { %6070 = vmatpush1.bf16.msra.mxu0 %v8579_v14  ;;  %6318 = vmatprep.subr.bf16.mxu1 %v8605_v7  ;;  %v8650_v14 = vld [vmem:[%s11500_s5 + $0x58] sm:$0xff]  }
 0x310   :  { %6071 = vmatprep.subr.bf16.mxu0 %v8584_v51  ;;  %v8652_v51 = vld [vmem:[%s11500_s5 + $0x50] sm:$0xff]  }
 0x312   :  { %6319 = vmatpush1.bf16.msra.mxu1 %v8603_v11 }
 0x313   :  { %6072 = vmatpush1.bf16.msra.mxu0 %v8582_v19  ;;  %6320 = vmatprep.subr.bf16.mxu1 %v8608_v50 }
 0x314   :  { %6073 = vmatprep.subr.bf16.mxu0 %v8587_v56 }
 0x316   :  { %6321 = vmatpush1.bf16.msra.mxu1 %v8606_v48 }
 0x317   :  { %6074 = vmatpush1.bf16.msra.mxu0 %v8585_v9  ;;  %6322 = vmatprep.subr.bf16.mxu1 %v8611_v20 }
 0x318   :  { %6075 = vmatprep.subr.bf16.mxu0 %v8590_v13 }
 0x31a   :  { %6323 = vmatpush1.bf16.msra.mxu1 %v8609_v25 }
 0x31b   :  { %6076 = vmatpush1.bf16.msra.mxu0 %v8588_v15  ;;  %6324 = vmatprep.subr.bf16.mxu1 %v8614_v28 }
 0x31c   :  { %6077 = vmatprep.subr.bf16.mxu0 %v8593_v17 }
 0x31e   :  { %6325 = vmatpush1.bf16.msra.mxu1 %v8612_v29 }
 0x31f   :  { %6078 = vmatpush1.bf16.msra.mxu0 %v8591_v22  ;;  %6326 = vmatprep.subr.bf16.mxu1 %v8617_v52 }
 0x322   :  { %6096 = vmatmul.mubr.bf16.vlgmr.msra.gmra.mxu0 %v362_v26  ;;  %6327 = vmatpush1.bf16.msra.mxu1 %v8615_v6 }
 0x323   :  { %6328 = vmatprep.subr.bf16.mxu1 %v8620_v53 }
 0x326   :  { %6329 = vmatpush2.bf16.msra.mxu1 %v8618_v55 }
 0x327   :  { %6330 = vmatprep.subr.bf16.mxu1 %v8623_v42  ;;  %v8655_v42 = vld [vmem:[%s11500_s5 + $0x8] sm:$0xff]  }
 0x32a   :  { %6331 = vmatpush2.bf16.msra.mxu1 %v8621_v45  ;;  %v8656_v45 = vld [vmem:[%s11500_s5 + $0x40] sm:$0xff]  }
 0x32b   :  { %6332 = vmatprep.subr.bf16.mxu1 %v8626_v12  ;;  %v8657_v12 = vld [vmem:[%s11500_s5] sm:$0xff]  }
 0x32e   :  { %6333 = vmatpush2.bf16.msra.mxu1 %v8624_v49  ;;  %v6140_v49 = vld [vmem:[%s11499_s4] sm:$0x3] }
 0x32f   :  { %6334 = vmatprep.subr.bf16.mxu1 %v8629_v18  ;;  %v6145_v18 = vrot.slane %v6140_v49, %v1151_v57  ;;  %v7364_v57 = vld [vmem:[%s11501_s6] ss:$0 sm:$0xff] }
 0x332   :  { %6335 = vmatpush2.bf16.msra.mxu1 %v8627_v8  ;;  %v6149_v8 = vrot.slane %v6140_v49, %v1155_v62 }
 0x333   :  { %6336 = vmatprep.subr.bf16.mxu1 %v8632_v54 }
 0x336   :  { %6337 = vmatpush2.bf16.msra.mxu1 %v8630_v34 }
 0x337   :  { %6338 = vmatprep.subr.bf16.mxu1 %v8635_v39 }
 0x33a   :  { %6339 = vmatpush2.bf16.msra.mxu1 %v8633_v40 }
 0x33b   :  { %6340 = vmatprep.subr.bf16.mxu1 %v8638_v58 }
 0x342   :  { %v5851_v27 = vpop.f32.mrf.mxu0 }
 0x343   :  { %v5852_v44 = vadd.f32 %v5851_v27, %v5811_v59  ;;  %v8636_v59 = vld [vmem:[%s11498_s3 + $0x90] ss:$8 sps:$4 sm:$0xff]   ;;  %s6539_s3 = sshll.u32 %s8682_s29, 4  ;;  %s6540_s3 = int_to_ptr.vmem [resolvable:$true] %s6539_s3 }
 0x344   :  { %v5853_v30 = vpop.f32.mrf.mxu0  ;;  %v5892_v31 = vpop.f32.mrf.mxu1  ;;  %6341 = vmatpush2.bf16.msra.mxu1 %v8636_v59  ;;  %s8658_s30 = scalar_lea.vmem %s6540_s3, 32  ;;  %p8663_p1 = scmp.lt.s32.totalorder %s6540_s3, %s6540_s3 }
 0x345   :  { %v5854_v47 = vadd.f32 %v5853_v30, %v5813_v61  ;;  %v11374_v46 = vadd.f32 %v5892_v31, %v5852_v44  ;;  %6342 = vmatprep.subr.bf16.mxu1 %v8641_v60  ;;  %v8642_v61 = vld [vmem:[%s11500_s5 + $0x78] sm:$0xff]   ;;  %p8659_p0 = scmp.ne.s32.totalorder %s6540_s3, %s8658_s30  ;;  %p8664_p2 = scmp.lt.s32.totalorder %s8658_s30, %s8658_s30 }
 0x346   :  { %v5855_v32 = vpop.f32.mrf.mxu0  ;;  %v5894_v33 = vpop.f32.mrf.mxu1  ;;  %7381 = vmatprep.subr.bf16.mxu0 %v8642_v61 }
 0x347   :  { %v11379_v35 = vadd.f32 %v5894_v33, %v5854_v47  ;;  %7382 = vmatpush3.bf16.msra.mxu0 %v8643_v63  ;;  %p8665_p3 = por %p8664_p2, %p8663_p1 }
 0x348   :  { %v5856_v37 = vpop.f32.mrf.mxu0  ;;  %v5896_v38 = vpop.f32.mrf.mxu1  ;;  %6343 = vmatpush2.bf16.msra.mxu1 %v8639_v16  ;;  %7383 = vmatprep.subr.bf16.mxu0 %v8644_v0 }
 0x349   :  { %p8666_p4 = pnand %p8665_p3, %p8659_p0 }
 0x34a   :  { %v5897_v23 = vpop.f32.mrf.mxu1 }
 0x34b   :  { %7384 = vmatpush3.bf16.msra.mxu0 %v8645_v1  ;;  %v8654_v23 = vld [vmem:[%s11500_s5 + $0x48] sm:$0xff]  }
 0x34c   :  { %7385 = vmatprep.subr.bf16.mxu0 %v8646_v10 }
 0x34f   :  { %7386 = vmatpush3.bf16.msra.mxu0 %v8647_v2 }
 0x350   :  { %7387 = vmatprep.subr.bf16.mxu0 %v8648_v21 }
 0x353   :  { %7388 = vmatpush3.bf16.msra.mxu0 %v8649_v3 }
 0x354   :  { %7389 = vmatprep.subr.bf16.mxu0 %v8650_v14 }
 0x357   :  { %7390 = vmatpush3.bf16.msra.mxu0 %v8651_v4 }
 0x358   :  { %7391 = vmatprep.subr.bf16.mxu0 %v8652_v51 }
 0x35b   :  { %7392 = vmatpush3.bf16.msra.mxu0 %v8653_v5 }
 0x35c   :  { %7393 = vmatprep.subr.bf16.mxu0 %v8654_v23 }
 0x35f   :  { %7394 = vmatpush3.bf16.msra.mxu0 %v8655_v42 }
 0x360   :  { %7395 = vmatprep.subr.bf16.mxu0 %v8656_v45 }
 0x363   :  { %7396 = vmatpush3.bf16.msra.mxu0 %v8657_v12 }
 0x382   :  { %v5933_v36 = vpop.f32.mrf.mxu0 }
 0x383   :  { %v5934_v19 = vadd.f32 %v5933_v36, %v11374_v46 }
 0x384   :  { %v5935_v56 = vpop.f32.mrf.mxu0  ;;  %v5974_v41 = vpop.f32.mrf.mxu1 }
 0x385   :  { %v5936_v7 = vadd.f32 %v5935_v56, %v11379_v35  ;;  %v5975_v9 = vadd.f32 %v5974_v41, %v5934_v19 }
 0x386   :  { %v5937_v13 = vpop.f32.mrf.mxu0  ;;  %v5976_v11 = vpop.f32.mrf.mxu1 }
 0x387   :  { %v5977_v50 = vadd.f32 %v5976_v11, %v5936_v7 }
 0x388   :  { %v5938_v15 = vpop.f32.mrf.mxu0  ;;  %v5978_v17 = vpop.f32.mrf.mxu1 }
 0x38a   :  { %v5979_v48 = vpop.f32.mrf.mxu1 }
 0x3c2   :  { %v6015_v20 = vpop.f32.mrf.mxu0 }
 0x3c3   :  { %v6016_v29 = vadd.f32 %v6015_v20, %v5975_v9 }
 0x3c4   :  { %v6017_v22 = vpop.f32.mrf.mxu0  ;;  %v6056_v24 = vpop.f32.mrf.mxu1 }
 0x3c5   :  { %v6018_v30 = vadd.f32 %v6017_v22, %v5977_v50  ;;  %v6057_v31 = vadd.f32 %v6056_v24, %v6016_v29 }
 0x3c6   :  { %v6019_v25 = vpop.f32.mrf.mxu0  ;;  %v6058_v26 = vpop.f32.mrf.mxu1 }
 0x3c7   :  { %v6059_v46 = vadd.f32 %v6058_v26, %v6018_v30 }
 0x3c8   :  { %v6020_v27 = vpop.f32.mrf.mxu0  ;;  %v6060_v28 = vpop.f32.mrf.mxu1 }
 0x3ca   :  { %v6061_v44 = vpop.f32.mrf.mxu1 }
 0x3e2   :  { %v6097_v47 = vpop.f32.mrf.mxu0 }
 0x3e3   :  { %v6098_v32 = vadd.f32 %v6097_v47, %v6057_v31 }
 0x3e4   :  { %v6099_v33 = vpop.f32.mrf.mxu0 }
 0x3e5   :  { %v6100_v52 = vadd.f32 %v6099_v33, %v6059_v46  ;;  %v6104_v35 = vmax.f32 %v6098_v32, 0.0 }
 0x3e6   :  { %v6101_v6 = vpop.f32.mrf.mxu0 }
 0x3e7   :  { %v6105_v37 = vmax.f32 %v6100_v52, 0.0  ;;  %v6106_v55 = vpack.c.bf16 %v6104_v35, %v6104_v35 }
 0x3e8   :  { %v6102_v38 = vpop.f32.mrf.mxu0 }
 0x3e9   :  { %v6107_v53 = vpack.c.bf16 %v6105_v37, %v6105_v37 }
 0x3eb   :  { %6344 = vmatprep.mubr.bf16.mxu1 %v6107_v53 }
 0x3ec   :  { %6345 = vmatmul.mubr.bf16.vlgmr.msra.gmra.mxu1 %v6106_v55 }
 0x4ac   :  { %v6346_v54 = vpop.f32.mrf.mxu1 }
 0x4ad   :  { %v6347_v34 = vadd.f32 %v6346_v54, %v6145_v18 }
 0x4ae   :  { %v6348_v39 = vpop.f32.mrf.mxu1 }
 0x4af   :  { %v6349_v40 = vadd.f32 %v6348_v39, %v6149_v8  ;;  %v6353_v58 = vmax.f32 %v6347_v34, 0.0 }
 0x4b0   :  { %v6350_v59 = vpop.f32.mrf.mxu1 }
 0x4b1   :  { %v6354_v60 = vmax.f32 %v6349_v40, 0.0  ;;  %v6355_v63 = vpack.c.bf16 %v6353_v58, %v6353_v58 }
 0x4b2   :  { %v6351_v16 = vpop.f32.mrf.mxu1 }
 0x4b3   :  { %v6356_v61 = vpack.c.bf16 %v6354_v60, %v6354_v60 }
 0x4b5   :  { %6524 = vmatprep.mubr.bf16.mxu0 %v6356_v61 }
 0x4b6   :  { %6525 = vmatmul.mubr.bf16.vlgmr.msra.gmra.mxu0 %v6355_v63 }
 0x576   :  { %v7397_v0 = vpop.f32.mrf.mxu0 }
 0x578   :  { %v7398_v1 = vpop.f32.mrf.mxu0 }
 0x579   :  { %v7399_v43 = vadd.f32 %v7398_v1, %v7397_v0 }
 0x57a   :  { %v7400_v62 = vpop.f32.mrf.mxu0 }
 0x57b   :  { %v6527_v10 = vadd.f32 %v7399_v43, %v7364_v57 }
 0x57c   :  { %v7401_v2 = vpop.f32.mrf.mxu0 }
 0x57d   :  { %6532 = vst [vmem:[#allocation2] sm:$0x3] %v6527_v10 }
 0x57e   :  { %8669 = shalt.err (!%p8666_p4)
}
 0x57f   :  { %6542 = dma.vmem_to_hbm [thread:$0]  %s6540_s3, 32, %s11502_s7, [#allocation3]  }
 0x580   :  { %8678 = dma.done.wait [#allocation3], 32  }
 0x581   :  { %8679 = vsyncadd [#allocation3], 4294967264 }
 0x582   :  { %6546 = vsyncpa [#allocation3], 1 }

</bundles_post_ra>
